<compile_context>
chip_gen: v7x
topology: tpu7x:2x2x1
jax: 0.10.0
libtpu: 0.0.40
codegen_flags: <defaults>
</compile_context>

<pallas_src>
import functools

import numpy as np
import jax
import jax.numpy as jnp
from jax.experimental import pallas as pl
from jax.experimental.pallas import tpu as pltpu


# ----------------------------------------------------------------------------
# Pallas kernel 1: fused fc1 + fc2 head   out = relu(relu(z@W1+b1) @ W2 + b2)
# ----------------------------------------------------------------------------
def _fc_head_kernel(z_ref, w1_ref, b1_ref, w2_ref, b2_ref, o_ref):
    h = jnp.dot(z_ref[...], w1_ref[...], preferred_element_type=jnp.float32)
    h = jnp.maximum(h + b1_ref[...], 0.0)                       # (B,256) f32
    y = jnp.dot(h.astype(jnp.bfloat16), w2_ref[...],
                preferred_element_type=jnp.float32)
    y = jnp.maximum(y + b2_ref[...], 0.0)                       # (B,3136) f32
    o_ref[...] = y.astype(o_ref.dtype)


def fc_head(z_bf16, w1, b1, w2, b2):
    """z:(B,L) bf16, w1:(L,H1) bf16, b1:(1,H1) f32, w2:(H1,N) bf16, b2:(1,N) f32
    -> (B,N) bf16, lane-dense (N=3136)."""
    B, L = z_bf16.shape
    H1 = w1.shape[1]
    N = w2.shape[1]
    return pl.pallas_call(
        _fc_head_kernel,
        out_shape=jax.ShapeDtypeStruct((B, N), jnp.bfloat16),
        grid=(1,),
        in_specs=[
            pl.BlockSpec((B, L), lambda i: (0, 0)),
            pl.BlockSpec((L, H1), lambda i: (0, 0)),
            pl.BlockSpec((1, H1), lambda i: (0, 0)),
            pl.BlockSpec((H1, N), lambda i: (0, 0)),
            pl.BlockSpec((1, N), lambda i: (0, 0)),
        ],
        out_specs=pl.BlockSpec((B, N), lambda i: (0, 0)),
        compiler_params=pltpu.CompilerParams(dimension_semantics=("arbitrary",)),
    )(z_bf16, w1, b1, w2, b2)


# ----------------------------------------------------------------------------
# Pallas kernel 2: transposed (lane-dense) deconv GEMM
#   Y^T = act(W^T @ cols^T + b),  shapes (Cout,K)@(K,M) -> (Cout,M), M = B*Ho*Wo
# ----------------------------------------------------------------------------
def _deconv_gemm_kernel(wt_ref, x_ref, b_ref, o_ref, *, act):
    y = jnp.dot(wt_ref[...], x_ref[...], preferred_element_type=jnp.float32)
    y = y + b_ref[...]                              # (Cout,M) + (Cout,1)
    if act == "relu":
        y = jnp.maximum(y, 0.0)
    elif act == "sigmoid":
        # EUP exp + approx reciprocal (keeps the VALU slots free)
        y = pl.reciprocal(1.0 + jnp.exp(-y), approx=True)
    o_ref[...] = y.astype(o_ref.dtype)


def _pick_m_tile(M):
    """Tile M (lane dim) only when it is a large multiple of 128 (v7x path)."""
    if M % 128 != 0:
        return M
    for tm in (2048, 1024, 512, 256):
        if M % tm == 0 and M > tm:
            return tm
    return M


def deconv_gemm(wt, cols_t, b, act, out_dtype):
    """wt:(Cout,K) bf16, cols_t:(K,M) bf16, b:(Cout,1) f32 -> (Cout,M) out_dtype."""
    Cout, K = wt.shape
    K2, M = cols_t.shape
    assert K == K2
    tm = _pick_m_tile(M)
    grid = (M // tm,)
    return pl.pallas_call(
        functools.partial(_deconv_gemm_kernel, act=act),
        out_shape=jax.ShapeDtypeStruct((Cout, M), out_dtype),
        grid=grid,
        in_specs=[
            pl.BlockSpec((Cout, K), lambda i: (0, 0)),
            pl.BlockSpec((K, tm), lambda i: (0, i)),
            pl.BlockSpec((Cout, 1), lambda i: (0, 0)),
        ],
        out_specs=pl.BlockSpec((Cout, tm), lambda i: (0, i)),
        compiler_params=pltpu.CompilerParams(dimension_semantics=("parallel",)),
    )(wt, cols_t, b)


# ----------------------------------------------------------------------------
# XLA glue: transposed im2col for ConvTranspose2d(K=4, stride=2, padding=1)
#   input  x : (Cin, B, H, W)   (channel-major, bf16)
#   output   : (Cin*K*K, B*Ho*Wo)   — directly the lane-dense GEMM RHS
# ----------------------------------------------------------------------------
def im2col_t(x, K=4, stride=2, padding=1):
    cin, b, h, w = x.shape
    ho = (h - 1) * stride - 2 * padding + K
    wo = (w - 1) * stride - 2 * padding + K
    hd, wd = (h - 1) * stride + 1, (w - 1) * stride + 1
    xd = jnp.zeros((cin, b, hd, wd), x.dtype).at[:, :, ::stride, ::stride].set(x)
    p = K - 1 - padding
    xp = jnp.pad(xd, ((0, 0), (0, 0), (p, p), (p, p)))
    cols = jnp.stack(
        [xp[:, :, ky:ky + ho, kx:kx + wo] for ky in range(K) for kx in range(K)],
        axis=1,
    )                                               # (Cin, K*K, B, Ho, Wo)
    return cols.reshape(cin * K * K, b * ho * wo), ho, wo


# ----------------------------------------------------------------------------
# Full decoder forward (takes PREPARED params)
# ----------------------------------------------------------------------------
def vae_decoder_forward(z, p):
    B = z.shape[0]

    # fused fc1 + fc2  ->  (B, 3136) bf16
    h = fc_head(z.astype(jnp.bfloat16), p["w1"], p["b1"], p["w2"], p["b2"])

    # torch .view(B,64,7,7) then go channel-major: (64, B, 7, 7)
    x = h.reshape(B, 64, 7, 7).transpose(1, 0, 2, 3)

    # deconv1: (64, B,7,7) -> (32, B*14*14), relu, bf16 out (feeds next glue)
    cols1, ho1, wo1 = im2col_t(x)
    y1 = deconv_gemm(p["wt1"], cols1, p["bd1"], "relu", jnp.bfloat16)
    y1 = y1.reshape(32, B, ho1, wo1)

    # deconv2: (32, B,14,14) -> (1, B*28*28), sigmoid, f32 out
    cols2, ho2, wo2 = im2col_t(y1)
    y2 = deconv_gemm(p["wt2"], cols2, p["bd2"], "sigmoid", jnp.float32)

    # single NCHW production at the very end: (B, 1, 28, 28)
    return y2.reshape(1, B, ho2, wo2).transpose(1, 0, 2, 3)


# ----------------------------------------------------------------------------
# Parameter init (torch layouts) + one-time preparation (outside jit)
# ----------------------------------------------------------------------------
def init_params(key, latent_dim):
    ks = jax.random.split(key, 8)

    def u(k, shape, fan_in):
        bound = 1.0 / np.sqrt(fan_in)
        return jax.random.uniform(k, shape, jnp.float32, -bound, bound)

    return {
        # Linear weights stored already transposed: (in, out)
        "w1": u(ks[0], (latent_dim, 256), latent_dim),
        "b1": u(ks[1], (256,), latent_dim),
        "w2": u(ks[2], (256, 64 * 7 * 7), 256),
        "b2": u(ks[3], (64 * 7 * 7,), 256),
        # ConvTranspose2d weights in torch layout (Cin, Cout, K, K)
        "wd1": u(ks[4], (64, 32, 4, 4), 64 * 16),
        "bd1": u(ks[5], (32,), 64 * 16),
        "wd2": u(ks[6], (32, 1, 4, 4), 32 * 16),
        "bd2": u(ks[7], (1,), 32 * 16),
    }


def prepare_params(raw):
    """Precompute correlation-form transposed deconv weights, bias reshapes and
    bf16 casts ONCE (not inside the jitted forward)."""
    def deconv_wt(w):                      # (Cin,Cout,K,K) -> (Cout, Cin*K*K)
        cin, cout, K, _ = w.shape
        wf = jnp.flip(w, (2, 3)).transpose(1, 0, 2, 3)      # (Cout,Cin,K,K)
        return wf.reshape(cout, cin * K * K).astype(jnp.bfloat16)

    return {
        "w1": raw["w1"].astype(jnp.bfloat16),
        "b1": raw["b1"].reshape(1, -1).astype(jnp.float32),
        "w2": raw["w2"].astype(jnp.bfloat16),
        "b2": raw["b2"].reshape(1, -1).astype(jnp.float32),
        "wt1": deconv_wt(raw["wd1"]),
        "bd1": raw["bd1"].reshape(-1, 1).astype(jnp.float32),
        "wt2": deconv_wt(raw["wd2"]),
        "bd2": raw["bd2"].reshape(-1, 1).astype(jnp.float32),
    }


# ----------------------------------------------------------------------------
# Pure-numpy f64 reference for verification
# ----------------------------------------------------------------------------
def _ref_deconv(x, w, b, stride=2, padding=1):
    B, Cin, H, W = x.shape
    Cout, K = w.shape[1], w.shape[2]
    Hf = (H - 1) * stride + K
    Wf = (W - 1) * stride + K
    full = np.zeros((B, Cout, Hf, Wf), dtype=np.float64)
    for ky in range(K):
        for kx in range(K):
            contrib = np.einsum("bihw,io->bohw", x, w[:, :, ky, kx])
            full[:, :, ky:ky + (H - 1) * stride + 1:stride,
                       kx:kx + (W - 1) * stride + 1:stride] += contrib
    out = full[:, :, padding:Hf - padding, padding:Wf - padding]
    return out + b.reshape(1, Cout, 1, 1)


def _ref_forward(z, p):
    z = np.asarray(z, np.float64)
    w1, b1 = np.asarray(p["w1"], np.float64), np.asarray(p["b1"], np.float64)
    w2, b2 = np.asarray(p["w2"], np.float64), np.asarray(p["b2"], np.float64)
    x = np.maximum(z @ w1 + b1, 0.0)
    x = np.maximum(x @ w2 + b2, 0.0)
    x = x.reshape(z.shape[0], 64, 7, 7)
    x = np.maximum(_ref_deconv(x, np.asarray(p["wd1"], np.float64),
                               np.asarray(p["bd1"], np.float64)), 0.0)
    x = _ref_deconv(x, np.asarray(p["wd2"], np.float64),
                    np.asarray(p["bd2"], np.float64))
    return 1.0 / (1.0 + np.exp(-x))


# ----------------------------------------------------------------------------
if __name__ == "__main__":
    latent_dim = 32
    batch = 2
    key = jax.random.PRNGKey(0)
    kz, kp = jax.random.split(key)

    z = jax.random.normal(kz, (batch, latent_dim), jnp.float32)
    raw_params = init_params(kp, latent_dim)
    params = prepare_params(raw_params)          # one-time, outside jit

    fwd = jax.jit(vae_decoder_forward)
    out = jax.block_until_ready(fwd(z, params))

    assert out.shape == (batch, 1, 28, 28), out.shape
    assert out.dtype == jnp.float32, out.dtype

    ref = _ref_forward(np.asarray(z), raw_params)
    # bf16 MXU inputs -> looser tolerance than the previous f32 run
    np.testing.assert_allclose(np.asarray(out, np.float64), ref,
                               rtol=2e-2, atol=2e-2)

    print("KERNEL_OK")
</pallas_src>

<mosaic_0001>
module attributes {stable_mosaic.version = 11 : i64} {
  func.func @_fc_head_kernel(%arg0: i32, %arg1: memref<2x32xbf16, #tpu.memory_space<vmem>>, %arg2: memref<32x256xbf16, #tpu.memory_space<vmem>>, %arg3: memref<1x256xf32, #tpu.memory_space<vmem>>, %arg4: memref<256x3136xbf16, #tpu.memory_space<vmem>>, %arg5: memref<1x3136xf32, #tpu.memory_space<vmem>>, %arg6: memref<2x3136xbf16, #tpu.memory_space<vmem>>) attributes {dimension_semantics = [#tpu.dimension_semantics<arbitrary>], iteration_bounds = array<i64: 1>, scalar_prefetch = 0 : i64, scratch_operands = 0 : i64, tpu.core_type = #tpu.core_type<tc>, window_params = [{pipeline_mode = #tpu.pipeline_mode<synchronous>, transform_indices = @transform_0, window_bounds = array<i64: 2, 32>}, {pipeline_mode = #tpu.pipeline_mode<synchronous>, transform_indices = @transform_1, window_bounds = array<i64: 32, 256>}, {pipeline_mode = #tpu.pipeline_mode<synchronous>, transform_indices = @transform_2, window_bounds = array<i64: 1, 256>}, {pipeline_mode = #tpu.pipeline_mode<synchronous>, transform_indices = @transform_3, window_bounds = array<i64: 256, 3136>}, {pipeline_mode = #tpu.pipeline_mode<synchronous>, transform_indices = @transform_4, window_bounds = array<i64: 1, 3136>}, {pipeline_mode = #tpu.pipeline_mode<synchronous>, transform_indices = @transform_5, window_bounds = array<i64: 2, 3136>}]} {
    %c0 = arith.constant 0 : index
    %c0_0 = arith.constant 0 : index
    %0 = vector.load %arg1[%c0, %c0_0] : memref<2x32xbf16, #tpu.memory_space<vmem>>, vector<2x32xbf16>
    %c0_1 = arith.constant 0 : index
    %c0_2 = arith.constant 0 : index
    %1 = vector.load %arg2[%c0_1, %c0_2] : memref<32x256xbf16, #tpu.memory_space<vmem>>, vector<32x256xbf16>
    %cst = arith.constant dense<0.000000e+00> : vector<2x256xf32>
    %2 = tpu.matmul %0, %1, %cst {dimension_numbers = #tpu.dot_dimension_numbers<[1], [0], [0], [1], [0, 0, 1, 1], [], []>} : vector<2x32xbf16>, vector<32x256xbf16>, vector<2x256xf32> -> vector<2x256xf32>
    %c0_3 = arith.constant 0 : index
    %c0_4 = arith.constant 0 : index
    %3 = vector.load %arg3[%c0_3, %c0_4] : memref<1x256xf32, #tpu.memory_space<vmem>>, vector<1x256xf32>
    %4 = vector.broadcast %3 : vector<1x256xf32> to vector<2x256xf32>
    %5 = arith.addf %2, %4 : vector<2x256xf32>
    %cst_5 = arith.constant 0.000000e+00 : f32
    %6 = vector.broadcast %cst_5 : f32 to vector<2x256xf32>
    %7 = arith.maximumf %5, %6 : vector<2x256xf32>
    %8 = arith.truncf %7 : vector<2x256xf32> to vector<2x256xbf16>
    %c0_6 = arith.constant 0 : index
    %c0_7 = arith.constant 0 : index
    %9 = vector.load %arg4[%c0_6, %c0_7] : memref<256x3136xbf16, #tpu.memory_space<vmem>>, vector<256x3136xbf16>
    %cst_8 = arith.constant dense<0.000000e+00> : vector<2x3136xf32>
    %10 = tpu.matmul %8, %9, %cst_8 {dimension_numbers = #tpu.dot_dimension_numbers<[1], [0], [0], [1], [0, 0, 1, 1], [], []>} : vector<2x256xbf16>, vector<256x3136xbf16>, vector<2x3136xf32> -> vector<2x3136xf32>
    %c0_9 = arith.constant 0 : index
    %c0_10 = arith.constant 0 : index
    %11 = vector.load %arg5[%c0_9, %c0_10] : memref<1x3136xf32, #tpu.memory_space<vmem>>, vector<1x3136xf32>
    %12 = vector.broadcast %11 : vector<1x3136xf32> to vector<2x3136xf32>
    %13 = arith.addf %10, %12 : vector<2x3136xf32>
    %cst_11 = arith.constant 0.000000e+00 : f32
    %14 = vector.broadcast %cst_11 : f32 to vector<2x3136xf32>
    %15 = arith.maximumf %13, %14 : vector<2x3136xf32>
    %16 = arith.truncf %15 : vector<2x3136xf32> to vector<2x3136xbf16>
    %c0_12 = arith.constant 0 : index
    %c0_13 = arith.constant 0 : index
    %17 = vector.load %arg6[%c0_12, %c0_13] : memref<2x3136xbf16, #tpu.memory_space<vmem>>, vector<2x3136xbf16>
    tpu.vector_store %arg6[%c0_12, %c0_13], %16 {strides = array<i32>} : memref<2x3136xbf16, #tpu.memory_space<vmem>>, vector<2x3136xbf16>,
    return
  }
  func.func @transform_0(%arg0: i32) -> (i32, i32) {
    %c0_i32 = arith.constant 0 : i32
    %c0_i32_0 = arith.constant 0 : i32
    %c0_i32_1 = arith.constant 0 : i32
    return %c0_i32, %c0_i32_0 : i32, i32
  }
  func.func @transform_1(%arg0: i32) -> (i32, i32) {
    %c0_i32 = arith.constant 0 : i32
    %c0_i32_0 = arith.constant 0 : i32
    %c0_i32_1 = arith.constant 0 : i32
    return %c0_i32, %c0_i32_0 : i32, i32
  }
  func.func @transform_2(%arg0: i32) -> (i32, i32) {
    %c0_i32 = arith.constant 0 : i32
    %c0_i32_0 = arith.constant 0 : i32
    %c0_i32_1 = arith.constant 0 : i32
    return %c0_i32, %c0_i32_0 : i32, i32
  }
  func.func @transform_3(%arg0: i32) -> (i32, i32) {
    %c0_i32 = arith.constant 0 : i32
    %c0_i32_0 = arith.constant 0 : i32
    %c0_i32_1 = arith.constant 0 : i32
    return %c0_i32, %c0_i32_0 : i32, i32
  }
  func.func @transform_4(%arg0: i32) -> (i32, i32) {
    %c0_i32 = arith.constant 0 : i32
    %c0_i32_0 = arith.constant 0 : i32
    %c0_i32_1 = arith.constant 0 : i32
    return %c0_i32, %c0_i32_0 : i32, i32
  }
  func.func @transform_5(%arg0: i32) -> (i32, i32) {
    %c0_i32 = arith.constant 0 : i32
    %c0_i32_0 = arith.constant 0 : i32
    %c0_i32_1 = arith.constant 0 : i32
    return %c0_i32, %c0_i32_0 : i32, i32
  }
}

module attributes {stable_mosaic.version = 11 : i64} {
  func.func @_deconv_gemm_kernel(%arg0: i32, %arg1: memref<32x1024xbf16, #tpu.memory_space<vmem>>, %arg2: memref<1024x392xbf16, #tpu.memory_space<vmem>>, %arg3: memref<32x1xf32, #tpu.memory_space<vmem>>, %arg4: memref<32x392xbf16, #tpu.memory_space<vmem>>) attributes {dimension_semantics = [#tpu.dimension_semantics<parallel>], iteration_bounds = array<i64: 1>, scalar_prefetch = 0 : i64, scratch_operands = 0 : i64, tpu.core_type = #tpu.core_type<tc>, window_params = [{pipeline_mode = #tpu.pipeline_mode<synchronous>, transform_indices = @transform_0, window_bounds = array<i64: 32, 1024>}, {transform_indices = @transform_1, window_bounds = array<i64: 1024, 392>}, {pipeline_mode = #tpu.pipeline_mode<synchronous>, transform_indices = @transform_2, window_bounds = array<i64: 32, 1>}, {transform_indices = @transform_3, window_bounds = array<i64: 32, 392>}]} {
    %c0 = arith.constant 0 : index
    %c0_0 = arith.constant 0 : index
    %0 = vector.load %arg1[%c0, %c0_0] : memref<32x1024xbf16, #tpu.memory_space<vmem>>, vector<32x1024xbf16>
    %c0_1 = arith.constant 0 : index
    %c0_2 = arith.constant 0 : index
    %1 = vector.load %arg2[%c0_1, %c0_2] : memref<1024x392xbf16, #tpu.memory_space<vmem>>, vector<1024x392xbf16>
    %cst = arith.constant dense<0.000000e+00> : vector<32x392xf32>
    %2 = tpu.matmul %0, %1, %cst {dimension_numbers = #tpu.dot_dimension_numbers<[1], [0], [0], [1], [0, 0, 1, 1], [], []>} : vector<32x1024xbf16>, vector<1024x392xbf16>, vector<32x392xf32> -> vector<32x392xf32>
    %c0_3 = arith.constant 0 : index
    %c0_4 = arith.constant 0 : index
    %3 = vector.load %arg3[%c0_3, %c0_4] : memref<32x1xf32, #tpu.memory_space<vmem>>, vector<32x1xf32>
    %4 = vector.broadcast %3 : vector<32x1xf32> to vector<32x392xf32>
    %5 = arith.addf %2, %4 : vector<32x392xf32>
    %cst_5 = arith.constant 0.000000e+00 : f32
    %6 = vector.broadcast %cst_5 : f32 to vector<32x392xf32>
    %7 = arith.maximumf %5, %6 : vector<32x392xf32>
    %8 = arith.truncf %7 : vector<32x392xf32> to vector<32x392xbf16>
    %c0_6 = arith.constant 0 : index
    %c0_7 = arith.constant 0 : index
    %9 = vector.load %arg4[%c0_6, %c0_7] : memref<32x392xbf16, #tpu.memory_space<vmem>>, vector<32x392xbf16>
    tpu.vector_store %arg4[%c0_6, %c0_7], %8 {strides = array<i32>} : memref<32x392xbf16, #tpu.memory_space<vmem>>, vector<32x392xbf16>,
    return
  }
  func.func @transform_0(%arg0: i32) -> (i32, i32) {
    %c0_i32 = arith.constant 0 : i32
    %c0_i32_0 = arith.constant 0 : i32
    %c0_i32_1 = arith.constant 0 : i32
    return %c0_i32, %c0_i32_0 : i32, i32
  }
  func.func @transform_1(%arg0: i32) -> (i32, i32) {
    %c0_i32 = arith.constant 0 : i32
    %c0_i32_0 = arith.constant 0 : i32
    return %c0_i32, %arg0 : i32, i32
  }
  func.func @transform_2(%arg0: i32) -> (i32, i32) {
    %c0_i32 = arith.constant 0 : i32
    %c0_i32_0 = arith.constant 0 : i32
    %c0_i32_1 = arith.constant 0 : i32
    return %c0_i32, %c0_i32_0 : i32, i32
  }
  func.func @transform_3(%arg0: i32) -> (i32, i32) {
    %c0_i32 = arith.constant 0 : i32
    %c0_i32_0 = arith.constant 0 : i32
    return %c0_i32, %arg0 : i32, i32
  }
}

module attributes {stable_mosaic.version = 11 : i64} {
  func.func @_deconv_gemm_kernel(%arg0: i32, %arg1: memref<1x512xbf16, #tpu.memory_space<vmem>>, %arg2: memref<512x1568xbf16, #tpu.memory_space<vmem>>, %arg3: memref<1x1xf32, #tpu.memory_space<vmem>>, %arg4: memref<1x1568xf32, #tpu.memory_space<vmem>>) attributes {dimension_semantics = [#tpu.dimension_semantics<parallel>], iteration_bounds = array<i64: 1>, scalar_prefetch = 0 : i64, scratch_operands = 0 : i64, tpu.core_type = #tpu.core_type<tc>, window_params = [{pipeline_mode = #tpu.pipeline_mode<synchronous>, transform_indices = @transform_0, window_bounds = array<i64: 1, 512>}, {transform_indices = @transform_1, window_bounds = array<i64: 512, 1568>}, {pipeline_mode = #tpu.pipeline_mode<synchronous>, transform_indices = @transform_2, window_bounds = array<i64: 1, 1>}, {transform_indices = @transform_3, window_bounds = array<i64: 1, 1568>}]} {
    %c0 = arith.constant 0 : index
    %c0_0 = arith.constant 0 : index
    %0 = vector.load %arg1[%c0, %c0_0] : memref<1x512xbf16, #tpu.memory_space<vmem>>, vector<1x512xbf16>
    %c0_1 = arith.constant 0 : index
    %c0_2 = arith.constant 0 : index
    %1 = vector.load %arg2[%c0_1, %c0_2] : memref<512x1568xbf16, #tpu.memory_space<vmem>>, vector<512x1568xbf16>
    %cst = arith.constant dense<0.000000e+00> : vector<1x1568xf32>
    %2 = tpu.matmul %0, %1, %cst {dimension_numbers = #tpu.dot_dimension_numbers<[1], [0], [0], [1], [0, 0, 1, 1], [], []>} : vector<1x512xbf16>, vector<512x1568xbf16>, vector<1x1568xf32> -> vector<1x1568xf32>
    %c0_3 = arith.constant 0 : index
    %c0_4 = arith.constant 0 : index
    %3 = vector.load %arg3[%c0_3, %c0_4] : memref<1x1xf32, #tpu.memory_space<vmem>>, vector<1x1xf32>
    %4 = vector.broadcast %3 : vector<1x1xf32> to vector<1x1568xf32>
    %5 = arith.addf %2, %4 : vector<1x1568xf32>
    %cst_5 = arith.constant 0.000000e+00 : f32
    %6 = vector.broadcast %cst_5 : f32 to vector<1x1568xf32>
    %7 = arith.subf %6, %5 : vector<1x1568xf32>
    %8 = math.exp %7 : vector<1x1568xf32>
    %cst_6 = arith.constant 1.000000e+00 : f32
    %9 = vector.broadcast %cst_6 : f32 to vector<1x1568xf32>
    %10 = arith.addf %9, %8 : vector<1x1568xf32>
    %11 = tpu.reciprocal %10 {approx = true} : vector<1x1568xf32> -> vector<1x1568xf32>
    %c0_7 = arith.constant 0 : index
    %c0_8 = arith.constant 0 : index
    %12 = vector.load %arg4[%c0_7, %c0_8] : memref<1x1568xf32, #tpu.memory_space<vmem>>, vector<1x1568xf32>
    tpu.vector_store %arg4[%c0_7, %c0_8], %11 {strides = array<i32>} : memref<1x1568xf32, #tpu.memory_space<vmem>>, vector<1x1568xf32>,
    return
  }
  func.func @transform_0(%arg0: i32) -> (i32, i32) {
    %c0_i32 = arith.constant 0 : i32
    %c0_i32_0 = arith.constant 0 : i32
    %c0_i32_1 = arith.constant 0 : i32
    return %c0_i32, %c0_i32_0 : i32, i32
  }
  func.func @transform_1(%arg0: i32) -> (i32, i32) {
    %c0_i32 = arith.constant 0 : i32
    %c0_i32_0 = arith.constant 0 : i32
    return %c0_i32, %arg0 : i32, i32
  }
  func.func @transform_2(%arg0: i32) -> (i32, i32) {
    %c0_i32 = arith.constant 0 : i32
    %c0_i32_0 = arith.constant 0 : i32
    %c0_i32_1 = arith.constant 0 : i32
    return %c0_i32, %c0_i32_0 : i32, i32
  }
  func.func @transform_3(%arg0: i32) -> (i32, i32) {
    %c0_i32 = arith.constant 0 : i32
    %c0_i32_0 = arith.constant 0 : i32
    return %c0_i32, %arg0 : i32, i32
  }
}

</mosaic_0001>

<bundles_post_ra>
// kernel: vae_decoder_forward.3
= control target key start
LH: loop header
LB: loop body
LE: loop exit
PB: predicated region body
PF: predicated region fallthrough
CT: control target
= control target key end

     0   :  { %v4493_v1 = vmov 0   ;;  %vm58_vm0 = vcmask 261120   ;;  %vm3447_vm1 = vcmask 516096   ;;  %s5885_s1 = inlined_call_operand.vmem [shape: bf16[32,256], index: 1, kind: input, shape index: {}]   ;;  %s5886_s3 = inlined_call_operand.vmem [shape: bf16[256,3136], index: 3, kind: input, shape index: {}]   ;;  %s5887_s0 = inlined_call_operand.vmem [shape: bf16[2,32], index: 0, kind: input, shape index: {}]   ;;  %s5888_s2 = inlined_call_operand.vmem [shape: f32[1,256], index: 2, kind: input, shape index: {}]   ;;  %s5889_s4 = inlined_call_operand.vmem [shape: f32[1,3136], index: 4, kind: input, shape index: {}]   ;;  %s5890_s5 = inlined_call_operand.vmem [shape: bf16[2,3136], index: 5, kind: output, shape index: {}]  }
   0x1   :  { %v3895_v0 = vld [vmem:[%s5885_s1 + $0x4] ss:$8 sps:$4 sm:$0xff]   ;;  %94 = vmatprep.mubr.bf16.mxu0 %v4493_v1  ;;  %v3897_v2 = vld [vmem:[%s5885_s1] ss:$8 sps:$4 sm:$0xff]   ;;  %v3898_v3 = vld [vmem:[%s5885_s1 + $0x14] ss:$8 sps:$4 sm:$0xff]  }
   0x2   :  { %62 = vmatprep.subr.bf16.mxu0 %v3895_v0  ;;  %v3900_v4 = vld [vmem:[%s5885_s1 + $0x10] ss:$8 sps:$4 sm:$0xff]   ;;  %v3901_v5 = vld [vmem:[%s5886_s3 + $0x4] ss:$100 sps:$4 sm:$0xff]   ;;  %v21_v6 = vld [vmem:[%s5887_s0] sm:$0x1] }
   0x3   :  { %63 = vmatpush1.bf16.msra.mxu0 %v3897_v2  ;;  %2672 = vmatprep.subr.bf16.mxu1 %v3901_v5  ;;  %v3905_v7 = vld [vmem:[%s5886_s3 + $0xc] ss:$100 sps:$4 sm:$0xff]   ;;  %v3906_v8 = vld [vmem:[%s5886_s3] ss:$100 sps:$4 sm:$0xff]   ;;  %v3911_v11 = vld [vmem:[%s5886_s3 + $0xd4] ss:$100 sps:$4 sm:$0xff]  }
   0x4   :  { %64 = vmatprep.subr.bf16.mxu0 %v3898_v3  ;;  %v3907_v9 = vld [vmem:[%s5886_s3 + $0xcc] ss:$100 sps:$4 sm:$0xff]   ;;  %2673 = vmatpush1.bf16.msra.mxu1 %v3906_v8  ;;  %v3913_v13 = vld [vmem:[%s5886_s3 + $0x194] ss:$100 sps:$4 sm:$0xff]   ;;  %v3917_v15 = vld [vmem:[%s5886_s3 + $0x19c] ss:$100 sps:$4 sm:$0xff]   ;;  %v28_v8 = vlaneseq }
   0x5   :  { %v3903_v10 = vld [vmem:[%s5886_s3 + $0x8] ss:$100 sps:$4 sm:$0xff]   ;;  %2674 = vmatprep.subr.bf16.mxu1 %v3907_v9  ;;  %v3909_v14 = vld [vmem:[%s5886_s3 + $0xd0] ss:$100 sps:$4 sm:$0xff]   ;;  %v3919_v17 = vld [vmem:[%s5886_s3 + $0x25c] ss:$100 sps:$4 sm:$0xff]  }
   0x6   :  { %v3912_v12 = vld [vmem:[%s5886_s3 + $0xc8] ss:$100 sps:$4 sm:$0xff]   ;;  %v3918_v16 = vld [vmem:[%s5886_s3 + $0x190] ss:$100 sps:$4 sm:$0xff]   ;;  %v3915_v18 = vld [vmem:[%s5886_s3 + $0x198] ss:$100 sps:$4 sm:$0xff]  }
   0x7   :  { %65 = vmatpush1.bf16.msra.mxu0 %v3900_v4  ;;  %v3923_v19 = vld [vmem:[%s5886_s3 + $0x264] ss:$100 sps:$4 sm:$0xff]   ;;  %v3924_v20 = vld [vmem:[%s5886_s3 + $0x258] ss:$100 sps:$4 sm:$0xff]   ;;  %v3929_v23 = vld [vmem:[%s5886_s3 + $0x32c] ss:$100 sps:$4 sm:$0xff]  }
   0x8   :  { %2713 = vmatprep.subr.bf16.mxu0 %v3905_v7  ;;  %2675 = vmatpush1.bf16.msra.mxu1 %v3912_v12  ;;  %v3925_v21 = vld [vmem:[%s5886_s3 + $0x324] ss:$100 sps:$4 sm:$0xff]   ;;  %v3931_v25 = vld [vmem:[%s5886_s3 + $0x3ec] ss:$100 sps:$4 sm:$0xff]   ;;  %v3935_v27 = vld [vmem:[%s5886_s3 + $0x3f4] ss:$100 sps:$4 sm:$0xff]  }
   0x9   :  { %2676 = vmatprep.subr.bf16.mxu1 %v3913_v13  ;;  %v3921_v22 = vld [vmem:[%s5886_s3 + $0x260] ss:$100 sps:$4 sm:$0xff]   ;;  %v3927_v26 = vld [vmem:[%s5886_s3 + $0x328] ss:$100 sps:$4 sm:$0xff]   ;;  %v3937_v29 = vld [vmem:[%s5886_s3 + $0x4b4] ss:$100 sps:$4 sm:$0xff]  }
   0xa   :  { %3457 = vmatmul.mubr.msk.bf16.vlgmr.msra.gmra.mrb[0].mxu0 %vm58_vm0, %v21_v6  ;;  %v3930_v24 = vld [vmem:[%s5886_s3 + $0x320] ss:$100 sps:$4 sm:$0xff]   ;;  %v3936_v28 = vld [vmem:[%s5886_s3 + $0x3e8] ss:$100 sps:$4 sm:$0xff]   ;;  %v3933_v30 = vld [vmem:[%s5886_s3 + $0x3f0] ss:$100 sps:$4 sm:$0xff]  }
   0xb   :  { %2714 = vmatpush1.bf16.msra.mxu0 %v3903_v10  ;;  %v3941_v31 = vld [vmem:[%s5886_s3 + $0x4bc] ss:$100 sps:$4 sm:$0xff]   ;;  %v3942_v32 = vld [vmem:[%s5886_s3 + $0x4b0] ss:$100 sps:$4 sm:$0xff]   ;;  %v3947_v35 = vld [vmem:[%s5886_s3 + $0x584] ss:$100 sps:$4 sm:$0xff]  }
   0xc   :  { %2715 = vmatprep.subr.bf16.mxu0 %v3911_v11  ;;  %2677 = vmatpush1.bf16.msra.mxu1 %v3918_v16  ;;  %v3943_v33 = vld [vmem:[%s5886_s3 + $0x57c] ss:$100 sps:$4 sm:$0xff]   ;;  %v3949_v37 = vld [vmem:[%s5886_s3 + $0x644] ss:$100 sps:$4 sm:$0xff]   ;;  %v3953_v39 = vld [vmem:[%s5886_s3 + $0x64c] ss:$100 sps:$4 sm:$0xff]  }
   0xd   :  { %2678 = vmatprep.subr.bf16.mxu1 %v3919_v17  ;;  %v3939_v34 = vld [vmem:[%s5886_s3 + $0x4b8] ss:$100 sps:$4 sm:$0xff]   ;;  %v3945_v38 = vld [vmem:[%s5886_s3 + $0x580] ss:$100 sps:$4 sm:$0xff]   ;;  %v3955_v41 = vld [vmem:[%s5886_s3 + $0x70c] ss:$100 sps:$4 sm:$0xff]  }
   0xe   :  { %v3948_v36 = vld [vmem:[%s5886_s3 + $0x578] ss:$100 sps:$4 sm:$0xff]   ;;  %v3954_v40 = vld [vmem:[%s5886_s3 + $0x640] ss:$100 sps:$4 sm:$0xff]   ;;  %v3951_v42 = vld [vmem:[%s5886_s3 + $0x648] ss:$100 sps:$4 sm:$0xff]  }
   0xf   :  { %2716 = vmatpush1.bf16.msra.mxu0 %v3909_v14  ;;  %v3960_v43 = vld [vmem:[%s5886_s3 + $0x708] ss:$100 sps:$4 sm:$0xff]   ;;  %v3959_v44 = vld [vmem:[%s5886_s3 + $0x714] ss:$100 sps:$4 sm:$0xff]   ;;  %v3965_v48 = vld [vmem:[%s5886_s3 + $0x7dc] ss:$100 sps:$4 sm:$0xff]  }
  0x10   :  { %2717 = vmatprep.subr.bf16.mxu0 %v3917_v15  ;;  %2679 = vmatpush1.bf16.msra.mxu1 %v3924_v20  ;;  %v3961_v45 = vld [vmem:[%s5886_s3 + $0x7d4] ss:$100 sps:$4 sm:$0xff]   ;;  %v3967_v49 = vld [vmem:[%s5886_s3 + $0x89c] ss:$100 sps:$4 sm:$0xff]   ;;  %v3971_v52 = vld [vmem:[%s5886_s3 + $0x8a4] ss:$100 sps:$4 sm:$0xff]  }
  0x11   :  { %2680 = vmatprep.subr.bf16.mxu1 %v3925_v21  ;;  %v3957_v46 = vld [vmem:[%s5886_s3 + $0x710] ss:$100 sps:$4 sm:$0xff]   ;;  %v3963_v50 = vld [vmem:[%s5886_s3 + $0x7d8] ss:$100 sps:$4 sm:$0xff]   ;;  %v3973_v53 = vld [vmem:[%s5886_s3 + $0x964] ss:$100 sps:$4 sm:$0xff]  }
  0x12   :  { %v3966_v47 = vld [vmem:[%s5886_s3 + $0x7d0] ss:$100 sps:$4 sm:$0xff]   ;;  %v3972_v51 = vld [vmem:[%s5886_s3 + $0x898] ss:$100 sps:$4 sm:$0xff]   ;;  %v3969_v54 = vld [vmem:[%s5886_s3 + $0x8a0] ss:$100 sps:$4 sm:$0xff]  }
  0x13   :  { %2718 = vmatpush1.bf16.msra.mxu0 %v3915_v18  ;;  %v3978_v55 = vld [vmem:[%s5886_s3 + $0x960] ss:$100 sps:$4 sm:$0xff]   ;;  %v3977_v56 = vld [vmem:[%s5886_s3 + $0x96c] ss:$100 sps:$4 sm:$0xff]   ;;  %v3983_v60 = vld [vmem:[%s5886_s3 + $0xa34] ss:$100 sps:$4 sm:$0xff]  }
  0x14   :  { %2719 = vmatprep.subr.bf16.mxu0 %v3923_v19  ;;  %2681 = vmatpush1.bf16.msra.mxu1 %v3930_v24  ;;  %v3979_v57 = vld [vmem:[%s5886_s3 + $0xa2c] ss:$100 sps:$4 sm:$0xff]   ;;  %v3985_v62 = vld [vmem:[%s5886_s3 + $0xaf4] ss:$100 sps:$4 sm:$0xff]   ;;  %v3989_v63 = vld [vmem:[%s5886_s3 + $0xafc] ss:$100 sps:$4 sm:$0xff]  }
  0x15   :  { %2682 = vmatprep.subr.bf16.mxu1 %v3931_v25  ;;  %v3975_v58 = vld [vmem:[%s5886_s3 + $0x968] ss:$100 sps:$4 sm:$0xff]   ;;  %v3981_v61 = vld [vmem:[%s5886_s3 + $0xa30] ss:$100 sps:$4 sm:$0xff]   ;;  %v3987_v0 = vld [vmem:[%s5886_s3 + $0xaf8] ss:$100 sps:$4 sm:$0xff]  }
  0x16   :  { %v3984_v59 = vld [vmem:[%s5886_s3 + $0xa28] ss:$100 sps:$4 sm:$0xff]   ;;  %v3990_v1 = vld [vmem:[%s5886_s3 + $0xaf0] ss:$100 sps:$4 sm:$0xff]   ;;  %v3991_v2 = vld [vmem:[%s5886_s3 + $0xbbc] ss:$100 sps:$4 sm:$0xff]  }
  0x17   :  { %2720 = vmatpush1.bf16.msra.mxu0 %v3921_v22  ;;  %v3995_v3 = vld [vmem:[%s5886_s3 + $0xbc4] ss:$100 sps:$4 sm:$0xff]   ;;  %v3996_v5 = vld [vmem:[%s5886_s3 + $0xbb8] ss:$100 sps:$4 sm:$0xff]   ;;  %v4738_v9 = vshrl.u32 %v28_v8, 7 }
  0x18   :  { %2721 = vmatprep.subr.bf16.mxu0 %v3929_v23  ;;  %2683 = vmatpush1.bf16.msra.mxu1 %v3936_v28  ;;  %v3993_v4 = vld [vmem:[%s5886_s3 + $0xbc0] ss:$100 sps:$4 sm:$0xff]   ;;  %v3999_v6 = vld [vmem:[%s5886_s3 + $0x14] ss:$100 sps:$4 sm:$0xff]  }
  0x19   :  { %2684 = vmatprep.subr.bf16.mxu1 %v3937_v29  ;;  %v4002_v7 = vld [vmem:[%s5886_s3 + $0x1c] ss:$100 sps:$4 sm:$0xff]   ;;  %v4741_v10 = vsub.s32 0, %v4738_v9  ;;  %v4747_v12 = vsub.s32 1, %v4738_v9  ;;  %v3997_v24 = vld [vmem:[%s5886_s3 + $0x10] ss:$100 sps:$4 sm:$0xff]  }
  0x1a   :  { %v26_v11 = vld [vmem:[%s5888_s2] sm:$0x3]  ;;  %v4000_v25 = vld [vmem:[%s5886_s3 + $0x18] ss:$100 sps:$4 sm:$0xff]   ;;  %v4008_v28 = vld [vmem:[%s5886_s3 + $0xe4] ss:$100 sps:$4 sm:$0xff]  }
  0x1b   :  { %2722 = vmatpush1.bf16.msra.mxu0 %v3927_v26  ;;  %v31_v13 = vrot.slane %v26_v11, %v4741_v10  ;;  %v35_v14 = vrot.slane %v26_v11, %v4747_v12  ;;  %v4003_v29 = vld [vmem:[%s5886_s3 + $0xd8] ss:$100 sps:$4 sm:$0xff]   ;;  %v4069_v11 = vld [vmem:[%s5886_s3 + $0x970] ss:$100 sps:$4 sm:$0xff]  }
  0x1c   :  { %2723 = vmatprep.subr.bf16.mxu0 %v3935_v27  ;;  %2685 = vmatpush1.bf16.msra.mxu1 %v3942_v32  ;;  %v4005_v27 = vld [vmem:[%s5886_s3 + $0xdc] ss:$100 sps:$4 sm:$0xff]   ;;  %v4014_v32 = vld [vmem:[%s5886_s3 + $0x1ac] ss:$100 sps:$4 sm:$0xff]  }
  0x1d   :  { %2686 = vmatprep.subr.bf16.mxu1 %v3943_v33  ;;  %v4009_v33 = vld [vmem:[%s5886_s3 + $0x1a0] ss:$100 sps:$4 sm:$0xff]  }
  0x1e   :  { %v4074_v8 = vld [vmem:[%s5886_s3 + $0x97c] ss:$100 sps:$4 sm:$0xff]  }
  0x1f   :  { %2724 = vmatpush1.bf16.msra.mxu0 %v3933_v30  ;;  %v4006_v30 = vld [vmem:[%s5886_s3 + $0xe0] ss:$100 sps:$4 sm:$0xff]  }
  0x20   :  { %2725 = vmatprep.subr.bf16.mxu0 %v3941_v31  ;;  %2687 = vmatpush1.bf16.msra.mxu1 %v3948_v36  ;;  %v4011_v31 = vld [vmem:[%s5886_s3 + $0x1a4] ss:$100 sps:$4 sm:$0xff]   ;;  %v4020_v36 = vld [vmem:[%s5886_s3 + $0x274] ss:$100 sps:$4 sm:$0xff]  }
  0x21   :  { %2688 = vmatprep.subr.bf16.mxu1 %v3949_v37  ;;  %v4015_v37 = vld [vmem:[%s5886_s3 + $0x268] ss:$100 sps:$4 sm:$0xff]  }
  0x23   :  { %2726 = vmatpush1.bf16.msra.mxu0 %v3939_v34  ;;  %v4012_v34 = vld [vmem:[%s5886_s3 + $0x1a8] ss:$100 sps:$4 sm:$0xff]  }
  0x24   :  { %2727 = vmatprep.subr.bf16.mxu0 %v3947_v35  ;;  %2689 = vmatpush1.bf16.msra.mxu1 %v3954_v40  ;;  %v4017_v35 = vld [vmem:[%s5886_s3 + $0x26c] ss:$100 sps:$4 sm:$0xff]   ;;  %v4026_v40 = vld [vmem:[%s5886_s3 + $0x33c] ss:$100 sps:$4 sm:$0xff]  }
  0x25   :  { %2690 = vmatprep.subr.bf16.mxu1 %v3955_v41  ;;  %v4021_v41 = vld [vmem:[%s5886_s3 + $0x330] ss:$100 sps:$4 sm:$0xff]  }
  0x27   :  { %2728 = vmatpush1.bf16.msra.mxu0 %v3945_v38  ;;  %v4018_v38 = vld [vmem:[%s5886_s3 + $0x270] ss:$100 sps:$4 sm:$0xff]  }
  0x28   :  { %2729 = vmatprep.subr.bf16.mxu0 %v3953_v39  ;;  %2691 = vmatpush1.bf16.msra.mxu1 %v3960_v43  ;;  %v4023_v39 = vld [vmem:[%s5886_s3 + $0x334] ss:$100 sps:$4 sm:$0xff]   ;;  %v4029_v43 = vld [vmem:[%s5886_s3 + $0x3fc] ss:$100 sps:$4 sm:$0xff]  }
  0x29   :  { %2692 = vmatprep.subr.bf16.mxu1 %v3961_v45  ;;  %v4027_v45 = vld [vmem:[%s5886_s3 + $0x3f8] ss:$100 sps:$4 sm:$0xff]  }
  0x2b   :  { %2730 = vmatpush1.bf16.msra.mxu0 %v3951_v42  ;;  %v4024_v42 = vld [vmem:[%s5886_s3 + $0x338] ss:$100 sps:$4 sm:$0xff]  }
  0x2c   :  { %2731 = vmatprep.subr.bf16.mxu0 %v3959_v44  ;;  %2693 = vmatpush1.bf16.msra.mxu1 %v3966_v47  ;;  %v4032_v44 = vld [vmem:[%s5886_s3 + $0x404] ss:$100 sps:$4 sm:$0xff]  }
  0x2d   :  { %2694 = vmatprep.subr.bf16.mxu1 %v3967_v49  ;;  %v4035_v47 = vld [vmem:[%s5886_s3 + $0x4c4] ss:$100 sps:$4 sm:$0xff]  }
  0x2e   :  { %v4033_v49 = vld [vmem:[%s5886_s3 + $0x4c0] ss:$100 sps:$4 sm:$0xff]  }
  0x2f   :  { %2732 = vmatpush1.bf16.msra.mxu0 %v3957_v46  ;;  %v4030_v46 = vld [vmem:[%s5886_s3 + $0x400] ss:$100 sps:$4 sm:$0xff]  }
  0x30   :  { %2733 = vmatprep.subr.bf16.mxu0 %v3965_v48  ;;  %2695 = vmatpush1.bf16.msra.mxu1 %v3972_v51  ;;  %v4038_v48 = vld [vmem:[%s5886_s3 + $0x4cc] ss:$100 sps:$4 sm:$0xff]  }
  0x31   :  { %2696 = vmatprep.subr.bf16.mxu1 %v3973_v53  ;;  %v4041_v51 = vld [vmem:[%s5886_s3 + $0x58c] ss:$100 sps:$4 sm:$0xff]  }
  0x32   :  { %v4039_v53 = vld [vmem:[%s5886_s3 + $0x588] ss:$100 sps:$4 sm:$0xff]  }
  0x33   :  { %2734 = vmatpush1.bf16.msra.mxu0 %v3963_v50  ;;  %v4036_v50 = vld [vmem:[%s5886_s3 + $0x4c8] ss:$100 sps:$4 sm:$0xff]  }
  0x34   :  { %2735 = vmatprep.subr.bf16.mxu0 %v3971_v52  ;;  %2697 = vmatpush1.bf16.msra.mxu1 %v3978_v55  ;;  %v4044_v52 = vld [vmem:[%s5886_s3 + $0x594] ss:$100 sps:$4 sm:$0xff]  }
  0x35   :  { %2698 = vmatprep.subr.bf16.mxu1 %v3979_v57  ;;  %v4047_v55 = vld [vmem:[%s5886_s3 + $0x654] ss:$100 sps:$4 sm:$0xff]  }
  0x36   :  { %v4045_v57 = vld [vmem:[%s5886_s3 + $0x650] ss:$100 sps:$4 sm:$0xff]  }
  0x37   :  { %2736 = vmatpush1.bf16.msra.mxu0 %v3969_v54  ;;  %v4042_v54 = vld [vmem:[%s5886_s3 + $0x590] ss:$100 sps:$4 sm:$0xff]  }
  0x38   :  { %2737 = vmatprep.subr.bf16.mxu0 %v3977_v56  ;;  %2699 = vmatpush1.bf16.msra.mxu1 %v3984_v59  ;;  %v4050_v56 = vld [vmem:[%s5886_s3 + $0x65c] ss:$100 sps:$4 sm:$0xff]  }
  0x39   :  { %2700 = vmatprep.subr.bf16.mxu1 %v3985_v62  ;;  %v4053_v59 = vld [vmem:[%s5886_s3 + $0x71c] ss:$100 sps:$4 sm:$0xff]  }
  0x3a   :  { %v4054_v62 = vld [vmem:[%s5886_s3 + $0x720] ss:$100 sps:$4 sm:$0xff]  }
  0x3b   :  { %2738 = vmatpush1.bf16.msra.mxu0 %v3975_v58  ;;  %v4048_v58 = vld [vmem:[%s5886_s3 + $0x658] ss:$100 sps:$4 sm:$0xff]  }
  0x3c   :  { %2739 = vmatprep.subr.bf16.mxu0 %v3983_v60  ;;  %2701 = vmatpush1.bf16.msra.mxu1 %v3990_v1  ;;  %v4056_v60 = vld [vmem:[%s5886_s3 + $0x724] ss:$100 sps:$4 sm:$0xff]  }
  0x3d   :  { %2702 = vmatprep.subr.bf16.mxu1 %v3991_v2  ;;  %v4057_v1 = vld [vmem:[%s5886_s3 + $0x7e0] ss:$100 sps:$4 sm:$0xff]   ;;  %v4060_v2 = vld [vmem:[%s5886_s3 + $0x7e8] ss:$100 sps:$4 sm:$0xff]  }
  0x3f   :  { %2740 = vmatpush1.bf16.msra.mxu0 %v3981_v61  ;;  %v4051_v61 = vld [vmem:[%s5886_s3 + $0x718] ss:$100 sps:$4 sm:$0xff]  }
  0x40   :  { %2741 = vmatprep.subr.bf16.mxu0 %v3989_v63  ;;  %2703 = vmatpush1.bf16.msra.mxu1 %v3996_v5  ;;  %v4059_v63 = vld [vmem:[%s5886_s3 + $0x7e4] ss:$100 sps:$4 sm:$0xff]  }
  0x41   :  { %2754 = vmatprep.subr.bf16.mxu1 %v3999_v6  ;;  %v4063_v5 = vld [vmem:[%s5886_s3 + $0x8a8] ss:$100 sps:$4 sm:$0xff]   ;;  %v4066_v6 = vld [vmem:[%s5886_s3 + $0x8b0] ss:$100 sps:$4 sm:$0xff]  }
  0x43   :  { %2742 = vmatpush1.bf16.msra.mxu0 %v3987_v0  ;;  %v4062_v0 = vld [vmem:[%s5886_s3 + $0x7ec] ss:$100 sps:$4 sm:$0xff]  }
  0x44   :  { %2743 = vmatprep.subr.bf16.mxu0 %v3995_v3  ;;  %v4065_v3 = vld [vmem:[%s5886_s3 + $0x8ac] ss:$100 sps:$4 sm:$0xff]  }
  0x47   :  { %2744 = vmatpush1.bf16.msra.mxu0 %v3993_v4  ;;  %v4068_v4 = vld [vmem:[%s5886_s3 + $0x8b4] ss:$100 sps:$4 sm:$0xff]  }
  0x48   :  { %2795 = vmatprep.subr.bf16.mxu0 %v4002_v7  ;;  %v4071_v7 = vld [vmem:[%s5886_s3 + $0x974] ss:$100 sps:$4 sm:$0xff]  }
  0xdd   :  { %v96_v15 = vpop.f32.mrb[0].mxu0 }
  0xde   :  { %v97_v16 = vadd.f32 %v96_v15, %v31_v13  ;;  %v98_v17 = vpop.f32.mrb[1].mxu0  ;;  %v4072_v13 = vld [vmem:[%s5886_s3 + $0x978] ss:$100 sps:$4 sm:$0xff]   ;;  %v4080_v15 = vld [vmem:[%s5886_s3 + $0xa44] ss:$100 sps:$4 sm:$0xff]  }
  0xdf   :  { %v99_v18 = vadd.f32 %v98_v17, %v35_v14  ;;  %v100_v19 = vpop.f32.mrb[2].mxu0  ;;  %v4077_v14 = vld [vmem:[%s5886_s3 + $0xa3c] ss:$100 sps:$4 sm:$0xff]  }
  0xe0   :  { %v103_v20 = vmax.f32 %v97_v16, 0.0  ;;  %v101_v21 = vpop.f32.mrb[3].mxu0  ;;  %v4075_v16 = vld [vmem:[%s5886_s3 + $0xa38] ss:$100 sps:$4 sm:$0xff]   ;;  %v4078_v17 = vld [vmem:[%s5886_s3 + $0xa40] ss:$100 sps:$4 sm:$0xff]  }
  0xe1   :  { %v104_v22 = vmax.f32 %v99_v18, 0.0  ;;  %v4083_v18 = vld [vmem:[%s5886_s3 + $0xb04] ss:$100 sps:$4 sm:$0xff]   ;;  %v4086_v19 = vld [vmem:[%s5886_s3 + $0xb0c] ss:$100 sps:$4 sm:$0xff]  }
  0xe2   :  { %v4759_v26 = vpack.c.bf16 %v103_v20, %v103_v20  ;;  %v4081_v20 = vld [vmem:[%s5886_s3 + $0xb00] ss:$100 sps:$4 sm:$0xff]   ;;  %v4084_v21 = vld [vmem:[%s5886_s3 + $0xb08] ss:$100 sps:$4 sm:$0xff]  }
  0xe3   :  { %v4751_v23 = vpack.c.bf16 %v104_v22, %v104_v22  ;;  %v4089_v22 = vld [vmem:[%s5886_s3 + $0xbcc] ss:$100 sps:$4 sm:$0xff]  }
  0xe5   :  { %2704 = vmatprep.mubr.bf16.mxu1 %v4751_v23  ;;  %2745 = vmatprep.mubr.bf16.mxu0 %v4751_v23 }
  0xe6   :  { %2705 = vmatmul.mubr.bf16.vlgmr.msra.gmra.mrb[0].mxu1 %v4759_v26  ;;  %2746 = vmatmul.mubr.bf16.vlgmr.msra.gmra.mrb[4].mxu0 %v4759_v26 }
  0xe7   :  { %2755 = vmatpush1.bf16.msra.mxu1 %v3997_v24  ;;  %2796 = vmatpush1.bf16.msra.mxu0 %v4000_v25  ;;  %v4092_v24 = vld [vmem:[%s5886_s3 + $0xbd4] ss:$100 sps:$4 sm:$0xff]   ;;  %v4087_v25 = vld [vmem:[%s5886_s3 + $0xbc8] ss:$100 sps:$4 sm:$0xff]  }
  0xe8   :  { %2786 = vmatprep.mubr.bf16.mxu1 %v4751_v23  ;;  %2827 = vmatprep.mubr.bf16.mxu0 %v4751_v23 }
  0xe9   :  { %2756 = vmatprep.subr.bf16.mxu1 %v4005_v27  ;;  %2797 = vmatprep.subr.bf16.mxu0 %v4008_v28  ;;  %v4090_v27 = vld [vmem:[%s5886_s3 + $0xbd0] ss:$100 sps:$4 sm:$0xff]   ;;  %v4095_v28 = vld [vmem:[%s5886_s3 + $0x24] ss:$100 sps:$4 sm:$0xff]  }
  0xeb   :  { %2757 = vmatpush1.bf16.msra.mxu1 %v4003_v29  ;;  %2798 = vmatpush1.bf16.msra.mxu0 %v4006_v30  ;;  %v4098_v29 = vld [vmem:[%s5886_s3 + $0x2c] ss:$100 sps:$4 sm:$0xff]   ;;  %v4093_v30 = vld [vmem:[%s5886_s3 + $0x20] ss:$100 sps:$4 sm:$0xff]  }
  0xec   :  { %2758 = vmatprep.subr.bf16.mxu1 %v4011_v31  ;;  %2799 = vmatprep.subr.bf16.mxu0 %v4014_v32  ;;  %v4096_v31 = vld [vmem:[%s5886_s3 + $0x28] ss:$100 sps:$4 sm:$0xff]  }
  0xed   :  { %v4101_v32 = vld [vmem:[%s5886_s3 + $0xec] ss:$100 sps:$4 sm:$0xff]  }
  0xef   :  { %2759 = vmatpush1.bf16.msra.mxu1 %v4009_v33  ;;  %2800 = vmatpush1.bf16.msra.mxu0 %v4012_v34  ;;  %v4104_v33 = vld [vmem:[%s5886_s3 + $0xf4] ss:$100 sps:$4 sm:$0xff]   ;;  %v4099_v34 = vld [vmem:[%s5886_s3 + $0xe8] ss:$100 sps:$4 sm:$0xff]  }
  0xf0   :  { %2760 = vmatprep.subr.bf16.mxu1 %v4017_v35  ;;  %2801 = vmatprep.subr.bf16.mxu0 %v4020_v36  ;;  %v4102_v35 = vld [vmem:[%s5886_s3 + $0xf0] ss:$100 sps:$4 sm:$0xff]  }
  0xf1   :  { %v4107_v36 = vld [vmem:[%s5886_s3 + $0x1b4] ss:$100 sps:$4 sm:$0xff]  }
  0xf3   :  { %2761 = vmatpush1.bf16.msra.mxu1 %v4015_v37  ;;  %2802 = vmatpush1.bf16.msra.mxu0 %v4018_v38  ;;  %v4110_v37 = vld [vmem:[%s5886_s3 + $0x1bc] ss:$100 sps:$4 sm:$0xff]   ;;  %v4105_v38 = vld [vmem:[%s5886_s3 + $0x1b0] ss:$100 sps:$4 sm:$0xff]  }
  0xf4   :  { %2762 = vmatprep.subr.bf16.mxu1 %v4023_v39  ;;  %2803 = vmatprep.subr.bf16.mxu0 %v4026_v40  ;;  %v4108_v39 = vld [vmem:[%s5886_s3 + $0x1b8] ss:$100 sps:$4 sm:$0xff]  }
  0xf5   :  { %v4113_v40 = vld [vmem:[%s5886_s3 + $0x27c] ss:$100 sps:$4 sm:$0xff]  }
  0xf7   :  { %2763 = vmatpush1.bf16.msra.mxu1 %v4021_v41  ;;  %2804 = vmatpush1.bf16.msra.mxu0 %v4024_v42  ;;  %v4116_v41 = vld [vmem:[%s5886_s3 + $0x284] ss:$100 sps:$4 sm:$0xff]   ;;  %v4111_v42 = vld [vmem:[%s5886_s3 + $0x278] ss:$100 sps:$4 sm:$0xff]  }
  0xf8   :  { %2764 = vmatprep.subr.bf16.mxu1 %v4029_v43  ;;  %2805 = vmatprep.subr.bf16.mxu0 %v4032_v44  ;;  %v4114_v43 = vld [vmem:[%s5886_s3 + $0x280] ss:$100 sps:$4 sm:$0xff]  }
  0xf9   :  { %v4119_v44 = vld [vmem:[%s5886_s3 + $0x344] ss:$100 sps:$4 sm:$0xff]  }
  0xfb   :  { %2765 = vmatpush1.bf16.msra.mxu1 %v4027_v45  ;;  %2806 = vmatpush1.bf16.msra.mxu0 %v4030_v46  ;;  %v4122_v45 = vld [vmem:[%s5886_s3 + $0x34c] ss:$100 sps:$4 sm:$0xff]   ;;  %v4117_v46 = vld [vmem:[%s5886_s3 + $0x340] ss:$100 sps:$4 sm:$0xff]  }
  0xfc   :  { %2766 = vmatprep.subr.bf16.mxu1 %v4035_v47  ;;  %2807 = vmatprep.subr.bf16.mxu0 %v4038_v48  ;;  %v4120_v47 = vld [vmem:[%s5886_s3 + $0x348] ss:$100 sps:$4 sm:$0xff]  }
  0xfd   :  { %v4125_v48 = vld [vmem:[%s5886_s3 + $0x40c] ss:$100 sps:$4 sm:$0xff]  }
  0xff   :  { %2767 = vmatpush1.bf16.msra.mxu1 %v4033_v49  ;;  %2808 = vmatpush1.bf16.msra.mxu0 %v4036_v50  ;;  %v4128_v49 = vld [vmem:[%s5886_s3 + $0x414] ss:$100 sps:$4 sm:$0xff]   ;;  %v4123_v50 = vld [vmem:[%s5886_s3 + $0x408] ss:$100 sps:$4 sm:$0xff]  }
 0x100   :  { %2768 = vmatprep.subr.bf16.mxu1 %v4041_v51  ;;  %2809 = vmatprep.subr.bf16.mxu0 %v4044_v52  ;;  %v4126_v51 = vld [vmem:[%s5886_s3 + $0x410] ss:$100 sps:$4 sm:$0xff]  }
 0x101   :  { %v4131_v52 = vld [vmem:[%s5886_s3 + $0x4d4] ss:$100 sps:$4 sm:$0xff]  }
 0x103   :  { %2769 = vmatpush1.bf16.msra.mxu1 %v4039_v53  ;;  %2810 = vmatpush1.bf16.msra.mxu0 %v4042_v54  ;;  %v4134_v53 = vld [vmem:[%s5886_s3 + $0x4dc] ss:$100 sps:$4 sm:$0xff]   ;;  %v4129_v54 = vld [vmem:[%s5886_s3 + $0x4d0] ss:$100 sps:$4 sm:$0xff]  }
 0x104   :  { %2770 = vmatprep.subr.bf16.mxu1 %v4047_v55  ;;  %2811 = vmatprep.subr.bf16.mxu0 %v4050_v56  ;;  %v4132_v55 = vld [vmem:[%s5886_s3 + $0x4d8] ss:$100 sps:$4 sm:$0xff]  }
 0x105   :  { %v4137_v56 = vld [vmem:[%s5886_s3 + $0x59c] ss:$100 sps:$4 sm:$0xff]  }
 0x107   :  { %2771 = vmatpush1.bf16.msra.mxu1 %v4045_v57  ;;  %2812 = vmatpush1.bf16.msra.mxu0 %v4048_v58  ;;  %v4140_v57 = vld [vmem:[%s5886_s3 + $0x5a4] ss:$100 sps:$4 sm:$0xff]   ;;  %v4135_v58 = vld [vmem:[%s5886_s3 + $0x598] ss:$100 sps:$4 sm:$0xff]  }
 0x108   :  { %2772 = vmatprep.subr.bf16.mxu1 %v4053_v59  ;;  %2813 = vmatprep.subr.bf16.mxu0 %v4056_v60  ;;  %v4138_v59 = vld [vmem:[%s5886_s3 + $0x5a0] ss:$100 sps:$4 sm:$0xff]  }
 0x109   :  { %v4143_v60 = vld [vmem:[%s5886_s3 + $0x664] ss:$100 sps:$4 sm:$0xff]  }
 0x10b   :  { %2773 = vmatpush1.bf16.msra.mxu1 %v4051_v61  ;;  %2814 = vmatpush1.bf16.msra.mxu0 %v4054_v62  ;;  %v4146_v61 = vld [vmem:[%s5886_s3 + $0x66c] ss:$100 sps:$4 sm:$0xff]   ;;  %v4141_v62 = vld [vmem:[%s5886_s3 + $0x660] ss:$100 sps:$4 sm:$0xff]  }
 0x10c   :  { %2774 = vmatprep.subr.bf16.mxu1 %v4059_v63  ;;  %2815 = vmatprep.subr.bf16.mxu0 %v4062_v0  ;;  %v4144_v63 = vld [vmem:[%s5886_s3 + $0x668] ss:$100 sps:$4 sm:$0xff]  }
 0x10d   :  { %v4149_v0 = vld [vmem:[%s5886_s3 + $0x72c] ss:$100 sps:$4 sm:$0xff]  }
 0x10f   :  { %2775 = vmatpush1.bf16.msra.mxu1 %v4057_v1  ;;  %2816 = vmatpush1.bf16.msra.mxu0 %v4060_v2  ;;  %v4152_v1 = vld [vmem:[%s5886_s3 + $0x734] ss:$100 sps:$4 sm:$0xff]   ;;  %v4147_v2 = vld [vmem:[%s5886_s3 + $0x728] ss:$100 sps:$4 sm:$0xff]  }
 0x110   :  { %2776 = vmatprep.subr.bf16.mxu1 %v4065_v3  ;;  %2817 = vmatprep.subr.bf16.mxu0 %v4068_v4  ;;  %v4150_v3 = vld [vmem:[%s5886_s3 + $0x730] ss:$100 sps:$4 sm:$0xff]  }
 0x111   :  { %v4155_v4 = vld [vmem:[%s5886_s3 + $0x7f4] ss:$100 sps:$4 sm:$0xff]  }
 0x113   :  { %2777 = vmatpush1.bf16.msra.mxu1 %v4063_v5  ;;  %2818 = vmatpush1.bf16.msra.mxu0 %v4066_v6  ;;  %v4158_v5 = vld [vmem:[%s5886_s3 + $0x7fc] ss:$100 sps:$4 sm:$0xff]   ;;  %v4153_v6 = vld [vmem:[%s5886_s3 + $0x7f0] ss:$100 sps:$4 sm:$0xff]  }
 0x114   :  { %2778 = vmatprep.subr.bf16.mxu1 %v4071_v7  ;;  %2819 = vmatprep.subr.bf16.mxu0 %v4074_v8  ;;  %v4156_v7 = vld [vmem:[%s5886_s3 + $0x7f8] ss:$100 sps:$4 sm:$0xff]  }
 0x115   :  { %v4161_v8 = vld [vmem:[%s5886_s3 + $0x8bc] ss:$100 sps:$4 sm:$0xff]  }
 0x117   :  { %2779 = vmatpush1.bf16.msra.mxu1 %v4069_v11  ;;  %2820 = vmatpush1.bf16.msra.mxu0 %v4072_v13  ;;  %v4164_v11 = vld [vmem:[%s5886_s3 + $0x8c4] ss:$100 sps:$4 sm:$0xff]   ;;  %v4159_v13 = vld [vmem:[%s5886_s3 + $0x8b8] ss:$100 sps:$4 sm:$0xff]  }
 0x118   :  { %2780 = vmatprep.subr.bf16.mxu1 %v4077_v14  ;;  %2821 = vmatprep.subr.bf16.mxu0 %v4080_v15  ;;  %v4162_v14 = vld [vmem:[%s5886_s3 + $0x8c0] ss:$100 sps:$4 sm:$0xff]  }
 0x119   :  { %v4167_v15 = vld [vmem:[%s5886_s3 + $0x984] ss:$100 sps:$4 sm:$0xff]  }
 0x11b   :  { %2781 = vmatpush1.bf16.msra.mxu1 %v4075_v16  ;;  %2822 = vmatpush1.bf16.msra.mxu0 %v4078_v17  ;;  %v4170_v16 = vld [vmem:[%s5886_s3 + $0x98c] ss:$100 sps:$4 sm:$0xff]   ;;  %v4165_v17 = vld [vmem:[%s5886_s3 + $0x980] ss:$100 sps:$4 sm:$0xff]  }
 0x11c   :  { %2782 = vmatprep.subr.bf16.mxu1 %v4083_v18  ;;  %2823 = vmatprep.subr.bf16.mxu0 %v4086_v19  ;;  %v4168_v18 = vld [vmem:[%s5886_s3 + $0x988] ss:$100 sps:$4 sm:$0xff]  }
 0x11d   :  { %v4173_v19 = vld [vmem:[%s5886_s3 + $0xa4c] ss:$100 sps:$4 sm:$0xff]  }
 0x11f   :  { %2783 = vmatpush1.bf16.msra.mxu1 %v4081_v20  ;;  %2824 = vmatpush1.bf16.msra.mxu0 %v4084_v21  ;;  %v4176_v20 = vld [vmem:[%s5886_s3 + $0xa54] ss:$100 sps:$4 sm:$0xff]   ;;  %v4171_v21 = vld [vmem:[%s5886_s3 + $0xa48] ss:$100 sps:$4 sm:$0xff]  }
 0x120   :  { %2784 = vmatprep.subr.bf16.mxu1 %v4089_v22  ;;  %2825 = vmatprep.subr.bf16.mxu0 %v4092_v24  ;;  %v4174_v22 = vld [vmem:[%s5886_s3 + $0xa50] ss:$100 sps:$4 sm:$0xff]  }
 0x121   :  { %v4179_v24 = vld [vmem:[%s5886_s3 + $0xb14] ss:$100 sps:$4 sm:$0xff]  }
 0x123   :  { %2785 = vmatpush1.bf16.msra.mxu1 %v4087_v25  ;;  %2826 = vmatpush1.bf16.msra.mxu0 %v4090_v27  ;;  %v4182_v25 = vld [vmem:[%s5886_s3 + $0xb1c] ss:$100 sps:$4 sm:$0xff]   ;;  %v4177_v27 = vld [vmem:[%s5886_s3 + $0xb10] ss:$100 sps:$4 sm:$0xff]  }
 0x124   :  { %2836 = vmatprep.subr.bf16.mxu1 %v4095_v28  ;;  %2877 = vmatprep.subr.bf16.mxu0 %v4098_v29  ;;  %v4180_v28 = vld [vmem:[%s5886_s3 + $0xb18] ss:$100 sps:$4 sm:$0xff]  }
 0x125   :  { %v4185_v29 = vld [vmem:[%s5886_s3 + $0xbdc] ss:$100 sps:$4 sm:$0xff]  }
 0x126   :  { %2787 = vmatmul.mubr.bf16.vlgmr.msra.gmra.mrb[4].mxu1 %v4759_v26  ;;  %2828 = vmatmul.mubr.bf16.vlgmr.msra.gmra.mrb[8].mxu0 %v4759_v26 }
 0x127   :  { %2837 = vmatpush1.bf16.msra.mxu1 %v4093_v30  ;;  %2868 = vmatprep.mubr.bf16.mxu1 %v4751_v23  ;;  %v4188_v30 = vld [vmem:[%s5886_s3 + $0xbe4] ss:$100 sps:$4 sm:$0xff]  }
 0x128   :  { %2878 = vmatpush1.bf16.msra.mxu0 %v4096_v31  ;;  %2909 = vmatprep.mubr.bf16.mxu0 %v4751_v23  ;;  %v4183_v31 = vld [vmem:[%s5886_s3 + $0xbd8] ss:$100 sps:$4 sm:$0xff]  }
 0x129   :  { %2838 = vmatprep.subr.bf16.mxu1 %v4101_v32  ;;  %2879 = vmatprep.subr.bf16.mxu0 %v4104_v33  ;;  %v4186_v32 = vld [vmem:[%s5886_s3 + $0xbe0] ss:$100 sps:$4 sm:$0xff]   ;;  %v4191_v33 = vld [vmem:[%s5886_s3 + $0x34] ss:$100 sps:$4 sm:$0xff]  }
 0x12b   :  { %2839 = vmatpush1.bf16.msra.mxu1 %v4099_v34  ;;  %v4194_v34 = vld [vmem:[%s5886_s3 + $0x3c] ss:$100 sps:$4 sm:$0xff]  }
 0x12c   :  { %2880 = vmatpush1.bf16.msra.mxu0 %v4102_v35  ;;  %2840 = vmatprep.subr.bf16.mxu1 %v4107_v36  ;;  %v4189_v35 = vld [vmem:[%s5886_s3 + $0x30] ss:$100 sps:$4 sm:$0xff]   ;;  %v4192_v36 = vld [vmem:[%s5886_s3 + $0x38] ss:$100 sps:$4 sm:$0xff]  }
 0x12d   :  { %2881 = vmatprep.subr.bf16.mxu0 %v4110_v37  ;;  %v4197_v37 = vld [vmem:[%s5886_s3 + $0xfc] ss:$100 sps:$4 sm:$0xff]  }
 0x12f   :  { %2841 = vmatpush1.bf16.msra.mxu1 %v4105_v38  ;;  %v4200_v38 = vld [vmem:[%s5886_s3 + $0x104] ss:$100 sps:$4 sm:$0xff]  }
 0x130   :  { %2882 = vmatpush1.bf16.msra.mxu0 %v4108_v39  ;;  %2842 = vmatprep.subr.bf16.mxu1 %v4113_v40  ;;  %v4195_v39 = vld [vmem:[%s5886_s3 + $0xf8] ss:$100 sps:$4 sm:$0xff]   ;;  %v4198_v40 = vld [vmem:[%s5886_s3 + $0x100] ss:$100 sps:$4 sm:$0xff]  }
 0x131   :  { %2883 = vmatprep.subr.bf16.mxu0 %v4116_v41  ;;  %v4203_v41 = vld [vmem:[%s5886_s3 + $0x1c4] ss:$100 sps:$4 sm:$0xff]  }
 0x133   :  { %2843 = vmatpush1.bf16.msra.mxu1 %v4111_v42  ;;  %v4206_v42 = vld [vmem:[%s5886_s3 + $0x1cc] ss:$100 sps:$4 sm:$0xff]  }
 0x134   :  { %2884 = vmatpush1.bf16.msra.mxu0 %v4114_v43  ;;  %2844 = vmatprep.subr.bf16.mxu1 %v4119_v44  ;;  %v4201_v43 = vld [vmem:[%s5886_s3 + $0x1c0] ss:$100 sps:$4 sm:$0xff]   ;;  %v4204_v44 = vld [vmem:[%s5886_s3 + $0x1c8] ss:$100 sps:$4 sm:$0xff]  }
 0x135   :  { %2885 = vmatprep.subr.bf16.mxu0 %v4122_v45  ;;  %v4209_v45 = vld [vmem:[%s5886_s3 + $0x28c] ss:$100 sps:$4 sm:$0xff]  }
 0x137   :  { %2845 = vmatpush1.bf16.msra.mxu1 %v4117_v46  ;;  %v4212_v46 = vld [vmem:[%s5886_s3 + $0x294] ss:$100 sps:$4 sm:$0xff]  }
 0x138   :  { %2886 = vmatpush1.bf16.msra.mxu0 %v4120_v47  ;;  %2846 = vmatprep.subr.bf16.mxu1 %v4125_v48  ;;  %v4207_v47 = vld [vmem:[%s5886_s3 + $0x288] ss:$100 sps:$4 sm:$0xff]   ;;  %v4210_v48 = vld [vmem:[%s5886_s3 + $0x290] ss:$100 sps:$4 sm:$0xff]  }
 0x139   :  { %2887 = vmatprep.subr.bf16.mxu0 %v4128_v49  ;;  %v4215_v49 = vld [vmem:[%s5886_s3 + $0x354] ss:$100 sps:$4 sm:$0xff]  }
 0x13b   :  { %2847 = vmatpush1.bf16.msra.mxu1 %v4123_v50  ;;  %v4218_v50 = vld [vmem:[%s5886_s3 + $0x35c] ss:$100 sps:$4 sm:$0xff]  }
 0x13c   :  { %2888 = vmatpush1.bf16.msra.mxu0 %v4126_v51  ;;  %2848 = vmatprep.subr.bf16.mxu1 %v4131_v52  ;;  %v4213_v51 = vld [vmem:[%s5886_s3 + $0x350] ss:$100 sps:$4 sm:$0xff]   ;;  %v4216_v52 = vld [vmem:[%s5886_s3 + $0x358] ss:$100 sps:$4 sm:$0xff]  }
 0x13d   :  { %2889 = vmatprep.subr.bf16.mxu0 %v4134_v53  ;;  %v4221_v53 = vld [vmem:[%s5886_s3 + $0x41c] ss:$100 sps:$4 sm:$0xff]  }
 0x13f   :  { %2849 = vmatpush1.bf16.msra.mxu1 %v4129_v54  ;;  %v4224_v54 = vld [vmem:[%s5886_s3 + $0x424] ss:$100 sps:$4 sm:$0xff]  }
 0x140   :  { %2890 = vmatpush1.bf16.msra.mxu0 %v4132_v55  ;;  %2850 = vmatprep.subr.bf16.mxu1 %v4137_v56  ;;  %v4219_v55 = vld [vmem:[%s5886_s3 + $0x418] ss:$100 sps:$4 sm:$0xff]   ;;  %v4222_v56 = vld [vmem:[%s5886_s3 + $0x420] ss:$100 sps:$4 sm:$0xff]  }
 0x141   :  { %2891 = vmatprep.subr.bf16.mxu0 %v4140_v57  ;;  %v4227_v57 = vld [vmem:[%s5886_s3 + $0x4e4] ss:$100 sps:$4 sm:$0xff]  }
 0x143   :  { %2851 = vmatpush1.bf16.msra.mxu1 %v4135_v58  ;;  %v4230_v58 = vld [vmem:[%s5886_s3 + $0x4ec] ss:$100 sps:$4 sm:$0xff]  }
 0x144   :  { %2892 = vmatpush1.bf16.msra.mxu0 %v4138_v59  ;;  %2852 = vmatprep.subr.bf16.mxu1 %v4143_v60  ;;  %v4225_v59 = vld [vmem:[%s5886_s3 + $0x4e0] ss:$100 sps:$4 sm:$0xff]   ;;  %v4228_v60 = vld [vmem:[%s5886_s3 + $0x4e8] ss:$100 sps:$4 sm:$0xff]  }
 0x145   :  { %2893 = vmatprep.subr.bf16.mxu0 %v4146_v61  ;;  %v4233_v61 = vld [vmem:[%s5886_s3 + $0x5ac] ss:$100 sps:$4 sm:$0xff]  }
 0x147   :  { %2853 = vmatpush1.bf16.msra.mxu1 %v4141_v62  ;;  %v4236_v62 = vld [vmem:[%s5886_s3 + $0x5b4] ss:$100 sps:$4 sm:$0xff]  }
 0x148   :  { %2894 = vmatpush1.bf16.msra.mxu0 %v4144_v63  ;;  %2854 = vmatprep.subr.bf16.mxu1 %v4149_v0  ;;  %v4231_v63 = vld [vmem:[%s5886_s3 + $0x5a8] ss:$100 sps:$4 sm:$0xff]   ;;  %v4234_v0 = vld [vmem:[%s5886_s3 + $0x5b0] ss:$100 sps:$4 sm:$0xff]  }
 0x149   :  { %2895 = vmatprep.subr.bf16.mxu0 %v4152_v1  ;;  %v4239_v1 = vld [vmem:[%s5886_s3 + $0x674] ss:$100 sps:$4 sm:$0xff]  }
 0x14b   :  { %2855 = vmatpush1.bf16.msra.mxu1 %v4147_v2  ;;  %v4242_v2 = vld [vmem:[%s5886_s3 + $0x67c] ss:$100 sps:$4 sm:$0xff]  }
 0x14c   :  { %2896 = vmatpush1.bf16.msra.mxu0 %v4150_v3  ;;  %2856 = vmatprep.subr.bf16.mxu1 %v4155_v4  ;;  %v4237_v3 = vld [vmem:[%s5886_s3 + $0x670] ss:$100 sps:$4 sm:$0xff]   ;;  %v4240_v4 = vld [vmem:[%s5886_s3 + $0x678] ss:$100 sps:$4 sm:$0xff]  }
 0x14d   :  { %2897 = vmatprep.subr.bf16.mxu0 %v4158_v5  ;;  %v4245_v5 = vld [vmem:[%s5886_s3 + $0x73c] ss:$100 sps:$4 sm:$0xff]  }
 0x14f   :  { %2857 = vmatpush1.bf16.msra.mxu1 %v4153_v6  ;;  %v4248_v6 = vld [vmem:[%s5886_s3 + $0x744] ss:$100 sps:$4 sm:$0xff]  }
 0x150   :  { %2898 = vmatpush1.bf16.msra.mxu0 %v4156_v7  ;;  %2858 = vmatprep.subr.bf16.mxu1 %v4161_v8  ;;  %v4243_v7 = vld [vmem:[%s5886_s3 + $0x738] ss:$100 sps:$4 sm:$0xff]   ;;  %v4246_v8 = vld [vmem:[%s5886_s3 + $0x740] ss:$100 sps:$4 sm:$0xff]  }
 0x151   :  { %2899 = vmatprep.subr.bf16.mxu0 %v4164_v11  ;;  %v4251_v11 = vld [vmem:[%s5886_s3 + $0x804] ss:$100 sps:$4 sm:$0xff]  }
 0x153   :  { %2859 = vmatpush1.bf16.msra.mxu1 %v4159_v13  ;;  %v4254_v13 = vld [vmem:[%s5886_s3 + $0x80c] ss:$100 sps:$4 sm:$0xff]  }
 0x154   :  { %2900 = vmatpush1.bf16.msra.mxu0 %v4162_v14  ;;  %2860 = vmatprep.subr.bf16.mxu1 %v4167_v15  ;;  %v4249_v14 = vld [vmem:[%s5886_s3 + $0x800] ss:$100 sps:$4 sm:$0xff]   ;;  %v4252_v15 = vld [vmem:[%s5886_s3 + $0x808] ss:$100 sps:$4 sm:$0xff]  }
 0x155   :  { %2901 = vmatprep.subr.bf16.mxu0 %v4170_v16  ;;  %v4257_v16 = vld [vmem:[%s5886_s3 + $0x8cc] ss:$100 sps:$4 sm:$0xff]  }
 0x157   :  { %2861 = vmatpush1.bf16.msra.mxu1 %v4165_v17  ;;  %v4260_v17 = vld [vmem:[%s5886_s3 + $0x8d4] ss:$100 sps:$4 sm:$0xff]  }
 0x158   :  { %2902 = vmatpush1.bf16.msra.mxu0 %v4168_v18  ;;  %2862 = vmatprep.subr.bf16.mxu1 %v4173_v19  ;;  %v4255_v18 = vld [vmem:[%s5886_s3 + $0x8c8] ss:$100 sps:$4 sm:$0xff]   ;;  %v4258_v19 = vld [vmem:[%s5886_s3 + $0x8d0] ss:$100 sps:$4 sm:$0xff]  }
 0x159   :  { %2903 = vmatprep.subr.bf16.mxu0 %v4176_v20  ;;  %v4263_v20 = vld [vmem:[%s5886_s3 + $0x994] ss:$100 sps:$4 sm:$0xff]  }
 0x15b   :  { %2863 = vmatpush1.bf16.msra.mxu1 %v4171_v21  ;;  %v4266_v21 = vld [vmem:[%s5886_s3 + $0x99c] ss:$100 sps:$4 sm:$0xff]  }
 0x15c   :  { %2904 = vmatpush1.bf16.msra.mxu0 %v4174_v22  ;;  %2864 = vmatprep.subr.bf16.mxu1 %v4179_v24  ;;  %v4261_v22 = vld [vmem:[%s5886_s3 + $0x990] ss:$100 sps:$4 sm:$0xff]   ;;  %v4264_v24 = vld [vmem:[%s5886_s3 + $0x998] ss:$100 sps:$4 sm:$0xff]  }
 0x15d   :  { %2905 = vmatprep.subr.bf16.mxu0 %v4182_v25  ;;  %v4269_v25 = vld [vmem:[%s5886_s3 + $0xa5c] ss:$100 sps:$4 sm:$0xff]  }
 0x15f   :  { %2865 = vmatpush1.bf16.msra.mxu1 %v4177_v27  ;;  %v4272_v27 = vld [vmem:[%s5886_s3 + $0xa64] ss:$100 sps:$4 sm:$0xff]  }
 0x160   :  { %2906 = vmatpush1.bf16.msra.mxu0 %v4180_v28  ;;  %2866 = vmatprep.subr.bf16.mxu1 %v4185_v29  ;;  %v4267_v28 = vld [vmem:[%s5886_s3 + $0xa58] ss:$100 sps:$4 sm:$0xff]   ;;  %v4270_v29 = vld [vmem:[%s5886_s3 + $0xa60] ss:$100 sps:$4 sm:$0xff]  }
 0x161   :  { %2907 = vmatprep.subr.bf16.mxu0 %v4188_v30  ;;  %v4275_v30 = vld [vmem:[%s5886_s3 + $0xb24] ss:$100 sps:$4 sm:$0xff]  }
 0x163   :  { %2867 = vmatpush1.bf16.msra.mxu1 %v4183_v31  ;;  %v4278_v31 = vld [vmem:[%s5886_s3 + $0xb2c] ss:$100 sps:$4 sm:$0xff]  }
 0x164   :  { %2908 = vmatpush1.bf16.msra.mxu0 %v4186_v32  ;;  %2918 = vmatprep.subr.bf16.mxu1 %v4191_v33  ;;  %v4273_v32 = vld [vmem:[%s5886_s3 + $0xb20] ss:$100 sps:$4 sm:$0xff]   ;;  %v4276_v33 = vld [vmem:[%s5886_s3 + $0xb28] ss:$100 sps:$4 sm:$0xff]  }
 0x165   :  { %2959 = vmatprep.subr.bf16.mxu0 %v4194_v34  ;;  %v4281_v34 = vld [vmem:[%s5886_s3 + $0xbec] ss:$100 sps:$4 sm:$0xff]  }
 0x166   :  { %2869 = vmatmul.mubr.bf16.vlgmr.msra.gmra.mrb[8].mxu1 %v4759_v26 }
 0x167   :  { %2910 = vmatmul.mubr.bf16.vlgmr.msra.gmra.mrb[12].mxu0 %v4759_v26  ;;  %2919 = vmatpush1.bf16.msra.mxu1 %v4189_v35  ;;  %v4284_v35 = vld [vmem:[%s5886_s3 + $0xbf4] ss:$100 sps:$4 sm:$0xff]  }
 0x168   :  { %2950 = vmatprep.mubr.bf16.mxu1 %v4751_v23  ;;  %2960 = vmatpush1.bf16.msra.mxu0 %v4192_v36  ;;  %v4279_v36 = vld [vmem:[%s5886_s3 + $0xbe8] ss:$100 sps:$4 sm:$0xff]  }
 0x169   :  { %2991 = vmatprep.mubr.bf16.mxu0 %v4751_v23  ;;  %2920 = vmatprep.subr.bf16.mxu1 %v4197_v37  ;;  %v4282_v37 = vld [vmem:[%s5886_s3 + $0xbf0] ss:$100 sps:$4 sm:$0xff]  }
 0x16a   :  { %2961 = vmatprep.subr.bf16.mxu0 %v4200_v38  ;;  %v4287_v38 = vld [vmem:[%s5886_s3 + $0x44] ss:$100 sps:$4 sm:$0xff]  }
 0x16b   :  { %2921 = vmatpush1.bf16.msra.mxu1 %v4195_v39  ;;  %v4290_v39 = vld [vmem:[%s5886_s3 + $0x4c] ss:$100 sps:$4 sm:$0xff]  }
 0x16c   :  { %2962 = vmatpush1.bf16.msra.mxu0 %v4198_v40  ;;  %2922 = vmatprep.subr.bf16.mxu1 %v4203_v41  ;;  %v4285_v40 = vld [vmem:[%s5886_s3 + $0x40] ss:$100 sps:$4 sm:$0xff]   ;;  %v4288_v41 = vld [vmem:[%s5886_s3 + $0x48] ss:$100 sps:$4 sm:$0xff]  }
 0x16d   :  { %2963 = vmatprep.subr.bf16.mxu0 %v4206_v42  ;;  %v4293_v42 = vld [vmem:[%s5886_s3 + $0x10c] ss:$100 sps:$4 sm:$0xff]  }
 0x16f   :  { %2923 = vmatpush1.bf16.msra.mxu1 %v4201_v43  ;;  %v4296_v43 = vld [vmem:[%s5886_s3 + $0x114] ss:$100 sps:$4 sm:$0xff]  }
 0x170   :  { %2964 = vmatpush1.bf16.msra.mxu0 %v4204_v44  ;;  %2924 = vmatprep.subr.bf16.mxu1 %v4209_v45  ;;  %v4291_v44 = vld [vmem:[%s5886_s3 + $0x108] ss:$100 sps:$4 sm:$0xff]   ;;  %v4294_v45 = vld [vmem:[%s5886_s3 + $0x110] ss:$100 sps:$4 sm:$0xff]  }
 0x171   :  { %2965 = vmatprep.subr.bf16.mxu0 %v4212_v46  ;;  %v4299_v46 = vld [vmem:[%s5886_s3 + $0x1d4] ss:$100 sps:$4 sm:$0xff]  }
 0x173   :  { %2925 = vmatpush1.bf16.msra.mxu1 %v4207_v47  ;;  %v4302_v47 = vld [vmem:[%s5886_s3 + $0x1dc] ss:$100 sps:$4 sm:$0xff]  }
 0x174   :  { %2966 = vmatpush1.bf16.msra.mxu0 %v4210_v48  ;;  %2926 = vmatprep.subr.bf16.mxu1 %v4215_v49  ;;  %v4297_v48 = vld [vmem:[%s5886_s3 + $0x1d0] ss:$100 sps:$4 sm:$0xff]   ;;  %v4300_v49 = vld [vmem:[%s5886_s3 + $0x1d8] ss:$100 sps:$4 sm:$0xff]  }
 0x175   :  { %2967 = vmatprep.subr.bf16.mxu0 %v4218_v50  ;;  %v4305_v50 = vld [vmem:[%s5886_s3 + $0x29c] ss:$100 sps:$4 sm:$0xff]  }
 0x177   :  { %2927 = vmatpush1.bf16.msra.mxu1 %v4213_v51  ;;  %v4308_v51 = vld [vmem:[%s5886_s3 + $0x2a4] ss:$100 sps:$4 sm:$0xff]  }
 0x178   :  { %2968 = vmatpush1.bf16.msra.mxu0 %v4216_v52  ;;  %2928 = vmatprep.subr.bf16.mxu1 %v4221_v53  ;;  %v4303_v52 = vld [vmem:[%s5886_s3 + $0x298] ss:$100 sps:$4 sm:$0xff]   ;;  %v4306_v53 = vld [vmem:[%s5886_s3 + $0x2a0] ss:$100 sps:$4 sm:$0xff]  }
 0x179   :  { %2969 = vmatprep.subr.bf16.mxu0 %v4224_v54  ;;  %v4311_v54 = vld [vmem:[%s5886_s3 + $0x364] ss:$100 sps:$4 sm:$0xff]  }
 0x17b   :  { %2929 = vmatpush1.bf16.msra.mxu1 %v4219_v55  ;;  %v4314_v55 = vld [vmem:[%s5886_s3 + $0x36c] ss:$100 sps:$4 sm:$0xff]  }
 0x17c   :  { %2970 = vmatpush1.bf16.msra.mxu0 %v4222_v56  ;;  %2930 = vmatprep.subr.bf16.mxu1 %v4227_v57  ;;  %v5398_v56 = vsub.s32 2, %v4738_v9  ;;  %v4309_v57 = vld [vmem:[%s5886_s3 + $0x360] ss:$100 sps:$4 sm:$0xff]  }
 0x17d   :  { %2971 = vmatprep.subr.bf16.mxu0 %v4230_v58  ;;  %v5406_v58 = vld [vmem:[%s5889_s4] sm:$0xff] }
 0x17f   :  { %2931 = vmatpush1.bf16.msra.mxu1 %v4225_v59  ;;  %v5409_v59 = vsub.s32 3, %v4738_v9 }
 0x180   :  { %2972 = vmatpush1.bf16.msra.mxu0 %v4228_v60  ;;  %2932 = vmatprep.subr.bf16.mxu1 %v4233_v61  ;;  %v4312_v60 = vld [vmem:[%s5886_s3 + $0x368] ss:$100 sps:$4 sm:$0xff]  }
 0x181   :  { %2973 = vmatprep.subr.bf16.mxu0 %v4236_v62  ;;  %v4317_v61 = vld [vmem:[%s5886_s3 + $0x42c] ss:$100 sps:$4 sm:$0xff]   ;;  %v4320_v62 = vld [vmem:[%s5886_s3 + $0x434] ss:$100 sps:$4 sm:$0xff]  }
 0x183   :  { %2933 = vmatpush1.bf16.msra.mxu1 %v4231_v63  ;;  %v4494_v63 = vmov 1966171168  }
 0x184   :  { %2974 = vmatpush1.bf16.msra.mxu0 %v4234_v0  ;;  %2934 = vmatprep.subr.bf16.mxu1 %v4239_v1  ;;  %v3284_v0 = vunpack.c.l.s4 %v4494_v63  ;;  %v534_v1 = vrot.slane %v5406_v58, %v4741_v10  ;;  %v4362_v63 = vld [vmem:[%s5886_s3 + $0x9ac] ss:$100 sps:$4 sm:$0xff]  }
 0x185   :  { %2975 = vmatprep.subr.bf16.mxu0 %v4242_v2  ;;  %v542_v2 = vrot.slane %v5406_v58, %v5398_v56 }
 0x187   :  { %2935 = vmatpush1.bf16.msra.mxu1 %v4237_v3  ;;  %v4315_v3 = vld [vmem:[%s5886_s3 + $0x428] ss:$100 sps:$4 sm:$0xff]  }
 0x188   :  { %2976 = vmatpush1.bf16.msra.mxu0 %v4240_v4  ;;  %2936 = vmatprep.subr.bf16.mxu1 %v4245_v5  ;;  %v538_v4 = vrot.slane %v5406_v58, %v4747_v12  ;;  %v546_v5 = vrot.slane %v5406_v58, %v5409_v59 }
 0x189   :  { %2977 = vmatprep.subr.bf16.mxu0 %v4248_v6  ;;  %v4318_v6 = vld [vmem:[%s5886_s3 + $0x430] ss:$100 sps:$4 sm:$0xff]  }
 0x18b   :  { %2937 = vmatpush1.bf16.msra.mxu1 %v4243_v7  ;;  %v4323_v7 = vld [vmem:[%s5886_s3 + $0x4f4] ss:$100 sps:$4 sm:$0xff]  }
 0x18c   :  { %2978 = vmatpush1.bf16.msra.mxu0 %v4246_v8  ;;  %2938 = vmatprep.subr.bf16.mxu1 %v4251_v11 }
 0x18d   :  { %2979 = vmatprep.subr.bf16.mxu0 %v4254_v13  ;;  %v3285_v13 = vunpack.c.0.s8 %v3284_v0  ;;  %v4357_v0 = vld [vmem:[%s5886_s3 + $0x9a0] ss:$100 sps:$4 sm:$0xff]  }
 0x18f   :  { %2939 = vmatpush1.bf16.msra.mxu1 %v4249_v14  ;;  %v4326_v14 = vld [vmem:[%s5886_s3 + $0x4fc] ss:$100 sps:$4 sm:$0xff]  }
 0x190   :  { %2980 = vmatpush1.bf16.msra.mxu0 %v4252_v15  ;;  %2940 = vmatprep.subr.bf16.mxu1 %v4257_v16 }
 0x191   :  { %2981 = vmatprep.subr.bf16.mxu0 %v4260_v17 }
 0x193   :  { %2941 = vmatpush1.bf16.msra.mxu1 %v4255_v18 }
 0x194   :  { %2982 = vmatpush1.bf16.msra.mxu0 %v4258_v19  ;;  %2942 = vmatprep.subr.bf16.mxu1 %v4263_v20 }
 0x195   :  { %2983 = vmatprep.subr.bf16.mxu0 %v4266_v21 }
 0x197   :  { %2943 = vmatpush1.bf16.msra.mxu1 %v4261_v22 }
 0x198   :  { %2984 = vmatpush1.bf16.msra.mxu0 %v4264_v24  ;;  %2944 = vmatprep.subr.bf16.mxu1 %v4269_v25  ;;  %v4321_v24 = vld [vmem:[%s5886_s3 + $0x4f0] ss:$100 sps:$4 sm:$0xff]   ;;  %v4324_v25 = vld [vmem:[%s5886_s3 + $0x4f8] ss:$100 sps:$4 sm:$0xff]  }
 0x199   :  { %2985 = vmatprep.subr.bf16.mxu0 %v4272_v27 }
 0x19b   :  { %2945 = vmatpush1.bf16.msra.mxu1 %v4267_v28 }
 0x19c   :  { %2986 = vmatpush1.bf16.msra.mxu0 %v4270_v29  ;;  %2946 = vmatprep.subr.bf16.mxu1 %v4275_v30 }
 0x19d   :  { %2987 = vmatprep.subr.bf16.mxu0 %v4278_v31  ;;  %v4329_v31 = vld [vmem:[%s5886_s3 + $0x5bc] ss:$100 sps:$4 sm:$0xff]  }
 0x19f   :  { %2947 = vmatpush1.bf16.msra.mxu1 %v4273_v32 }
 0x1a0   :  { %2988 = vmatpush1.bf16.msra.mxu0 %v4276_v33  ;;  %2948 = vmatprep.subr.bf16.mxu1 %v4281_v34  ;;  %v5450_v33 = vsub.s32 %v3285_v13, %v4738_v9  ;;  %v4377_v13 = vld [vmem:[%s5886_s3 + $0xbfc] ss:$100 sps:$4 sm:$0xff]  }
 0x1a1   :  { %2989 = vmatprep.subr.bf16.mxu0 %v4284_v35  ;;  %v4332_v35 = vld [vmem:[%s5886_s3 + $0x5c4] ss:$100 sps:$4 sm:$0xff]  }
 0x1a3   :  { %2949 = vmatpush1.bf16.msra.mxu1 %v4279_v36 }
 0x1a4   :  { %2990 = vmatpush1.bf16.msra.mxu0 %v4282_v37  ;;  %3000 = vmatprep.subr.bf16.mxu1 %v4287_v38  ;;  %v4327_v38 = vld [vmem:[%s5886_s3 + $0x5b8] ss:$100 sps:$4 sm:$0xff]  }
 0x1a5   :  { %3041 = vmatprep.subr.bf16.mxu0 %v4290_v39  ;;  %v4330_v39 = vld [vmem:[%s5886_s3 + $0x5c0] ss:$100 sps:$4 sm:$0xff]  }
 0x1a6   :  { %2951 = vmatmul.mubr.bf16.vlgmr.msra.gmra.mrb[12].mxu1 %v4759_v26 }
 0x1a7   :  { %2992 = vmatmul.mubr.bf16.vlgmr.msra.gmra.mrb[16].mxu0 %v4759_v26  ;;  %3001 = vmatpush1.bf16.msra.mxu1 %v4285_v40  ;;  %v4335_v40 = vld [vmem:[%s5886_s3 + $0x684] ss:$100 sps:$4 sm:$0xff]  }
 0x1a8   :  { %3032 = vmatprep.mubr.bf16.mxu1 %v4751_v23  ;;  %3042 = vmatpush1.bf16.msra.mxu0 %v4288_v41 }
 0x1a9   :  { %3073 = vmatprep.mubr.bf16.mxu0 %v4751_v23  ;;  %3002 = vmatprep.subr.bf16.mxu1 %v4293_v42 }
 0x1aa   :  { %3043 = vmatprep.subr.bf16.mxu0 %v4296_v43  ;;  %v4338_v43 = vld [vmem:[%s5886_s3 + $0x68c] ss:$100 sps:$4 sm:$0xff]  }
 0x1ab   :  { %3003 = vmatpush1.bf16.msra.mxu1 %v4291_v44 }
 0x1ac   :  { %3044 = vmatpush1.bf16.msra.mxu0 %v4294_v45  ;;  %3004 = vmatprep.subr.bf16.mxu1 %v4299_v46  ;;  %v4333_v45 = vld [vmem:[%s5886_s3 + $0x680] ss:$100 sps:$4 sm:$0xff]   ;;  %v4336_v46 = vld [vmem:[%s5886_s3 + $0x688] ss:$100 sps:$4 sm:$0xff]  }
 0x1ad   :  { %3045 = vmatprep.subr.bf16.mxu0 %v4302_v47  ;;  %v4341_v47 = vld [vmem:[%s5886_s3 + $0x74c] ss:$100 sps:$4 sm:$0xff]  }
 0x1af   :  { %3005 = vmatpush1.bf16.msra.mxu1 %v4297_v48  ;;  %v4344_v48 = vld [vmem:[%s5886_s3 + $0x754] ss:$100 sps:$4 sm:$0xff]  }
 0x1b0   :  { %3046 = vmatpush1.bf16.msra.mxu0 %v4300_v49  ;;  %3006 = vmatprep.subr.bf16.mxu1 %v4305_v50  ;;  %v4339_v49 = vld [vmem:[%s5886_s3 + $0x748] ss:$100 sps:$4 sm:$0xff]   ;;  %v4342_v50 = vld [vmem:[%s5886_s3 + $0x750] ss:$100 sps:$4 sm:$0xff]  }
 0x1b1   :  { %3047 = vmatprep.subr.bf16.mxu0 %v4308_v51  ;;  %v4347_v51 = vld [vmem:[%s5886_s3 + $0x814] ss:$100 sps:$4 sm:$0xff]  }
 0x1b3   :  { %3007 = vmatpush1.bf16.msra.mxu1 %v4303_v52  ;;  %v4350_v52 = vld [vmem:[%s5886_s3 + $0x81c] ss:$100 sps:$4 sm:$0xff]  }
 0x1b4   :  { %3048 = vmatpush1.bf16.msra.mxu0 %v4306_v53  ;;  %3008 = vmatprep.subr.bf16.mxu1 %v4311_v54  ;;  %v4345_v53 = vld [vmem:[%s5886_s3 + $0x810] ss:$100 sps:$4 sm:$0xff]   ;;  %v4348_v54 = vld [vmem:[%s5886_s3 + $0x818] ss:$100 sps:$4 sm:$0xff]  }
 0x1b5   :  { %3049 = vmatprep.subr.bf16.mxu0 %v4314_v55  ;;  %v4353_v55 = vld [vmem:[%s5886_s3 + $0x8dc] ss:$100 sps:$4 sm:$0xff]  }
 0x1b7   :  { %3009 = vmatpush1.bf16.msra.mxu1 %v4309_v57  ;;  %v4356_v57 = vld [vmem:[%s5886_s3 + $0x8e4] ss:$100 sps:$4 sm:$0xff]  }
 0x1b8   :  { %3050 = vmatpush1.bf16.msra.mxu0 %v4312_v60  ;;  %3010 = vmatprep.subr.bf16.mxu1 %v4317_v61  ;;  %v4351_v60 = vld [vmem:[%s5886_s3 + $0x8d8] ss:$100 sps:$4 sm:$0xff]   ;;  %v4354_v61 = vld [vmem:[%s5886_s3 + $0x8e0] ss:$100 sps:$4 sm:$0xff]  }
 0x1b9   :  { %v2706_v8 = vpop.f32.mrb[0].mxu1  ;;  %v2747_v11 = vpop.f32.mrb[4].mxu0  ;;  %3051 = vmatprep.subr.bf16.mxu0 %v4320_v62  ;;  %v4359_v62 = vld [vmem:[%s5886_s3 + $0x9a4] ss:$100 sps:$4 sm:$0xff]  }
 0x1ba   :  { %v2707_v15 = vadd.f32 %v2706_v8, %v534_v1  ;;  %v2748_v16 = vadd.f32 %v2747_v11, %v542_v2  ;;  %v2708_v17 = vpop.f32.mrb[1].mxu1  ;;  %v2749_v18 = vpop.f32.mrb[5].mxu0  ;;  %v4360_v1 = vld [vmem:[%s5886_s3 + $0x9a8] ss:$100 sps:$4 sm:$0xff]   ;;  %v4369_v8 = vld [vmem:[%s5886_s3 + $0xb30] ss:$100 sps:$4 sm:$0xff]  }
 0x1bb   :  { %v2709_v19 = vadd.f32 %v2708_v17, %v538_v4  ;;  %v2750_v20 = vadd.f32 %v2749_v18, %v546_v5  ;;  %3011 = vmatpush1.bf16.msra.mxu1 %v4315_v3  ;;  %v2710_v21 = vpop.f32.mrb[2].mxu1  ;;  %v2751_v22 = vpop.f32.mrb[6].mxu0  ;;  %v4365_v2 = vld [vmem:[%s5886_s3 + $0xa6c] ss:$100 sps:$4 sm:$0xff]   ;;  %v4368_v3 = vld [vmem:[%s5886_s3 + $0xa74] ss:$100 sps:$4 sm:$0xff]  }
 0x1bc   :  { %v3204_v27 = vmax.f32 %v2707_v15, 0.0  ;;  %v3206_v28 = vmax.f32 %v2748_v16, 0.0  ;;  %3052 = vmatpush1.bf16.msra.mxu0 %v4318_v6  ;;  %v2711_v29 = vpop.f32.mrb[3].mxu1  ;;  %v2752_v30 = vpop.f32.mrb[7].mxu0  ;;  %3012 = vmatprep.subr.bf16.mxu1 %v4323_v7  ;;  %v4363_v4 = vld [vmem:[%s5886_s3 + $0xa68] ss:$100 sps:$4 sm:$0xff]  }
 0x1bd   :  { %v3205_v32 = vmax.f32 %v2709_v19, 0.0  ;;  %v3207_v34 = vmax.f32 %v2750_v20, 0.0  ;;  %3053 = vmatprep.subr.bf16.mxu0 %v4326_v14  ;;  %v4366_v5 = vld [vmem:[%s5886_s3 + $0xa70] ss:$100 sps:$4 sm:$0xff]   ;;  %v4374_v7 = vld [vmem:[%s5886_s3 + $0xb3c] ss:$100 sps:$4 sm:$0xff]  }
 0x1be   :  { %v4371_v6 = vld [vmem:[%s5886_s3 + $0xb34] ss:$100 sps:$4 sm:$0xff]   ;;  %v4380_v14 = vld [vmem:[%s5886_s3 + $0xc04] ss:$100 sps:$4 sm:$0xff]   ;;  %v4386_v18 = vld [vmem:[%s5886_s3 + $0x5c] ss:$100 sps:$4 sm:$0xff]  }
 0x1bf   :  { %v3859_v36 = vpack.c.bf16 %v3205_v32, %v3204_v27  ;;  %v3860_v37 = vpack.c.bf16 %v3207_v34, %v3206_v28  ;;  %3013 = vmatpush1.bf16.msra.mxu1 %v4321_v24  ;;  %v4372_v11 = vld [vmem:[%s5886_s3 + $0xb38] ss:$100 sps:$4 sm:$0xff]   ;;  %v4378_v16 = vld [vmem:[%s5886_s3 + $0xc00] ss:$100 sps:$4 sm:$0xff]   ;;  %v4381_v19 = vld [vmem:[%s5886_s3 + $0x50] ss:$100 sps:$4 sm:$0xff]  }
 0x1c0   :  { %3054 = vmatpush1.bf16.msra.mxu0 %v4324_v25  ;;  %3014 = vmatprep.subr.bf16.mxu1 %v4329_v31  ;;  %v4375_v15 = vld [vmem:[%s5886_s3 + $0xbf8] ss:$100 sps:$4 sm:$0xff]   ;;  %v4392_v22 = vld [vmem:[%s5886_s3 + $0x124] ss:$100 sps:$4 sm:$0xff]   ;;  %v4398_v28 = vld [vmem:[%s5886_s3 + $0x1ec] ss:$100 sps:$4 sm:$0xff]  }
 0x1c1   :  { %v3289_v41 = vrot.slane %v3859_v36, %v5450_v33  ;;  %v3296_v42 = vrot.slane %v3860_v37, %v5450_v33  ;;  %3055 = vmatprep.subr.bf16.mxu0 %v4332_v35  ;;  %v4383_v17 = vld [vmem:[%s5886_s3 + $0x54] ss:$100 sps:$4 sm:$0xff]   ;;  %v4389_v21 = vld [vmem:[%s5886_s3 + $0x11c] ss:$100 sps:$4 sm:$0xff]   ;;  %v4395_v27 = vld [vmem:[%s5886_s3 + $0x1e4] ss:$100 sps:$4 sm:$0xff]  }
 0x1c2   :  { %v4384_v20 = vld [vmem:[%s5886_s3 + $0x58] ss:$100 sps:$4 sm:$0xff]   ;;  %v4390_v25 = vld [vmem:[%s5886_s3 + $0x120] ss:$100 sps:$4 sm:$0xff]   ;;  %v4396_v30 = vld [vmem:[%s5886_s3 + $0x1e8] ss:$100 sps:$4 sm:$0xff]  }
 0x1c3   :  { %v5469_v44 = vcombine.low %v3289_v41, %v3296_v42  ;;  %3015 = vmatpush1.bf16.msra.mxu1 %v4327_v38  ;;  %v4387_v24 = vld [vmem:[%s5886_s3 + $0x118] ss:$100 sps:$4 sm:$0xff]   ;;  %v4393_v29 = vld [vmem:[%s5886_s3 + $0x1e0] ss:$100 sps:$4 sm:$0xff]   ;;  %v4401_v31 = vld [vmem:[%s5886_s3 + $0x2ac] ss:$100 sps:$4 sm:$0xff]  }
 0x1c4   :  { %3056 = vmatpush1.bf16.msra.mxu0 %v4330_v39  ;;  %3016 = vmatprep.subr.bf16.mxu1 %v4335_v40  ;;  %v4404_v32 = vld [vmem:[%s5886_s3 + $0x2b4] ss:$100 sps:$4 sm:$0xff]   ;;  %v4399_v34 = vld [vmem:[%s5886_s3 + $0x2a8] ss:$100 sps:$4 sm:$0xff]   ;;  %v4410_v37 = vld [vmem:[%s5886_s3 + $0x37c] ss:$100 sps:$4 sm:$0xff]  }
 0x1c5   :  { %3057 = vmatprep.subr.bf16.mxu0 %v4338_v43  ;;  %v4402_v35 = vld [vmem:[%s5886_s3 + $0x2b0] ss:$100 sps:$4 sm:$0xff]   ;;  %v5620_v38 = vsub.s32 4, %v4738_v9  ;;  %v5623_v39 = vsub.s32 6, %v4738_v9  ;;  %v5629_v41 = vsub.s32 5, %v4738_v9  ;;  %v5632_v42 = vsub.s32 7, %v4738_v9 }
 0x1c6   :  { %v4407_v36 = vld [vmem:[%s5886_s3 + $0x374] ss:$100 sps:$4 sm:$0xff]  }
 0x1c7   :  { %3017 = vmatpush1.bf16.msra.mxu1 %v4333_v45  ;;  %v4405_v40 = vld [vmem:[%s5886_s3 + $0x370] ss:$100 sps:$4 sm:$0xff]   ;;  %v4408_v43 = vld [vmem:[%s5886_s3 + $0x378] ss:$100 sps:$4 sm:$0xff]   ;;  %v558_v9 = vrot.slane %v5406_v58, %v5623_v39 }
 0x1c8   :  { %3058 = vmatpush1.bf16.msra.mxu0 %v4336_v46  ;;  %3018 = vmatprep.subr.bf16.mxu1 %v4341_v47  ;;  %v4413_v45 = vld [vmem:[%s5886_s3 + $0x43c] ss:$100 sps:$4 sm:$0xff]   ;;  %v4416_v46 = vld [vmem:[%s5886_s3 + $0x444] ss:$100 sps:$4 sm:$0xff]   ;;  %v550_v47 = vrot.slane %v5406_v58, %v5620_v38 }
 0x1c9   :  { %3059 = vmatprep.subr.bf16.mxu0 %v4344_v48  ;;  %v554_v48 = vrot.slane %v5406_v58, %v5629_v41 }
 0x1cb   :  { %3019 = vmatpush1.bf16.msra.mxu1 %v4339_v49  ;;  %v562_v49 = vrot.slane %v5406_v58, %v5632_v42  ;;  %v4422_v58 = vld [vmem:[%s5886_s3 + $0x50c] ss:$100 sps:$4 sm:$0xff]  }
 0x1cc   :  { %3060 = vmatpush1.bf16.msra.mxu0 %v4342_v50  ;;  %3020 = vmatprep.subr.bf16.mxu1 %v4347_v51  ;;  %v4411_v50 = vld [vmem:[%s5886_s3 + $0x438] ss:$100 sps:$4 sm:$0xff]   ;;  %v4414_v51 = vld [vmem:[%s5886_s3 + $0x440] ss:$100 sps:$4 sm:$0xff]  }
 0x1cd   :  { %3061 = vmatprep.subr.bf16.mxu0 %v4350_v52  ;;  %v4419_v52 = vld [vmem:[%s5886_s3 + $0x504] ss:$100 sps:$4 sm:$0xff]  }
 0x1cf   :  { %3021 = vmatpush1.bf16.msra.mxu1 %v4345_v53 }
 0x1d0   :  { %3062 = vmatpush1.bf16.msra.mxu0 %v4348_v54  ;;  %3022 = vmatprep.subr.bf16.mxu1 %v4353_v55 }
 0x1d1   :  { %3063 = vmatprep.subr.bf16.mxu0 %v4356_v57 }
 0x1d3   :  { %3023 = vmatpush1.bf16.msra.mxu1 %v4351_v60 }
 0x1d4   :  { %3064 = vmatpush1.bf16.msra.mxu0 %v4354_v61  ;;  %3024 = vmatprep.subr.bf16.mxu1 %v4359_v62 }
 0x1d5   :  { %3065 = vmatprep.subr.bf16.mxu0 %v4362_v63 }
 0x1d7   :  { %3025 = vmatpush1.bf16.msra.mxu1 %v4357_v0 }
 0x1d8   :  { %3066 = vmatpush1.bf16.msra.mxu0 %v4360_v1  ;;  %3026 = vmatprep.subr.bf16.mxu1 %v4365_v2  ;;  %v4417_v2 = vld [vmem:[%s5886_s3 + $0x500] ss:$100 sps:$4 sm:$0xff]  }
 0x1d9   :  { %3067 = vmatprep.subr.bf16.mxu0 %v4368_v3  ;;  %v4420_v3 = vld [vmem:[%s5886_s3 + $0x508] ss:$100 sps:$4 sm:$0xff]  }
 0x1db   :  { %3027 = vmatpush1.bf16.msra.mxu1 %v4363_v4 }
 0x1dc   :  { %3068 = vmatpush1.bf16.msra.mxu0 %v4366_v5  ;;  %3028 = vmatprep.subr.bf16.mxu1 %v4371_v6 }
 0x1dd   :  { %3069 = vmatprep.subr.bf16.mxu0 %v4374_v7 }
 0x1df   :  { %3029 = vmatpush1.bf16.msra.mxu1 %v4369_v8  ;;  %v4425_v8 = vld [vmem:[%s5886_s3 + $0x5cc] ss:$100 sps:$4 sm:$0xff]  }
 0x1e0   :  { %3070 = vmatpush1.bf16.msra.mxu0 %v4372_v11  ;;  %3030 = vmatprep.subr.bf16.mxu1 %v4377_v13 }
 0x1e1   :  { %3071 = vmatprep.subr.bf16.mxu0 %v4380_v14  ;;  %v4428_v14 = vld [vmem:[%s5886_s3 + $0x5d4] ss:$100 sps:$4 sm:$0xff]  }
 0x1e3   :  { %3031 = vmatpush1.bf16.msra.mxu1 %v4375_v15 }
 0x1e4   :  { %3072 = vmatpush1.bf16.msra.mxu0 %v4378_v16  ;;  %3082 = vmatprep.subr.bf16.mxu1 %v4383_v17  ;;  %v4423_v17 = vld [vmem:[%s5886_s3 + $0x5c8] ss:$100 sps:$4 sm:$0xff]  }
 0x1e5   :  { %3123 = vmatprep.subr.bf16.mxu0 %v4386_v18  ;;  %v4426_v18 = vld [vmem:[%s5886_s3 + $0x5d0] ss:$100 sps:$4 sm:$0xff]  }
 0x1e6   :  { %3033 = vmatmul.mubr.bf16.vlgmr.msra.gmra.mrb[16].mxu1 %v4759_v26 }
 0x1e7   :  { %3074 = vmatmul.mubr.bf16.vlgmr.msra.gmra.mrb[20].mxu0 %v4759_v26  ;;  %3083 = vmatpush1.bf16.msra.mxu1 %v4381_v19  ;;  %v4431_v19 = vld [vmem:[%s5886_s3 + $0x694] ss:$100 sps:$4 sm:$0xff]  }
 0x1e8   :  { %3114 = vmatprep.mubr.bf16.mxu1 %v4751_v23  ;;  %3124 = vmatpush1.bf16.msra.mxu0 %v4384_v20 }
 0x1e9   :  { %3155 = vmatprep.mubr.bf16.mxu0 %v4751_v23  ;;  %3084 = vmatprep.subr.bf16.mxu1 %v4389_v21 }
 0x1ea   :  { %3125 = vmatprep.subr.bf16.mxu0 %v4392_v22  ;;  %v4434_v22 = vld [vmem:[%s5886_s3 + $0x69c] ss:$100 sps:$4 sm:$0xff]  }
 0x1eb   :  { %3085 = vmatpush1.bf16.msra.mxu1 %v4387_v24 }
 0x1ec   :  { %3126 = vmatpush1.bf16.msra.mxu0 %v4390_v25  ;;  %3086 = vmatprep.subr.bf16.mxu1 %v4395_v27  ;;  %v4429_v25 = vld [vmem:[%s5886_s3 + $0x690] ss:$100 sps:$4 sm:$0xff]   ;;  %v4432_v27 = vld [vmem:[%s5886_s3 + $0x698] ss:$100 sps:$4 sm:$0xff]  }
 0x1ed   :  { %3127 = vmatprep.subr.bf16.mxu0 %v4398_v28  ;;  %v4437_v28 = vld [vmem:[%s5886_s3 + $0x75c] ss:$100 sps:$4 sm:$0xff]  }
 0x1ef   :  { %3087 = vmatpush1.bf16.msra.mxu1 %v4393_v29  ;;  %v3319_v29 = vrot.slane %v5469_v44, %v5450_v33  ;;  %v4443_v44 = vld [vmem:[%s5886_s3 + $0x824] ss:$100 sps:$4 sm:$0xff]  }
 0x1f0   :  { %3128 = vmatpush1.bf16.msra.mxu0 %v4396_v30  ;;  %3088 = vmatprep.subr.bf16.mxu1 %v4401_v31  ;;  %v4440_v31 = vld [vmem:[%s5886_s3 + $0x764] ss:$100 sps:$4 sm:$0xff]  }
 0x1f1   :  { %3129 = vmatprep.subr.bf16.mxu0 %v4404_v32 }
 0x1f3   :  { %3089 = vmatpush1.bf16.msra.mxu1 %v4399_v34  ;;  %v4435_v34 = vld [vmem:[%s5886_s3 + $0x758] ss:$100 sps:$4 sm:$0xff]  }
 0x1f4   :  { %3130 = vmatpush1.bf16.msra.mxu0 %v4402_v35  ;;  %3090 = vmatprep.subr.bf16.mxu1 %v4407_v36  ;;  %v4438_v35 = vld [vmem:[%s5886_s3 + $0x760] ss:$100 sps:$4 sm:$0xff]   ;;  %v4446_v36 = vld [vmem:[%s5886_s3 + $0x82c] ss:$100 sps:$4 sm:$0xff]  }
 0x1f5   :  { %3131 = vmatprep.subr.bf16.mxu0 %v4410_v37  ;;  %v4441_v37 = vld [vmem:[%s5886_s3 + $0x820] ss:$100 sps:$4 sm:$0xff]  }
 0x1f7   :  { %3091 = vmatpush1.bf16.msra.mxu1 %v4405_v40  ;;  %v4444_v40 = vld [vmem:[%s5886_s3 + $0x828] ss:$100 sps:$4 sm:$0xff]  }
 0x1f8   :  { %3132 = vmatpush1.bf16.msra.mxu0 %v4408_v43  ;;  %3092 = vmatprep.subr.bf16.mxu1 %v4413_v45  ;;  %v4449_v43 = vld [vmem:[%s5886_s3 + $0x8ec] ss:$100 sps:$4 sm:$0xff]   ;;  %v4452_v45 = vld [vmem:[%s5886_s3 + $0x8f4] ss:$100 sps:$4 sm:$0xff]  }
 0x1f9   :  { %v2788_v53 = vpop.f32.mrb[4].mxu1  ;;  %v2829_v54 = vpop.f32.mrb[8].mxu0  ;;  %3133 = vmatprep.subr.bf16.mxu0 %v4416_v46  ;;  %v4447_v46 = vld [vmem:[%s5886_s3 + $0x8e8] ss:$100 sps:$4 sm:$0xff]  }
 0x1fa   :  { %v2789_v55 = vadd.f32 %v2788_v53, %v550_v47  ;;  %v2830_v57 = vadd.f32 %v2829_v54, %v558_v9  ;;  %v2790_v60 = vpop.f32.mrb[5].mxu1  ;;  %v2831_v61 = vpop.f32.mrb[9].mxu0  ;;  %v4450_v47 = vld [vmem:[%s5886_s3 + $0x8f0] ss:$100 sps:$4 sm:$0xff]   ;;  %v4459_v53 = vld [vmem:[%s5886_s3 + $0xa78] ss:$100 sps:$4 sm:$0xff]  }
 0x1fb   :  { %v2791_v62 = vadd.f32 %v2790_v60, %v554_v48  ;;  %v2832_v63 = vadd.f32 %v2831_v61, %v562_v49  ;;  %v2792_v0 = vpop.f32.mrb[6].mxu1  ;;  %v2833_v1 = vpop.f32.mrb[10].mxu0  ;;  %3093 = vmatpush1.bf16.msra.mxu1 %v4411_v50  ;;  %v4455_v9 = vld [vmem:[%s5886_s3 + $0x9b4] ss:$100 sps:$4 sm:$0xff]   ;;  %v4458_v48 = vld [vmem:[%s5886_s3 + $0x9bc] ss:$100 sps:$4 sm:$0xff]  }
 0x1fc   :  { %v3208_v4 = vmax.f32 %v2789_v55, 0.0  ;;  %v3210_v5 = vmax.f32 %v2830_v57, 0.0  ;;  %3134 = vmatpush1.bf16.msra.mxu0 %v4414_v51  ;;  %v2793_v6 = vpop.f32.mrb[7].mxu1  ;;  %v2834_v7 = vpop.f32.mrb[11].mxu0  ;;  %3094 = vmatprep.subr.bf16.mxu1 %v4419_v52  ;;  %v4453_v49 = vld [vmem:[%s5886_s3 + $0x9b0] ss:$100 sps:$4 sm:$0xff]  }
 0x1fd   :  { %v3209_v11 = vmax.f32 %v2791_v62, 0.0  ;;  %v3211_v13 = vmax.f32 %v2832_v63, 0.0  ;;  %3135 = vmatprep.subr.bf16.mxu0 %v4422_v58  ;;  %v4456_v50 = vld [vmem:[%s5886_s3 + $0x9b8] ss:$100 sps:$4 sm:$0xff]   ;;  %v4464_v52 = vld [vmem:[%s5886_s3 + $0xa84] ss:$100 sps:$4 sm:$0xff]  }
 0x1fe   :  { %v4461_v51 = vld [vmem:[%s5886_s3 + $0xa7c] ss:$100 sps:$4 sm:$0xff]   ;;  %v4467_v58 = vld [vmem:[%s5886_s3 + $0xb44] ss:$100 sps:$4 sm:$0xff]   ;;  %v4470_v55 = vld [vmem:[%s5886_s3 + $0xb4c] ss:$100 sps:$4 sm:$0xff]  }
 0x1ff   :  { %v3861_v15 = vpack.c.bf16 %v3209_v11, %v3208_v4  ;;  %v3862_v16 = vpack.c.bf16 %v3211_v13, %v3210_v5  ;;  %3095 = vmatpush1.bf16.msra.mxu1 %v4417_v2  ;;  %v4462_v54 = vld [vmem:[%s5886_s3 + $0xa80] ss:$100 sps:$4 sm:$0xff]   ;;  %v4468_v60 = vld [vmem:[%s5886_s3 + $0xb48] ss:$100 sps:$4 sm:$0xff]   ;;  %v4476_v62 = vld [vmem:[%s5886_s3 + $0xc14] ss:$100 sps:$4 sm:$0xff]  }
 0x200   :  { %3136 = vmatpush1.bf16.msra.mxu0 %v4420_v3  ;;  %3096 = vmatprep.subr.bf16.mxu1 %v4425_v8  ;;  %v4465_v57 = vld [vmem:[%s5886_s3 + $0xb40] ss:$100 sps:$4 sm:$0xff]   ;;  %v4473_v61 = vld [vmem:[%s5886_s3 + $0xc0c] ss:$100 sps:$4 sm:$0xff]   ;;  %v4483_v7 = vld [vmem:[%s5886_s3 + $0x8f8] ss:$100 sps:$4 sm:$0xff]  }
 0x201   :  { %v3303_v20 = vrot.slane %v3861_v15, %v5450_v33  ;;  %v3310_v21 = vrot.slane %v3862_v16, %v5450_v33  ;;  %3137 = vmatprep.subr.bf16.mxu0 %v4428_v14  ;;  %v4471_v63 = vld [vmem:[%s5886_s3 + $0xc08] ss:$100 sps:$4 sm:$0xff]   ;;  %v4474_v0 = vld [vmem:[%s5886_s3 + $0xc10] ss:$100 sps:$4 sm:$0xff]   ;;  %v4477_v1 = vld [vmem:[%s5886_s3 + $0x6a0] ss:$100 sps:$4 sm:$0xff]  }
 0x202   :  { %v4478_v2 = vld [vmem:[%s5886_s3 + $0x60] ss:$100 sps:$4 sm:$0xff]   ;;  %v4479_v3 = vld [vmem:[%s5886_s3 + $0x768] ss:$100 sps:$4 sm:$0xff]   ;;  %v4481_v5 = vld [vmem:[%s5886_s3 + $0x830] ss:$100 sps:$4 sm:$0xff]  }
 0x203   :  { %v3312_v24 = vcombine.low %v3303_v20, %v3310_v21  ;;  %3097 = vmatpush1.bf16.msra.mxu1 %v4423_v17  ;;  %v4480_v4 = vld [vmem:[%s5886_s3 + $0x128] ss:$100 sps:$4 sm:$0xff]   ;;  %v4482_v6 = vld [vmem:[%s5886_s3 + $0x1f0] ss:$100 sps:$4 sm:$0xff]   ;;  %v4485_v8 = vld [vmem:[%s5886_s3 + $0x9c0] ss:$100 sps:$4 sm:$0xff]  }
 0x204   :  { %3138 = vmatpush1.bf16.msra.mxu0 %v4426_v18  ;;  %3098 = vmatprep.subr.bf16.mxu1 %v4431_v19  ;;  %v4486_v11 = vld [vmem:[%s5886_s3 + $0x380] ss:$100 sps:$4 sm:$0xff]   ;;  %v524_v13 = vld [vmem:[%s5889_s4 + $0x8] sm:$0xff]  ;;  %v4489_v20 = vld [vmem:[%s5886_s3 + $0xb50] ss:$100 sps:$4 sm:$0xff]  }
 0x205   :  { %v3326_v30 = vrot.slane %v3312_v24, %v5450_v33  ;;  %3139 = vmatprep.subr.bf16.mxu0 %v4434_v22  ;;  %v4487_v14 = vld [vmem:[%s5886_s3 + $0xa88] ss:$100 sps:$4 sm:$0xff]   ;;  %v566_v15 = vrot.slane %v524_v13, %v4741_v10  ;;  %v574_v16 = vrot.slane %v524_v13, %v5398_v56  ;;  %v570_v17 = vrot.slane %v524_v13, %v4747_v12 }
 0x206   :  { %v4488_v18 = vld [vmem:[%s5886_s3 + $0x448] ss:$100 sps:$4 sm:$0xff]   ;;  %v578_v19 = vrot.slane %v524_v13, %v5409_v59 }
 0x207   :  { %v3327_v32 = vcombine.low %v3319_v29, %v3326_v30  ;;  %3099 = vmatpush1.bf16.msra.mxu1 %v4429_v25 }
 0x208   :  { %3140 = vmatpush1.bf16.msra.mxu0 %v4432_v27  ;;  %3100 = vmatprep.subr.bf16.mxu1 %v4437_v28 }
 0x209   :  { %3444 = vst [vmem:[%s5890_s5] sm:$0xff] %v3327_v32  ;;  %3141 = vmatprep.subr.bf16.mxu0 %v4440_v31  ;;  %v4490_v31 = vld [vmem:[%s5886_s3 + $0x510] ss:$100 sps:$4 sm:$0xff]  }
 0x20b   :  { %3101 = vmatpush1.bf16.msra.mxu1 %v4435_v34 }
 0x20c   :  { %3142 = vmatpush1.bf16.msra.mxu0 %v4438_v35  ;;  %3102 = vmatprep.subr.bf16.mxu1 %v4443_v44 }
 0x20d   :  { %3143 = vmatprep.subr.bf16.mxu0 %v4446_v36  ;;  %v4491_v36 = vld [vmem:[%s5886_s3 + $0xc18] ss:$100 sps:$4 sm:$0xff]  }
 0x20f   :  { %3103 = vmatpush1.bf16.msra.mxu1 %v4441_v37 }
 0x210   :  { %3144 = vmatpush1.bf16.msra.mxu0 %v4444_v40  ;;  %3104 = vmatprep.subr.bf16.mxu1 %v4449_v43 }
 0x211   :  { %3145 = vmatprep.subr.bf16.mxu0 %v4452_v45 }
 0x213   :  { %3105 = vmatpush1.bf16.msra.mxu1 %v4447_v46 }
 0x214   :  { %3146 = vmatpush1.bf16.msra.mxu0 %v4450_v47  ;;  %3106 = vmatprep.subr.bf16.mxu1 %v4455_v9  ;;  %v4492_v47 = vld [vmem:[%s5886_s3 + $0x5d8] ss:$100 sps:$4 sm:$0xff]  }
 0x215   :  { %3147 = vmatprep.subr.bf16.mxu0 %v4458_v48 }
 0x217   :  { %3107 = vmatpush1.bf16.msra.mxu1 %v4453_v49 }
 0x218   :  { %3148 = vmatpush1.bf16.msra.mxu0 %v4456_v50  ;;  %3108 = vmatprep.subr.bf16.mxu1 %v4461_v51  ;;  %v582_v51 = vrot.slane %v524_v13, %v5620_v38 }
 0x219   :  { %3149 = vmatprep.subr.bf16.mxu0 %v4464_v52  ;;  %v590_v52 = vrot.slane %v524_v13, %v5623_v39 }
 0x21b   :  { %3109 = vmatpush1.bf16.msra.mxu1 %v4459_v53  ;;  %v586_v53 = vrot.slane %v524_v13, %v5629_v41 }
 0x21c   :  { %3150 = vmatpush1.bf16.msra.mxu0 %v4462_v54  ;;  %3110 = vmatprep.subr.bf16.mxu1 %v4467_v58  ;;  %v594_v54 = vrot.slane %v524_v13, %v5632_v42 }
 0x21d   :  { %3151 = vmatprep.subr.bf16.mxu0 %v4470_v55 }
 0x21f   :  { %3111 = vmatpush1.bf16.msra.mxu1 %v4465_v57 }
 0x220   :  { %3152 = vmatpush1.bf16.msra.mxu0 %v4468_v60  ;;  %3112 = vmatprep.subr.bf16.mxu1 %v4473_v61 }
 0x221   :  { %3153 = vmatprep.subr.bf16.mxu0 %v4476_v62 }
 0x223   :  { %3113 = vmatpush1.bf16.msra.mxu1 %v4471_v63 }
 0x224   :  { %3154 = vmatpush1.bf16.msra.mxu0 %v4474_v0  ;;  %3871 = vmatprep.subr.bf16.mxu1 %v4477_v1 }
 0x226   :  { %3115 = vmatmul.mubr.bf16.vlgmr.msra.gmra.mrb[20].mxu1 %v4759_v26 }
 0x227   :  { %3156 = vmatmul.mubr.bf16.vlgmr.msra.gmra.mrb[24].mxu0 %v4759_v26  ;;  %3872 = vmatpush3.bf16.msra.mxu1 %v4478_v2 }
 0x228   :  { %3196 = vmatprep.mubr.bf16.mxu1 %v4751_v23  ;;  %3873 = vmatprep.subr.bf16.mxu1 %v4479_v3  ;;  %v4484_v23 = vld [vmem:[%s5886_s3 + $0x2b8] ss:$100 sps:$4 sm:$0xff]  }
 0x22b   :  { %3874 = vmatpush3.bf16.msra.mxu1 %v4480_v4 }
 0x22c   :  { %3875 = vmatprep.subr.bf16.mxu1 %v4481_v5 }
 0x22f   :  { %3876 = vmatpush3.bf16.msra.mxu1 %v4482_v6 }
 0x230   :  { %3877 = vmatprep.subr.bf16.mxu1 %v4483_v7 }
 0x233   :  { %3878 = vmatpush3.bf16.msra.mxu1 %v4484_v23 }
 0x234   :  { %3879 = vmatprep.subr.bf16.mxu1 %v4485_v8 }
 0x237   :  { %3880 = vmatpush3.bf16.msra.mxu1 %v4486_v11 }
 0x238   :  { %3881 = vmatprep.subr.bf16.mxu1 %v4487_v14 }
 0x239   :  { %v2870_v21 = vpop.f32.mrb[8].mxu1 }
 0x23a   :  { %v2871_v22 = vadd.f32 %v2870_v21, %v566_v15  ;;  %v2911_v24 = vpop.f32.mrb[12].mxu0  ;;  %v2872_v25 = vpop.f32.mrb[9].mxu1 }
 0x23b   :  { %v2912_v27 = vadd.f32 %v2911_v24, %v574_v16  ;;  %v2873_v28 = vadd.f32 %v2872_v25, %v570_v17  ;;  %v2913_v29 = vpop.f32.mrb[13].mxu0  ;;  %v2874_v30 = vpop.f32.mrb[10].mxu1  ;;  %3882 = vmatpush3.bf16.msra.mxu1 %v4488_v18  ;;  %v525_v18 = vld [vmem:[%s5889_s4 + $0x10] sm:$0xff] }
 0x23c   :  { %v3212_v32 = vmax.f32 %v2871_v22, 0.0  ;;  %v2914_v34 = vadd.f32 %v2913_v29, %v578_v19  ;;  %v2915_v35 = vpop.f32.mrb[14].mxu0  ;;  %v2875_v44 = vpop.f32.mrb[11].mxu1  ;;  %3883 = vmatprep.subr.bf16.mxu1 %v4489_v20  ;;  %v598_v19 = vrot.slane %v525_v18, %v4741_v10  ;;  %v606_v20 = vrot.slane %v525_v18, %v5398_v56 }
 0x23d   :  { %v3214_v37 = vmax.f32 %v2912_v27, 0.0  ;;  %v3213_v40 = vmax.f32 %v2873_v28, 0.0  ;;  %v2916_v43 = vpop.f32.mrb[15].mxu0  ;;  %v602_v21 = vrot.slane %v525_v18, %v4747_v12  ;;  %v610_v22 = vrot.slane %v525_v18, %v5409_v59 }
 0x23e   :  { %v3215_v45 = vmax.f32 %v2914_v34, 0.0 }
 0x23f   :  { %v3863_v46 = vpack.c.bf16 %v3213_v40, %v3212_v32  ;;  %3884 = vmatpush3.bf16.msra.mxu1 %v4490_v31 }
 0x240   :  { %v3864_v9 = vpack.c.bf16 %v3215_v45, %v3214_v37  ;;  %3885 = vmatprep.subr.bf16.mxu1 %v4491_v36 }
 0x241   :  { %v3338_v48 = vrot.slane %v3863_v46, %v5450_v33 }
 0x242   :  { %v3345_v49 = vrot.slane %v3864_v9, %v5450_v33  ;;  %v622_v9 = vrot.slane %v525_v18, %v5623_v39 }
 0x243   :  { %3886 = vmatpush3.bf16.msra.mxu1 %v4492_v47  ;;  %v614_v47 = vrot.slane %v525_v18, %v5620_v38 }
 0x244   :  { %v3360_v50 = vcombine.low %v3338_v48, %v3345_v49  ;;  %v618_v48 = vrot.slane %v525_v18, %v5629_v41  ;;  %v626_v49 = vrot.slane %v525_v18, %v5632_v42 }
 0x246   :  { %3197 = vmatmul.mubr.bf16.vlgmr.msra.gmra.mrb[24].mxu1 %v4759_v26  ;;  %v3368_v15 = vrot.slane %v3360_v50, %v5450_v33 }
 0x279   :  { %v2952_v58 = vpop.f32.mrb[12].mxu1 }
 0x27a   :  { %v2953_v55 = vadd.f32 %v2952_v58, %v582_v51  ;;  %v2993_v57 = vpop.f32.mrb[16].mxu0  ;;  %v2954_v60 = vpop.f32.mrb[13].mxu1 }
 0x27b   :  { %v2994_v61 = vadd.f32 %v2993_v57, %v590_v52  ;;  %v2955_v62 = vadd.f32 %v2954_v60, %v586_v53  ;;  %v2995_v63 = vpop.f32.mrb[17].mxu0  ;;  %v2956_v0 = vpop.f32.mrb[14].mxu1 }
 0x27c   :  { %v3216_v1 = vmax.f32 %v2953_v55, 0.0  ;;  %v2996_v2 = vadd.f32 %v2995_v63, %v594_v54  ;;  %v2997_v3 = vpop.f32.mrb[18].mxu0  ;;  %v2957_v26 = vpop.f32.mrb[15].mxu1 }
 0x27d   :  { %v3218_v4 = vmax.f32 %v2994_v61, 0.0  ;;  %v3217_v5 = vmax.f32 %v2955_v62, 0.0  ;;  %v2998_v6 = vpop.f32.mrb[19].mxu0 }
 0x27e   :  { %v3219_v7 = vmax.f32 %v2996_v2, 0.0 }
 0x27f   :  { %v3865_v23 = vpack.c.bf16 %v3217_v5, %v3216_v1 }
 0x280   :  { %v3866_v8 = vpack.c.bf16 %v3219_v7, %v3218_v4 }
 0x281   :  { %v3352_v11 = vrot.slane %v3865_v23, %v5450_v33  ;;  %v3458_v23 = vld [vmem:[%s5889_s4 + $0x18] ss:$0 sm:$0xff] }
 0x282   :  { %v3359_v13 = vrot.slane %v3866_v8, %v5450_v33 }
 0x284   :  { %v3361_v14 = vcombine.low %v3352_v11, %v3359_v13 }
 0x286   :  { %v3375_v16 = vrot.slane %v3361_v14, %v5450_v33 }
 0x288   :  { %v3376_v17 = vcombine.low %v3368_v15, %v3375_v16 }
 0x28a   :  { %3445 = vst [vmem:[%s5890_s5 + $0x8] sm:$0xff] %v3376_v17 }
 0x2b9   :  { %v3034_v24 = vpop.f32.mrb[16].mxu1 }
 0x2ba   :  { %v3035_v25 = vadd.f32 %v3034_v24, %v598_v19  ;;  %v3075_v27 = vpop.f32.mrb[20].mxu0  ;;  %v3036_v28 = vpop.f32.mrb[17].mxu1 }
 0x2bb   :  { %v3076_v29 = vadd.f32 %v3075_v27, %v606_v20  ;;  %v3037_v30 = vadd.f32 %v3036_v28, %v602_v21  ;;  %v3077_v31 = vpop.f32.mrb[21].mxu0  ;;  %v3038_v32 = vpop.f32.mrb[18].mxu1 }
 0x2bc   :  { %v3220_v34 = vmax.f32 %v3035_v25, 0.0  ;;  %v3078_v35 = vadd.f32 %v3077_v31, %v610_v22  ;;  %v3079_v44 = vpop.f32.mrb[22].mxu0  ;;  %v3039_v36 = vpop.f32.mrb[19].mxu1 }
 0x2bd   :  { %v3222_v37 = vmax.f32 %v3076_v29, 0.0  ;;  %v3221_v10 = vmax.f32 %v3037_v30, 0.0  ;;  %v3080_v40 = vpop.f32.mrb[23].mxu0 }
 0x2be   :  { %v3223_v56 = vmax.f32 %v3078_v35, 0.0 }
 0x2bf   :  { %v3867_v43 = vpack.c.bf16 %v3221_v10, %v3220_v34 }
 0x2c0   :  { %v3868_v12 = vpack.c.bf16 %v3223_v56, %v3222_v37 }
 0x2c1   :  { %v3387_v59 = vrot.slane %v3867_v43, %v5450_v33 }
 0x2c2   :  { %v3394_v45 = vrot.slane %v3868_v12, %v5450_v33 }
 0x2c4   :  { %v3409_v46 = vcombine.low %v3387_v59, %v3394_v45 }
 0x2c6   :  { %v3417_v4 = vrot.slane %v3409_v46, %v5450_v33 }
 0x2f9   :  { %v3116_v50 = vpop.f32.mrb[20].mxu1 }
 0x2fa   :  { %v3117_v51 = vadd.f32 %v3116_v50, %v614_v47  ;;  %v3157_v52 = vpop.f32.mrb[24].mxu0  ;;  %v3118_v53 = vpop.f32.mrb[21].mxu1 }
 0x2fb   :  { %v3158_v54 = vadd.f32 %v3157_v52, %v622_v9  ;;  %v3119_v58 = vadd.f32 %v3118_v53, %v618_v48  ;;  %v3159_v55 = vpop.f32.mrb[25].mxu0  ;;  %v3120_v57 = vpop.f32.mrb[22].mxu1 }
 0x2fc   :  { %v3224_v60 = vmax.f32 %v3117_v51, 0.0  ;;  %v3160_v61 = vadd.f32 %v3159_v55, %v626_v49  ;;  %v3161_v62 = vpop.f32.mrb[26].mxu0  ;;  %v3121_v63 = vpop.f32.mrb[23].mxu1 }
 0x2fd   :  { %v3226_v0 = vmax.f32 %v3158_v54, 0.0  ;;  %v3225_v38 = vmax.f32 %v3119_v58, 0.0  ;;  %v3162_v1 = vpop.f32.mrb[27].mxu0 }
 0x2fe   :  { %v3227_v39 = vmax.f32 %v3160_v61, 0.0 }
 0x2ff   :  { %v3869_v2 = vpack.c.bf16 %v3225_v38, %v3224_v60 }
 0x300   :  { %v3870_v41 = vpack.c.bf16 %v3227_v39, %v3226_v0 }
 0x301   :  { %v3401_v42 = vrot.slane %v3869_v2, %v5450_v33 }
 0x302   :  { %v3408_v3 = vrot.slane %v3870_v41, %v5450_v33 }
 0x304   :  { %v3410_v26 = vcombine.low %v3401_v42, %v3408_v3 }
 0x306   :  { %v3424_v5 = vrot.slane %v3410_v26, %v5450_v33 }
 0x308   :  { %v3425_v6 = vcombine.low %v3417_v4, %v3424_v5 }
 0x30a   :  { %3446 = vst [vmem:[%s5890_s5 + $0x10] sm:$0xff] %v3425_v6 }
 0x319   :  { %v3887_v7 = vpop.f32.mrb[24].mxu1 }
 0x31a   :  { %v3888_v8 = vpop.f32.mrb[25].mxu1 }
 0x31b   :  { %v3889_v11 = vadd.f32 %v3888_v8, %v3887_v7  ;;  %v3890_v13 = vpop.f32.mrb[26].mxu1 }
 0x31c   :  { %v3891_v14 = vpop.f32.mrb[27].mxu1 }
 0x31d   :  { %v3199_v15 = vadd.f32 %v3889_v11, %v3458_v23 }
 0x31f   :  { %v3228_v16 = vmax.f32 %v3199_v15, 0.0 }
 0x321   :  { %v3253_v17 = vpack.c.bf16 %v3228_v16, %v3228_v16 }
 0x323   :  { %v3432_v18 = vrot.slane %v3253_v17, %v5450_v33 }
 0x325   :  { %v3439_v19 = vrot.slane %v3432_v18, %v5450_v33 }
 0x327   :  { %3448 = vst.msk [vmem:[%s5890_s5 + $0x18] sm:$0x1] %vm3447_vm1, %v3439_v19 }

// kernel: vae_decoder_forward.4
= control target key start
LH: loop header
LB: loop body
LE: loop exit
PB: predicated region body
PF: predicated region fallthrough
CT: control target
= control target key end

     0   :  { %vm2159_vm0 = vcmask 1043456   ;;  %vm2160_vm1 = vcmask 64516   ;;  %s3822_s1 = inlined_call_operand.vmem [shape: bf16[1024,392], index: 1, kind: input, shape index: {}]   ;;  %s3823_s0 = inlined_call_operand.vmem [shape: bf16[32,1024], index: 0, kind: input, shape index: {}]   ;;  %s3824_s2 = inlined_call_operand.vmem [shape: f32[32,1], index: 2, kind: input, shape index: {}]   ;;  %s3825_s3 = inlined_call_operand.vmem [shape: bf16[32,392], index: 3, kind: output, shape index: {}]  }
   0x1   :  { %v2528_v0 = vld [vmem:[%s3822_s1 + $0x4] ss:$16 sps:$4 sm:$0xff]   ;;  %v2530_v1 = vld [vmem:[%s3822_s1 + $0xc] ss:$16 sps:$4 sm:$0xff]   ;;  %v2532_v2 = vld [vmem:[%s3822_s1] ss:$16 sps:$4 sm:$0xff]  }
   0x2   :  { %1670 = vmatprep.subr.bf16.mxu0 %v2528_v0  ;;  %v2533_v3 = vld [vmem:[%s3822_s1 + $0x8] ss:$16 sps:$4 sm:$0xff]   ;;  %1882 = vmatprep.subr.bf16.mxu1 %v2530_v1  ;;  %v2534_v4 = vld [vmem:[%s3822_s1 + $0x24] ss:$16 sps:$4 sm:$0xff]   ;;  %v2536_v5 = vld [vmem:[%s3822_s1 + $0x2c] ss:$16 sps:$4 sm:$0xff]  }
   0x3   :  { %1671 = vmatpush1.bf16.msra.mxu0 %v2532_v2  ;;  %1883 = vmatpush1.bf16.msra.mxu1 %v2533_v3  ;;  %v2538_v6 = vld [vmem:[%s3822_s1 + $0x20] ss:$16 sps:$4 sm:$0xff]   ;;  %v2539_v7 = vld [vmem:[%s3822_s1 + $0x28] ss:$16 sps:$4 sm:$0xff]   ;;  %v2540_v8 = vld [vmem:[%s3822_s1 + $0x44] ss:$16 sps:$4 sm:$0xff]  }
   0x4   :  { %1672 = vmatprep.subr.bf16.mxu0 %v2534_v4  ;;  %1884 = vmatprep.subr.bf16.mxu1 %v2536_v5  ;;  %v2542_v9 = vld [vmem:[%s3822_s1 + $0x4c] ss:$16 sps:$4 sm:$0xff]   ;;  %v2544_v10 = vld [vmem:[%s3822_s1 + $0x40] ss:$16 sps:$4 sm:$0xff]   ;;  %v2545_v11 = vld [vmem:[%s3822_s1 + $0x48] ss:$16 sps:$4 sm:$0xff]  }
   0x5   :  { %v2546_v12 = vld [vmem:[%s3822_s1 + $0x64] ss:$16 sps:$4 sm:$0xff]   ;;  %v2548_v13 = vld [vmem:[%s3822_s1 + $0x6c] ss:$16 sps:$4 sm:$0xff]   ;;  %v2550_v14 = vld [vmem:[%s3822_s1 + $0x60] ss:$16 sps:$4 sm:$0xff]  }
   0x6   :  { %v2551_v15 = vld [vmem:[%s3822_s1 + $0x68] ss:$16 sps:$4 sm:$0xff]   ;;  %v2552_v16 = vld [vmem:[%s3822_s1 + $0x84] ss:$16 sps:$4 sm:$0xff]   ;;  %v2554_v17 = vld [vmem:[%s3822_s1 + $0x8c] ss:$16 sps:$4 sm:$0xff]  }
   0x7   :  { %1673 = vmatpush1.bf16.msra.mxu0 %v2538_v6  ;;  %1885 = vmatpush1.bf16.msra.mxu1 %v2539_v7  ;;  %v2556_v18 = vld [vmem:[%s3822_s1 + $0x80] ss:$16 sps:$4 sm:$0xff]   ;;  %v2557_v19 = vld [vmem:[%s3822_s1 + $0x88] ss:$16 sps:$4 sm:$0xff]   ;;  %v2558_v20 = vld [vmem:[%s3822_s1 + $0xa4] ss:$16 sps:$4 sm:$0xff]  }
   0x8   :  { %1674 = vmatprep.subr.bf16.mxu0 %v2540_v8  ;;  %1886 = vmatprep.subr.bf16.mxu1 %v2542_v9  ;;  %v2560_v21 = vld [vmem:[%s3822_s1 + $0xac] ss:$16 sps:$4 sm:$0xff]   ;;  %v2562_v22 = vld [vmem:[%s3822_s1 + $0xa0] ss:$16 sps:$4 sm:$0xff]   ;;  %v2563_v23 = vld [vmem:[%s3822_s1 + $0xa8] ss:$16 sps:$4 sm:$0xff]  }
   0x9   :  { %v2564_v24 = vld [vmem:[%s3822_s1 + $0xc4] ss:$16 sps:$4 sm:$0xff]   ;;  %v2566_v25 = vld [vmem:[%s3822_s1 + $0xcc] ss:$16 sps:$4 sm:$0xff]   ;;  %v2568_v26 = vld [vmem:[%s3822_s1 + $0xc0] ss:$16 sps:$4 sm:$0xff]  }
   0xa   :  { %v2569_v27 = vld [vmem:[%s3822_s1 + $0xc8] ss:$16 sps:$4 sm:$0xff]   ;;  %v2570_v28 = vld [vmem:[%s3822_s1 + $0xe4] ss:$16 sps:$4 sm:$0xff]   ;;  %v2572_v29 = vld [vmem:[%s3822_s1 + $0xec] ss:$16 sps:$4 sm:$0xff]  }
   0xb   :  { %1675 = vmatpush1.bf16.msra.mxu0 %v2544_v10  ;;  %1887 = vmatpush1.bf16.msra.mxu1 %v2545_v11  ;;  %v2574_v30 = vld [vmem:[%s3822_s1 + $0xe0] ss:$16 sps:$4 sm:$0xff]   ;;  %v2575_v31 = vld [vmem:[%s3822_s1 + $0xe8] ss:$16 sps:$4 sm:$0xff]   ;;  %v2576_v32 = vld [vmem:[%s3822_s1 + $0x104] ss:$16 sps:$4 sm:$0xff]  }
   0xc   :  { %1676 = vmatprep.subr.bf16.mxu0 %v2546_v12  ;;  %1888 = vmatprep.subr.bf16.mxu1 %v2548_v13  ;;  %v2578_v33 = vld [vmem:[%s3822_s1 + $0x10c] ss:$16 sps:$4 sm:$0xff]   ;;  %v2580_v34 = vld [vmem:[%s3822_s1 + $0x100] ss:$16 sps:$4 sm:$0xff]   ;;  %v2581_v35 = vld [vmem:[%s3822_s1 + $0x108] ss:$16 sps:$4 sm:$0xff]  }
   0xd   :  { %v2582_v36 = vld [vmem:[%s3822_s1 + $0x124] ss:$16 sps:$4 sm:$0xff]   ;;  %v2584_v37 = vld [vmem:[%s3822_s1 + $0x12c] ss:$16 sps:$4 sm:$0xff]   ;;  %v2586_v38 = vld [vmem:[%s3822_s1 + $0x120] ss:$16 sps:$4 sm:$0xff]  }
   0xe   :  { %v2587_v39 = vld [vmem:[%s3822_s1 + $0x128] ss:$16 sps:$4 sm:$0xff]   ;;  %v2588_v40 = vld [vmem:[%s3822_s1 + $0x144] ss:$16 sps:$4 sm:$0xff]   ;;  %v2590_v41 = vld [vmem:[%s3822_s1 + $0x14c] ss:$16 sps:$4 sm:$0xff]  }
   0xf   :  { %1677 = vmatpush1.bf16.msra.mxu0 %v2550_v14  ;;  %1889 = vmatpush1.bf16.msra.mxu1 %v2551_v15  ;;  %v2592_v42 = vld [vmem:[%s3822_s1 + $0x140] ss:$16 sps:$4 sm:$0xff]   ;;  %v2593_v43 = vld [vmem:[%s3822_s1 + $0x148] ss:$16 sps:$4 sm:$0xff]   ;;  %v2594_v44 = vld [vmem:[%s3822_s1 + $0x164] ss:$16 sps:$4 sm:$0xff]  }
  0x10   :  { %1678 = vmatprep.subr.bf16.mxu0 %v2552_v16  ;;  %1890 = vmatprep.subr.bf16.mxu1 %v2554_v17  ;;  %v2596_v45 = vld [vmem:[%s3822_s1 + $0x16c] ss:$16 sps:$4 sm:$0xff]   ;;  %v14_v46 = vld [vmem:[%s3823_s0] sm:$0xff]  ;;  %v2599_v49 = vld [vmem:[%s3822_s1 + $0x168] ss:$16 sps:$4 sm:$0xff]  }
  0x11   :  { %v18_v47 = vld [vmem:[%s3823_s0 + $0x20] sm:$0xff]  ;;  %v2602_v52 = vld [vmem:[%s3822_s1 + $0x18c] ss:$16 sps:$4 sm:$0xff]   ;;  %v2605_v54 = vld [vmem:[%s3822_s1 + $0x188] ss:$16 sps:$4 sm:$0xff]  }
  0x12   :  { %v2598_v48 = vld [vmem:[%s3822_s1 + $0x160] ss:$16 sps:$4 sm:$0xff]   ;;  %v2174_v50 = vcombine.high %v14_v46, %v18_v47  ;;  %v2600_v51 = vld [vmem:[%s3822_s1 + $0x184] ss:$16 sps:$4 sm:$0xff]   ;;  %v2608_v56 = vld [vmem:[%s3822_s1 + $0x1ac] ss:$16 sps:$4 sm:$0xff]   ;;  %v2173_v5 = vcombine.low %v14_v46, %v18_v47 }
  0x13   :  { %1679 = vmatpush1.bf16.msra.mxu0 %v2556_v18  ;;  %1891 = vmatpush1.bf16.msra.mxu1 %v2557_v19  ;;  %v2604_v53 = vld [vmem:[%s3822_s1 + $0x180] ss:$16 sps:$4 sm:$0xff]   ;;  %v2606_v55 = vld [vmem:[%s3822_s1 + $0x1a4] ss:$16 sps:$4 sm:$0xff]   ;;  %v2611_v58 = vld [vmem:[%s3822_s1 + $0x1a8] ss:$16 sps:$4 sm:$0xff]  }
  0x14   :  { %1680 = vmatprep.subr.bf16.mxu0 %v2558_v20  ;;  %1892 = vmatprep.subr.bf16.mxu1 %v2560_v21  ;;  %v2610_v57 = vld [vmem:[%s3822_s1 + $0x1a0] ss:$16 sps:$4 sm:$0xff]   ;;  %v2612_v59 = vld [vmem:[%s3822_s1 + $0x1c4] ss:$16 sps:$4 sm:$0xff]   ;;  %v2614_v60 = vld [vmem:[%s3822_s1 + $0x1cc] ss:$16 sps:$4 sm:$0xff]  }
  0x15   :  { %1702 = vmatprep.mubr.bf16.mxu0 %v2174_v50  ;;  %1914 = vmatprep.mubr.bf16.mxu1 %v2174_v50  ;;  %v2616_v61 = vld [vmem:[%s3822_s1 + $0x1c0] ss:$16 sps:$4 sm:$0xff]   ;;  %v2617_v62 = vld [vmem:[%s3822_s1 + $0x1c8] ss:$16 sps:$4 sm:$0xff]   ;;  %v2618_v63 = vld [vmem:[%s3822_s1 + $0x1e4] ss:$16 sps:$4 sm:$0xff]  }
  0x16   :  { %v2620_v0 = vld [vmem:[%s3822_s1 + $0x1ec] ss:$16 sps:$4 sm:$0xff]   ;;  %v2622_v1 = vld [vmem:[%s3822_s1 + $0x1e0] ss:$16 sps:$4 sm:$0xff]   ;;  %v2623_v2 = vld [vmem:[%s3822_s1 + $0x1e8] ss:$16 sps:$4 sm:$0xff]  }
  0x17   :  { %1681 = vmatpush1.bf16.msra.mxu0 %v2562_v22  ;;  %1893 = vmatpush1.bf16.msra.mxu1 %v2563_v23  ;;  %v2626_v3 = vld [vmem:[%s3822_s1 + $0x204] ss:$16 sps:$4 sm:$0xff]   ;;  %v2629_v4 = vld [vmem:[%s3822_s1 + $0x20c] ss:$16 sps:$4 sm:$0xff]   ;;  %v2624_v6 = vld [vmem:[%s3822_s1 + $0x200] ss:$16 sps:$4 sm:$0xff]  }
  0x18   :  { %1682 = vmatprep.subr.bf16.mxu0 %v2564_v24  ;;  %1894 = vmatprep.subr.bf16.mxu1 %v2566_v25  ;;  %v2627_v7 = vld [vmem:[%s3822_s1 + $0x208] ss:$16 sps:$4 sm:$0xff]   ;;  %v2632_v8 = vld [vmem:[%s3822_s1 + $0x224] ss:$16 sps:$4 sm:$0xff]   ;;  %v2635_v9 = vld [vmem:[%s3822_s1 + $0x22c] ss:$16 sps:$4 sm:$0xff]  }
  0x19   :  { %v2630_v10 = vld [vmem:[%s3822_s1 + $0x220] ss:$16 sps:$4 sm:$0xff]   ;;  %v2633_v11 = vld [vmem:[%s3822_s1 + $0x228] ss:$16 sps:$4 sm:$0xff]   ;;  %v2638_v12 = vld [vmem:[%s3822_s1 + $0x244] ss:$16 sps:$4 sm:$0xff]  }
  0x1a   :  { %v2641_v13 = vld [vmem:[%s3822_s1 + $0x24c] ss:$16 sps:$4 sm:$0xff]   ;;  %v2636_v14 = vld [vmem:[%s3822_s1 + $0x240] ss:$16 sps:$4 sm:$0xff]   ;;  %v2639_v15 = vld [vmem:[%s3822_s1 + $0x248] ss:$16 sps:$4 sm:$0xff]  }
  0x1b   :  { %1683 = vmatpush1.bf16.msra.mxu0 %v2568_v26  ;;  %1895 = vmatpush1.bf16.msra.mxu1 %v2569_v27  ;;  %v2644_v16 = vld [vmem:[%s3822_s1 + $0x264] ss:$16 sps:$4 sm:$0xff]   ;;  %v2647_v17 = vld [vmem:[%s3822_s1 + $0x26c] ss:$16 sps:$4 sm:$0xff]   ;;  %v2642_v18 = vld [vmem:[%s3822_s1 + $0x260] ss:$16 sps:$4 sm:$0xff]  }
  0x1c   :  { %1684 = vmatprep.subr.bf16.mxu0 %v2570_v28  ;;  %1896 = vmatprep.subr.bf16.mxu1 %v2572_v29  ;;  %v2645_v19 = vld [vmem:[%s3822_s1 + $0x268] ss:$16 sps:$4 sm:$0xff]   ;;  %v2650_v20 = vld [vmem:[%s3822_s1 + $0x284] ss:$16 sps:$4 sm:$0xff]   ;;  %v2653_v21 = vld [vmem:[%s3822_s1 + $0x28c] ss:$16 sps:$4 sm:$0xff]  }
  0x1d   :  { %v2648_v22 = vld [vmem:[%s3822_s1 + $0x280] ss:$16 sps:$4 sm:$0xff]   ;;  %v2651_v23 = vld [vmem:[%s3822_s1 + $0x288] ss:$16 sps:$4 sm:$0xff]   ;;  %v2656_v24 = vld [vmem:[%s3822_s1 + $0x2a4] ss:$16 sps:$4 sm:$0xff]  }
  0x1e   :  { %v2659_v25 = vld [vmem:[%s3822_s1 + $0x2ac] ss:$16 sps:$4 sm:$0xff]   ;;  %v22_v26 = vld [vmem:[%s3823_s0 + $0x40] sm:$0xff]  ;;  %v2675_v46 = vld [vmem:[%s3822_s1 + $0x308] ss:$16 sps:$4 sm:$0xff]  }
  0x1f   :  { %1685 = vmatpush1.bf16.msra.mxu0 %v2574_v30  ;;  %1897 = vmatpush1.bf16.msra.mxu1 %v2575_v31  ;;  %v26_v27 = vld [vmem:[%s3823_s0 + $0x60] sm:$0xff]  ;;  %v2657_v30 = vld [vmem:[%s3822_s1 + $0x2a8] ss:$16 sps:$4 sm:$0xff]   ;;  %vm3786_vm2 = vmor %vm2160_vm1, %vm2159_vm0 }
  0x20   :  { %1686 = vmatprep.subr.bf16.mxu0 %v2576_v32  ;;  %1898 = vmatprep.subr.bf16.mxu1 %v2578_v33  ;;  %v2182_v28 = vcombine.high %v22_v26, %v26_v27  ;;  %v2654_v29 = vld [vmem:[%s3822_s1 + $0x2a0] ss:$16 sps:$4 sm:$0xff]   ;;  %v2181_v31 = vcombine.low %v22_v26, %v26_v27  ;;  %v2662_v32 = vld [vmem:[%s3822_s1 + $0x2c4] ss:$16 sps:$4 sm:$0xff]   ;;  %v2665_v33 = vld [vmem:[%s3822_s1 + $0x2cc] ss:$16 sps:$4 sm:$0xff]  }
  0x21   :  { %v2680_v47 = vld [vmem:[%s3822_s1 + $0x324] ss:$16 sps:$4 sm:$0xff]   ;;  %v2681_v50 = vld [vmem:[%s3822_s1 + $0x328] ss:$16 sps:$4 sm:$0xff]  }
  0x22   :  { %v3387_v27 = vld [vmem:[%s3823_s0 + $0x30] sm:$0xff] }
  0x23   :  { %1687 = vmatpush1.bf16.msra.mxu0 %v2580_v34  ;;  %1899 = vmatpush1.bf16.msra.mxu1 %v2581_v35  ;;  %v3218_v34 = vld [vmem:[%s3823_s0 + $0x8] sm:$0xff] }
  0x24   :  { %1688 = vmatprep.subr.bf16.mxu0 %v2582_v36  ;;  %1900 = vmatprep.subr.bf16.mxu1 %v2584_v37  ;;  %v3223_v35 = vld [vmem:[%s3823_s0 + $0x28] sm:$0xff]  ;;  %v2660_v36 = vld [vmem:[%s3822_s1 + $0x2c0] ss:$16 sps:$4 sm:$0xff]  }
  0x25   :  { %v2663_v37 = vld [vmem:[%s3822_s1 + $0x2c8] ss:$16 sps:$4 sm:$0xff]  }
  0x27   :  { %1689 = vmatpush1.bf16.msra.mxu0 %v2586_v38  ;;  %1901 = vmatpush1.bf16.msra.mxu1 %v2587_v39  ;;  %v2176_v38 = vcombine.high %v3218_v34, %v3223_v35  ;;  %v2668_v39 = vld [vmem:[%s3822_s1 + $0x2e4] ss:$16 sps:$4 sm:$0xff]  }
  0x28   :  { %1690 = vmatprep.subr.bf16.mxu0 %v2588_v40  ;;  %1902 = vmatprep.subr.bf16.mxu1 %v2590_v41  ;;  %v2671_v40 = vld [vmem:[%s3822_s1 + $0x2ec] ss:$16 sps:$4 sm:$0xff]   ;;  %v2666_v41 = vld [vmem:[%s3822_s1 + $0x2e0] ss:$16 sps:$4 sm:$0xff]  }
  0x2b   :  { %1691 = vmatpush1.bf16.msra.mxu0 %v2592_v42  ;;  %1903 = vmatpush1.bf16.msra.mxu1 %v2593_v43  ;;  %v2669_v42 = vld [vmem:[%s3822_s1 + $0x2e8] ss:$16 sps:$4 sm:$0xff]   ;;  %v2674_v43 = vld [vmem:[%s3822_s1 + $0x304] ss:$16 sps:$4 sm:$0xff]  }
  0x2c   :  { %1692 = vmatprep.subr.bf16.mxu0 %v2594_v44  ;;  %1904 = vmatprep.subr.bf16.mxu1 %v2596_v45  ;;  %v2677_v44 = vld [vmem:[%s3822_s1 + $0x30c] ss:$16 sps:$4 sm:$0xff]   ;;  %v2672_v45 = vld [vmem:[%s3822_s1 + $0x300] ss:$16 sps:$4 sm:$0xff]  }
  0x2f   :  { %1693 = vmatpush1.bf16.msra.mxu0 %v2598_v48  ;;  %1905 = vmatpush1.bf16.msra.mxu1 %v2599_v49  ;;  %v2683_v48 = vld [vmem:[%s3822_s1 + $0x32c] ss:$16 sps:$4 sm:$0xff]   ;;  %v2678_v49 = vld [vmem:[%s3822_s1 + $0x320] ss:$16 sps:$4 sm:$0xff]  }
  0x30   :  { %1694 = vmatprep.subr.bf16.mxu0 %v2600_v51  ;;  %1906 = vmatprep.subr.bf16.mxu1 %v2602_v52  ;;  %v2686_v51 = vld [vmem:[%s3822_s1 + $0x344] ss:$16 sps:$4 sm:$0xff]   ;;  %v2689_v52 = vld [vmem:[%s3822_s1 + $0x34c] ss:$16 sps:$4 sm:$0xff]  }
  0x33   :  { %1695 = vmatpush1.bf16.msra.mxu0 %v2604_v53  ;;  %1907 = vmatpush1.bf16.msra.mxu1 %v2605_v54  ;;  %v2684_v53 = vld [vmem:[%s3822_s1 + $0x340] ss:$16 sps:$4 sm:$0xff]   ;;  %v2687_v54 = vld [vmem:[%s3822_s1 + $0x348] ss:$16 sps:$4 sm:$0xff]  }
  0x34   :  { %1696 = vmatprep.subr.bf16.mxu0 %v2606_v55  ;;  %1908 = vmatprep.subr.bf16.mxu1 %v2608_v56  ;;  %v2692_v55 = vld [vmem:[%s3822_s1 + $0x364] ss:$16 sps:$4 sm:$0xff]   ;;  %v2695_v56 = vld [vmem:[%s3822_s1 + $0x36c] ss:$16 sps:$4 sm:$0xff]  }
  0x37   :  { %1697 = vmatpush1.bf16.msra.mxu0 %v2610_v57  ;;  %1909 = vmatpush1.bf16.msra.mxu1 %v2611_v58  ;;  %v2690_v57 = vld [vmem:[%s3822_s1 + $0x360] ss:$16 sps:$4 sm:$0xff]   ;;  %v2693_v58 = vld [vmem:[%s3822_s1 + $0x368] ss:$16 sps:$4 sm:$0xff]  }
  0x38   :  { %1698 = vmatprep.subr.bf16.mxu0 %v2612_v59  ;;  %1910 = vmatprep.subr.bf16.mxu1 %v2614_v60  ;;  %v2698_v59 = vld [vmem:[%s3822_s1 + $0x384] ss:$16 sps:$4 sm:$0xff]   ;;  %v2701_v60 = vld [vmem:[%s3822_s1 + $0x38c] ss:$16 sps:$4 sm:$0xff]  }
  0x3b   :  { %1699 = vmatpush1.bf16.msra.mxu0 %v2616_v61  ;;  %1911 = vmatpush1.bf16.msra.mxu1 %v2617_v62  ;;  %v2696_v61 = vld [vmem:[%s3822_s1 + $0x380] ss:$16 sps:$4 sm:$0xff]   ;;  %v2699_v62 = vld [vmem:[%s3822_s1 + $0x388] ss:$16 sps:$4 sm:$0xff]  }
  0x3c   :  { %1700 = vmatprep.subr.bf16.mxu0 %v2618_v63  ;;  %1912 = vmatprep.subr.bf16.mxu1 %v2620_v0  ;;  %v2704_v63 = vld [vmem:[%s3822_s1 + $0x3a4] ss:$16 sps:$4 sm:$0xff]   ;;  %v2707_v0 = vld [vmem:[%s3822_s1 + $0x3ac] ss:$16 sps:$4 sm:$0xff]  }
  0x3f   :  { %1701 = vmatpush1.bf16.msra.mxu0 %v2622_v1  ;;  %1913 = vmatpush1.bf16.msra.mxu1 %v2623_v2  ;;  %v2702_v1 = vld [vmem:[%s3822_s1 + $0x3a0] ss:$16 sps:$4 sm:$0xff]   ;;  %v2705_v2 = vld [vmem:[%s3822_s1 + $0x3a8] ss:$16 sps:$4 sm:$0xff]  }
  0x40   :  { %1723 = vmatprep.subr.bf16.mxu0 %v2626_v3  ;;  %1935 = vmatprep.subr.bf16.mxu1 %v2629_v4  ;;  %v2710_v3 = vld [vmem:[%s3822_s1 + $0x3c4] ss:$16 sps:$4 sm:$0xff]   ;;  %v2713_v4 = vld [vmem:[%s3822_s1 + $0x3cc] ss:$16 sps:$4 sm:$0xff]  }
  0x42   :  { %1703 = vmatmul.mubr.bf16.vlgmr.msra.gmra.mrb[0].mxu0 %v2173_v5  ;;  %1915 = vmatmul.mubr.bf16.vlgmr.msra.gmra.mrb[0].mxu1 %v2173_v5  ;;  %v2708_v5 = vld [vmem:[%s3822_s1 + $0x3c0] ss:$16 sps:$4 sm:$0xff]  }
  0x43   :  { %1724 = vmatpush1.bf16.msra.mxu0 %v2624_v6  ;;  %1936 = vmatpush1.bf16.msra.mxu1 %v2627_v7  ;;  %v2711_v6 = vld [vmem:[%s3822_s1 + $0x3c8] ss:$16 sps:$4 sm:$0xff]   ;;  %v2716_v7 = vld [vmem:[%s3822_s1 + $0x3e4] ss:$16 sps:$4 sm:$0xff]  }
  0x44   :  { %1725 = vmatprep.subr.bf16.mxu0 %v2632_v8  ;;  %1937 = vmatprep.subr.bf16.mxu1 %v2635_v9  ;;  %v2719_v8 = vld [vmem:[%s3822_s1 + $0x3ec] ss:$16 sps:$4 sm:$0xff]   ;;  %v2714_v9 = vld [vmem:[%s3822_s1 + $0x3e0] ss:$16 sps:$4 sm:$0xff]  }
  0x45   :  { %1712 = vmatprep.mubr.bf16.mxu0 %v2182_v28  ;;  %1924 = vmatprep.mubr.bf16.mxu1 %v2182_v28  ;;  %v2732_v28 = vld [vmem:[%s3822_s1 + $0x440] ss:$16 sps:$4 sm:$0xff]  }
  0x47   :  { %1726 = vmatpush1.bf16.msra.mxu0 %v2630_v10  ;;  %1938 = vmatpush1.bf16.msra.mxu1 %v2633_v11  ;;  %v2717_v10 = vld [vmem:[%s3822_s1 + $0x3e8] ss:$16 sps:$4 sm:$0xff]   ;;  %v2722_v11 = vld [vmem:[%s3822_s1 + $0x404] ss:$16 sps:$4 sm:$0xff]  }
  0x48   :  { %1727 = vmatprep.subr.bf16.mxu0 %v2638_v12  ;;  %1939 = vmatprep.subr.bf16.mxu1 %v2641_v13  ;;  %v2725_v12 = vld [vmem:[%s3822_s1 + $0x40c] ss:$16 sps:$4 sm:$0xff]   ;;  %v2720_v13 = vld [vmem:[%s3822_s1 + $0x400] ss:$16 sps:$4 sm:$0xff]  }
  0x4a   :  { %1713 = vmatmul.mubr.bf16.gmra.mrb[4].mxu0 %v2181_v31  ;;  %1925 = vmatmul.mubr.bf16.gmra.mrb[4].mxu1 %v2181_v31  ;;  %v2743_v31 = vld [vmem:[%s3822_s1 + $0x46c] ss:$16 sps:$4 sm:$0xff]  }
  0x4b   :  { %1728 = vmatpush1.bf16.msra.mxu0 %v2636_v14  ;;  %1940 = vmatpush1.bf16.msra.mxu1 %v2639_v15  ;;  %v2723_v14 = vld [vmem:[%s3822_s1 + $0x408] ss:$16 sps:$4 sm:$0xff]   ;;  %v2175_v15 = vcombine.low %v3218_v34, %v3223_v35  ;;  %v2746_v35 = vld [vmem:[%s3822_s1 + $0x484] ss:$16 sps:$4 sm:$0xff]  }
  0x4c   :  { %1729 = vmatprep.subr.bf16.mxu0 %v2644_v16  ;;  %1941 = vmatprep.subr.bf16.mxu1 %v2647_v17  ;;  %v23_v16 = vld [vmem:[%s3823_s0 + $0x48] sm:$0xff] }
  0x4d   :  { %1755 = vmatprep.mubr.bf16.mxu0 %v2176_v38  ;;  %1967 = vmatprep.mubr.bf16.mxu1 %v2176_v38  ;;  %v27_v17 = vld [vmem:[%s3823_s0 + $0x68] sm:$0xff]  ;;  %v2744_v38 = vld [vmem:[%s3822_s1 + $0x480] ss:$16 sps:$4 sm:$0xff]  }
  0x4e   :  { %v2183_v26 = vcombine.low %v23_v16, %v27_v17  ;;  %v2741_v34 = vld [vmem:[%s3822_s1 + $0x468] ss:$16 sps:$4 sm:$0xff]  }
  0x4f   :  { %1730 = vmatpush1.bf16.msra.mxu0 %v2642_v18  ;;  %1942 = vmatpush1.bf16.msra.mxu1 %v2645_v19  ;;  %v2728_v18 = vld [vmem:[%s3822_s1 + $0x424] ss:$16 sps:$4 sm:$0xff]   ;;  %v2731_v19 = vld [vmem:[%s3822_s1 + $0x42c] ss:$16 sps:$4 sm:$0xff]  }
  0x50   :  { %1731 = vmatprep.subr.bf16.mxu0 %v2650_v20  ;;  %1943 = vmatprep.subr.bf16.mxu1 %v2653_v21  ;;  %v2184_v20 = vcombine.high %v23_v16, %v27_v17  ;;  %v2726_v21 = vld [vmem:[%s3822_s1 + $0x420] ss:$16 sps:$4 sm:$0xff]   ;;  %v2806_v16 = vld [vmem:[%s3822_s1 + $0x5c4] ss:$16 sps:$4 sm:$0xff]   ;;  %v2809_v17 = vld [vmem:[%s3822_s1 + $0x5cc] ss:$16 sps:$4 sm:$0xff]  }
  0x53   :  { %1732 = vmatpush1.bf16.msra.mxu0 %v2648_v22  ;;  %1944 = vmatpush1.bf16.msra.mxu1 %v2651_v23  ;;  %v2729_v22 = vld [vmem:[%s3822_s1 + $0x428] ss:$16 sps:$4 sm:$0xff]   ;;  %v2734_v23 = vld [vmem:[%s3822_s1 + $0x444] ss:$16 sps:$4 sm:$0xff]  }
  0x54   :  { %1733 = vmatprep.subr.bf16.mxu0 %v2656_v24  ;;  %1945 = vmatprep.subr.bf16.mxu1 %v2659_v25  ;;  %v2737_v24 = vld [vmem:[%s3822_s1 + $0x44c] ss:$16 sps:$4 sm:$0xff]   ;;  %v3382_v25 = vld [vmem:[%s3823_s0 + $0x10] sm:$0xff] }
  0x57   :  { %1734 = vmatpush1.bf16.msra.mxu0 %v2654_v29  ;;  %1946 = vmatpush1.bf16.msra.mxu1 %v2657_v30  ;;  %v2735_v29 = vld [vmem:[%s3822_s1 + $0x448] ss:$16 sps:$4 sm:$0xff]   ;;  %v2740_v30 = vld [vmem:[%s3822_s1 + $0x464] ss:$16 sps:$4 sm:$0xff]  }
  0x58   :  { %1735 = vmatprep.subr.bf16.mxu0 %v2662_v32  ;;  %1947 = vmatprep.subr.bf16.mxu1 %v2665_v33  ;;  %v2178_v32 = vcombine.high %v3382_v25, %v3387_v27  ;;  %v2738_v33 = vld [vmem:[%s3822_s1 + $0x460] ss:$16 sps:$4 sm:$0xff]  }
  0x5b   :  { %1736 = vmatpush1.bf16.msra.mxu0 %v2660_v36  ;;  %1948 = vmatpush1.bf16.msra.mxu1 %v2663_v37  ;;  %v2749_v36 = vld [vmem:[%s3822_s1 + $0x48c] ss:$16 sps:$4 sm:$0xff]   ;;  %v2912_v37 = vmov 0  }
  0x5c   :  { %1737 = vmatprep.subr.bf16.mxu0 %v2668_v39  ;;  %1949 = vmatprep.subr.bf16.mxu1 %v2671_v40  ;;  %v2747_v39 = vld [vmem:[%s3822_s1 + $0x488] ss:$16 sps:$4 sm:$0xff]   ;;  %v2752_v40 = vld [vmem:[%s3822_s1 + $0x4a4] ss:$16 sps:$4 sm:$0xff]  }
  0x5d   :  { %2526 = vset.pattern.permute.xlu0 %v2912_v37  ;;  %2527 = vset.pattern.permute.xlu1 %v2912_v37  ;;  %v2833_v37 = vld [vmem:[%s3822_s1 + $0x64c] ss:$16 sps:$4 sm:$0xff]  }
  0x5f   :  { %1738 = vmatpush1.bf16.msra.mxu0 %v2666_v41  ;;  %1950 = vmatpush1.bf16.msra.mxu1 %v2669_v42  ;;  %v2755_v41 = vld [vmem:[%s3822_s1 + $0x4ac] ss:$16 sps:$4 sm:$0xff]   ;;  %v2750_v42 = vld [vmem:[%s3822_s1 + $0x4a0] ss:$16 sps:$4 sm:$0xff]  }
  0x60   :  { %1739 = vmatprep.subr.bf16.mxu0 %v2674_v43  ;;  %1951 = vmatprep.subr.bf16.mxu1 %v2677_v44  ;;  %v2753_v43 = vld [vmem:[%s3822_s1 + $0x4a8] ss:$16 sps:$4 sm:$0xff]   ;;  %v2758_v44 = vld [vmem:[%s3822_s1 + $0x4c4] ss:$16 sps:$4 sm:$0xff]  }
  0x63   :  { %1740 = vmatpush1.bf16.msra.mxu0 %v2672_v45  ;;  %1952 = vmatpush1.bf16.msra.mxu1 %v2675_v46  ;;  %v2761_v45 = vld [vmem:[%s3822_s1 + $0x4cc] ss:$16 sps:$4 sm:$0xff]   ;;  %v2756_v46 = vld [vmem:[%s3822_s1 + $0x4c0] ss:$16 sps:$4 sm:$0xff]  }
  0x64   :  { %1741 = vmatprep.subr.bf16.mxu0 %v2680_v47  ;;  %1953 = vmatprep.subr.bf16.mxu1 %v2683_v48  ;;  %v2759_v47 = vld [vmem:[%s3822_s1 + $0x4c8] ss:$16 sps:$4 sm:$0xff]   ;;  %v2764_v48 = vld [vmem:[%s3822_s1 + $0x4e4] ss:$16 sps:$4 sm:$0xff]  }
  0x67   :  { %1742 = vmatpush1.bf16.msra.mxu0 %v2678_v49  ;;  %1954 = vmatpush1.bf16.msra.mxu1 %v2681_v50  ;;  %v2767_v49 = vld [vmem:[%s3822_s1 + $0x4ec] ss:$16 sps:$4 sm:$0xff]   ;;  %v2762_v50 = vld [vmem:[%s3822_s1 + $0x4e0] ss:$16 sps:$4 sm:$0xff]  }
  0x68   :  { %1743 = vmatprep.subr.bf16.mxu0 %v2686_v51  ;;  %1955 = vmatprep.subr.bf16.mxu1 %v2689_v52  ;;  %v2765_v51 = vld [vmem:[%s3822_s1 + $0x4e8] ss:$16 sps:$4 sm:$0xff]   ;;  %v2770_v52 = vld [vmem:[%s3822_s1 + $0x504] ss:$16 sps:$4 sm:$0xff]  }
  0x6b   :  { %1744 = vmatpush1.bf16.msra.mxu0 %v2684_v53  ;;  %1956 = vmatpush1.bf16.msra.mxu1 %v2687_v54  ;;  %v2773_v53 = vld [vmem:[%s3822_s1 + $0x50c] ss:$16 sps:$4 sm:$0xff]   ;;  %v2768_v54 = vld [vmem:[%s3822_s1 + $0x500] ss:$16 sps:$4 sm:$0xff]  }
  0x6c   :  { %1745 = vmatprep.subr.bf16.mxu0 %v2692_v55  ;;  %1957 = vmatprep.subr.bf16.mxu1 %v2695_v56  ;;  %v2771_v55 = vld [vmem:[%s3822_s1 + $0x508] ss:$16 sps:$4 sm:$0xff]   ;;  %v2776_v56 = vld [vmem:[%s3822_s1 + $0x524] ss:$16 sps:$4 sm:$0xff]  }
  0x6f   :  { %1746 = vmatpush1.bf16.msra.mxu0 %v2690_v57  ;;  %1958 = vmatpush1.bf16.msra.mxu1 %v2693_v58  ;;  %v2779_v57 = vld [vmem:[%s3822_s1 + $0x52c] ss:$16 sps:$4 sm:$0xff]   ;;  %v2774_v58 = vld [vmem:[%s3822_s1 + $0x520] ss:$16 sps:$4 sm:$0xff]  }
  0x70   :  { %1747 = vmatprep.subr.bf16.mxu0 %v2698_v59  ;;  %1959 = vmatprep.subr.bf16.mxu1 %v2701_v60  ;;  %v2777_v59 = vld [vmem:[%s3822_s1 + $0x528] ss:$16 sps:$4 sm:$0xff]   ;;  %v2782_v60 = vld [vmem:[%s3822_s1 + $0x544] ss:$16 sps:$4 sm:$0xff]  }
  0x73   :  { %1748 = vmatpush1.bf16.msra.mxu0 %v2696_v61  ;;  %1960 = vmatpush1.bf16.msra.mxu1 %v2699_v62  ;;  %v2785_v61 = vld [vmem:[%s3822_s1 + $0x54c] ss:$16 sps:$4 sm:$0xff]   ;;  %v2780_v62 = vld [vmem:[%s3822_s1 + $0x540] ss:$16 sps:$4 sm:$0xff]  }
  0x74   :  { %1749 = vmatprep.subr.bf16.mxu0 %v2704_v63  ;;  %1961 = vmatprep.subr.bf16.mxu1 %v2707_v0  ;;  %v2783_v63 = vld [vmem:[%s3822_s1 + $0x548] ss:$16 sps:$4 sm:$0xff]   ;;  %v2788_v0 = vld [vmem:[%s3822_s1 + $0x564] ss:$16 sps:$4 sm:$0xff]  }
  0x77   :  { %1750 = vmatpush1.bf16.msra.mxu0 %v2702_v1  ;;  %1962 = vmatpush1.bf16.msra.mxu1 %v2705_v2  ;;  %v2791_v1 = vld [vmem:[%s3822_s1 + $0x56c] ss:$16 sps:$4 sm:$0xff]   ;;  %v2786_v2 = vld [vmem:[%s3822_s1 + $0x560] ss:$16 sps:$4 sm:$0xff]  }
  0x78   :  { %1751 = vmatprep.subr.bf16.mxu0 %v2710_v3  ;;  %1963 = vmatprep.subr.bf16.mxu1 %v2713_v4  ;;  %v2789_v3 = vld [vmem:[%s3822_s1 + $0x568] ss:$16 sps:$4 sm:$0xff]   ;;  %v2794_v4 = vld [vmem:[%s3822_s1 + $0x584] ss:$16 sps:$4 sm:$0xff]  }
  0x7b   :  { %1752 = vmatpush1.bf16.msra.mxu0 %v2708_v5  ;;  %1964 = vmatpush1.bf16.msra.mxu1 %v2711_v6  ;;  %v2797_v5 = vld [vmem:[%s3822_s1 + $0x58c] ss:$16 sps:$4 sm:$0xff]   ;;  %v2792_v6 = vld [vmem:[%s3822_s1 + $0x580] ss:$16 sps:$4 sm:$0xff]  }
  0x7c   :  { %1753 = vmatprep.subr.bf16.mxu0 %v2716_v7  ;;  %1965 = vmatprep.subr.bf16.mxu1 %v2719_v8  ;;  %v2795_v7 = vld [vmem:[%s3822_s1 + $0x588] ss:$16 sps:$4 sm:$0xff]   ;;  %v286_v8 = vld [vmem:[%s3824_s2] sm:$0xff] }
  0x7d   :  { %292 = vperm.xlu0 %2526, %v286_v8   ;;  %v2878_v8 = vld [vmem:[%s3822_s1 + $0x744] ss:$16 sps:$4 sm:$0xff]  }
  0x7f   :  { %1754 = vmatpush1.bf16.msra.mxu0 %v2714_v9  ;;  %1966 = vmatpush1.bf16.msra.mxu1 %v2717_v10  ;;  %v288_v9 = vld [vmem:[%s3824_s2 + $0x10] sm:$0xff] }
  0x80   :  { %1776 = vmatprep.subr.bf16.mxu0 %v2722_v11  ;;  %1988 = vmatprep.subr.bf16.mxu1 %v2725_v12  ;;  %v2800_v10 = vld [vmem:[%s3822_s1 + $0x5a4] ss:$16 sps:$4 sm:$0xff]   ;;  %v2803_v11 = vld [vmem:[%s3822_s1 + $0x5ac] ss:$16 sps:$4 sm:$0xff]  }
  0x81   :  { %302 = vperm.xlu1 %2527, %v288_v9   ;;  %v287_v12 = vld [vmem:[%s3824_s2 + $0x8] sm:$0xff] }
  0x82   :  { %1756 = vmatmul.mubr.bf16.vlgmr.msra.gmra.mrb[0].mxu0 %v2175_v15  ;;  %1968 = vmatmul.mubr.bf16.vlgmr.msra.gmra.mrb[0].mxu1 %v2175_v15  ;;  %v2801_v15 = vld [vmem:[%s3822_s1 + $0x5a8] ss:$16 sps:$4 sm:$0xff]   ;;  %v2881_v9 = vld [vmem:[%s3822_s1 + $0x74c] ss:$16 sps:$4 sm:$0xff]  }
  0x83   :  { %1777 = vmatpush1.bf16.msra.mxu0 %v2720_v13  ;;  %1989 = vmatpush1.bf16.msra.mxu1 %v2723_v14  ;;  %v289_v13 = vld [vmem:[%s3824_s2 + $0x18] sm:$0xff]  ;;  %v2798_v14 = vld [vmem:[%s3822_s1 + $0x5a0] ss:$16 sps:$4 sm:$0xff]  }
  0x84   :  { %1778 = vmatprep.subr.bf16.mxu0 %v2728_v18  ;;  %1990 = vmatprep.subr.bf16.mxu1 %v2731_v19  ;;  %v2804_v18 = vld [vmem:[%s3822_s1 + $0x5c0] ss:$16 sps:$4 sm:$0xff]   ;;  %v2807_v19 = vld [vmem:[%s3822_s1 + $0x5c8] ss:$16 sps:$4 sm:$0xff]  }
  0x85   :  { %1765 = vmatprep.mubr.bf16.mxu0 %v2184_v20  ;;  %1977 = vmatprep.mubr.bf16.mxu1 %v2184_v20  ;;  %v2812_v20 = vld [vmem:[%s3822_s1 + $0x5e4] ss:$16 sps:$4 sm:$0xff]  }
  0x86   :  { %297 = vperm.xlu0 %2526, %v287_v12   ;;  %307 = vperm.xlu1 %2527, %v289_v13   ;;  %v2884_v12 = vld [vmem:[%s3822_s1 + $0x764] ss:$16 sps:$4 sm:$0xff]   ;;  %v2887_v13 = vld [vmem:[%s3822_s1 + $0x76c] ss:$16 sps:$4 sm:$0xff]  }
  0x87   :  { %1779 = vmatpush1.bf16.msra.mxu0 %v2726_v21  ;;  %1991 = vmatpush1.bf16.msra.mxu1 %v2729_v22  ;;  %v2815_v21 = vld [vmem:[%s3822_s1 + $0x5ec] ss:$16 sps:$4 sm:$0xff]   ;;  %v2810_v22 = vld [vmem:[%s3822_s1 + $0x5e0] ss:$16 sps:$4 sm:$0xff]  }
  0x88   :  { %1780 = vmatprep.subr.bf16.mxu0 %v2734_v23  ;;  %1992 = vmatprep.subr.bf16.mxu1 %v2737_v24  ;;  %v2813_v23 = vld [vmem:[%s3822_s1 + $0x5e8] ss:$16 sps:$4 sm:$0xff]   ;;  %v2818_v24 = vld [vmem:[%s3822_s1 + $0x604] ss:$16 sps:$4 sm:$0xff]  }
  0x8a   :  { %1766 = vmatmul.mubr.bf16.gmra.mrb[4].mxu0 %v2183_v26  ;;  %1978 = vmatmul.mubr.bf16.gmra.mrb[4].mxu1 %v2183_v26  ;;  %v2821_v26 = vld [vmem:[%s3822_s1 + $0x60c] ss:$16 sps:$4 sm:$0xff]  }
  0x8b   :  { %1781 = vmatpush1.bf16.msra.mxu0 %v2732_v28  ;;  %1993 = vmatpush1.bf16.msra.mxu1 %v2735_v29  ;;  %v2177_v28 = vcombine.low %v3382_v25, %v3387_v27  ;;  %v24_v29 = vld [vmem:[%s3823_s0 + $0x50] sm:$0xff]  ;;  %v2827_v27 = vld [vmem:[%s3822_s1 + $0x62c] ss:$16 sps:$4 sm:$0xff]  }
  0x8c   :  { %1782 = vmatprep.subr.bf16.mxu0 %v2740_v30  ;;  %1994 = vmatprep.subr.bf16.mxu1 %v2743_v31  ;;  %v28_v30 = vld [vmem:[%s3823_s0 + $0x70] sm:$0xff] }
  0x8d   :  { %1808 = vmatprep.mubr.bf16.mxu0 %v2178_v32  ;;  %2020 = vmatprep.mubr.bf16.mxu1 %v2178_v32  ;;  %v2816_v31 = vld [vmem:[%s3822_s1 + $0x600] ss:$16 sps:$4 sm:$0xff]   ;;  %v2819_v32 = vld [vmem:[%s3822_s1 + $0x608] ss:$16 sps:$4 sm:$0xff]   ;;  %v2824_v25 = vld [vmem:[%s3822_s1 + $0x624] ss:$16 sps:$4 sm:$0xff]  }
  0x8f   :  { %1783 = vmatpush1.bf16.msra.mxu0 %v2738_v33  ;;  %1995 = vmatpush1.bf16.msra.mxu1 %v2741_v34  ;;  %v2186_v33 = vcombine.high %v24_v29, %v28_v30  ;;  %v2822_v34 = vld [vmem:[%s3822_s1 + $0x620] ss:$16 sps:$4 sm:$0xff]  }
  0x90   :  { %1784 = vmatprep.subr.bf16.mxu0 %v2746_v35  ;;  %1996 = vmatprep.subr.bf16.mxu1 %v2749_v36  ;;  %v2825_v35 = vld [vmem:[%s3822_s1 + $0x628] ss:$16 sps:$4 sm:$0xff]   ;;  %v2830_v36 = vld [vmem:[%s3822_s1 + $0x644] ss:$16 sps:$4 sm:$0xff]  }
  0x93   :  { %1785 = vmatpush1.bf16.msra.mxu0 %v2744_v38  ;;  %1997 = vmatpush1.bf16.msra.mxu1 %v2747_v39  ;;  %v2185_v38 = vcombine.low %v24_v29, %v28_v30  ;;  %v3606_v39 = vld [vmem:[%s3823_s0 + $0x18] sm:$0xff]  ;;  %v2908_v30 = vld [vmem:[%s3822_s1 + $0x7e4] ss:$16 sps:$4 sm:$0xff]  }
  0x94   :  { %1786 = vmatprep.subr.bf16.mxu0 %v2752_v40  ;;  %1998 = vmatprep.subr.bf16.mxu1 %v2755_v41  ;;  %v3611_v40 = vld [vmem:[%s3823_s0 + $0x38] sm:$0xff]  ;;  %v2828_v41 = vld [vmem:[%s3822_s1 + $0x640] ss:$16 sps:$4 sm:$0xff]  }
  0x95   :  { %v2903_v29 = vld [vmem:[%s3822_s1 + $0x7c8] ss:$16 sps:$4 sm:$0xff]  }
  0x97   :  { %1787 = vmatpush1.bf16.msra.mxu0 %v2750_v42  ;;  %1999 = vmatpush1.bf16.msra.mxu1 %v2753_v43  ;;  %v2831_v42 = vld [vmem:[%s3822_s1 + $0x648] ss:$16 sps:$4 sm:$0xff]   ;;  %v2836_v43 = vld [vmem:[%s3822_s1 + $0x664] ss:$16 sps:$4 sm:$0xff]  }
  0x98   :  { %1788 = vmatprep.subr.bf16.mxu0 %v2758_v44  ;;  %2000 = vmatprep.subr.bf16.mxu1 %v2761_v45  ;;  %v2839_v44 = vld [vmem:[%s3822_s1 + $0x66c] ss:$16 sps:$4 sm:$0xff]   ;;  %v2180_v45 = vcombine.high %v3606_v39, %v3611_v40 }
  0x9b   :  { %1789 = vmatpush1.bf16.msra.mxu0 %v2756_v46  ;;  %2001 = vmatpush1.bf16.msra.mxu1 %v2759_v47  ;;  %v2834_v46 = vld [vmem:[%s3822_s1 + $0x660] ss:$16 sps:$4 sm:$0xff]   ;;  %v2837_v47 = vld [vmem:[%s3822_s1 + $0x668] ss:$16 sps:$4 sm:$0xff]  }
  0x9c   :  { %1790 = vmatprep.subr.bf16.mxu0 %v2764_v48  ;;  %2002 = vmatprep.subr.bf16.mxu1 %v2767_v49  ;;  %v2842_v48 = vld [vmem:[%s3822_s1 + $0x684] ss:$16 sps:$4 sm:$0xff]   ;;  %v2845_v49 = vld [vmem:[%s3822_s1 + $0x68c] ss:$16 sps:$4 sm:$0xff]  }
  0x9f   :  { %1791 = vmatpush1.bf16.msra.mxu0 %v2762_v50  ;;  %2003 = vmatpush1.bf16.msra.mxu1 %v2765_v51  ;;  %v2840_v50 = vld [vmem:[%s3822_s1 + $0x680] ss:$16 sps:$4 sm:$0xff]   ;;  %v2843_v51 = vld [vmem:[%s3822_s1 + $0x688] ss:$16 sps:$4 sm:$0xff]  }
  0xa0   :  { %1792 = vmatprep.subr.bf16.mxu0 %v2770_v52  ;;  %2004 = vmatprep.subr.bf16.mxu1 %v2773_v53  ;;  %v2848_v52 = vld [vmem:[%s3822_s1 + $0x6a4] ss:$16 sps:$4 sm:$0xff]   ;;  %v2851_v53 = vld [vmem:[%s3822_s1 + $0x6ac] ss:$16 sps:$4 sm:$0xff]  }
  0xa3   :  { %1793 = vmatpush1.bf16.msra.mxu0 %v2768_v54  ;;  %2005 = vmatpush1.bf16.msra.mxu1 %v2771_v55  ;;  %v2846_v54 = vld [vmem:[%s3822_s1 + $0x6a0] ss:$16 sps:$4 sm:$0xff]   ;;  %v2849_v55 = vld [vmem:[%s3822_s1 + $0x6a8] ss:$16 sps:$4 sm:$0xff]  }
  0xa4   :  { %1794 = vmatprep.subr.bf16.mxu0 %v2776_v56  ;;  %2006 = vmatprep.subr.bf16.mxu1 %v2779_v57  ;;  %v2854_v56 = vld [vmem:[%s3822_s1 + $0x6c4] ss:$16 sps:$4 sm:$0xff]   ;;  %v2857_v57 = vld [vmem:[%s3822_s1 + $0x6cc] ss:$16 sps:$4 sm:$0xff]  }
  0xa7   :  { %1795 = vmatpush1.bf16.msra.mxu0 %v2774_v58  ;;  %2007 = vmatpush1.bf16.msra.mxu1 %v2777_v59  ;;  %v2852_v58 = vld [vmem:[%s3822_s1 + $0x6c0] ss:$16 sps:$4 sm:$0xff]   ;;  %v2855_v59 = vld [vmem:[%s3822_s1 + $0x6c8] ss:$16 sps:$4 sm:$0xff]  }
  0xa8   :  { %1796 = vmatprep.subr.bf16.mxu0 %v2782_v60  ;;  %2008 = vmatprep.subr.bf16.mxu1 %v2785_v61  ;;  %v2860_v60 = vld [vmem:[%s3822_s1 + $0x6e4] ss:$16 sps:$4 sm:$0xff]   ;;  %v2863_v61 = vld [vmem:[%s3822_s1 + $0x6ec] ss:$16 sps:$4 sm:$0xff]  }
  0xab   :  { %1797 = vmatpush1.bf16.msra.mxu0 %v2780_v62  ;;  %2009 = vmatpush1.bf16.msra.mxu1 %v2783_v63  ;;  %v2858_v62 = vld [vmem:[%s3822_s1 + $0x6e0] ss:$16 sps:$4 sm:$0xff]   ;;  %v2861_v63 = vld [vmem:[%s3822_s1 + $0x6e8] ss:$16 sps:$4 sm:$0xff]  }
  0xac   :  { %1798 = vmatprep.subr.bf16.mxu0 %v2788_v0  ;;  %2010 = vmatprep.subr.bf16.mxu1 %v2791_v1  ;;  %v2866_v0 = vld [vmem:[%s3822_s1 + $0x704] ss:$16 sps:$4 sm:$0xff]   ;;  %v2869_v1 = vld [vmem:[%s3822_s1 + $0x70c] ss:$16 sps:$4 sm:$0xff]  }
  0xaf   :  { %1799 = vmatpush1.bf16.msra.mxu0 %v2786_v2  ;;  %2011 = vmatpush1.bf16.msra.mxu1 %v2789_v3  ;;  %v2864_v2 = vld [vmem:[%s3822_s1 + $0x700] ss:$16 sps:$4 sm:$0xff]   ;;  %v2867_v3 = vld [vmem:[%s3822_s1 + $0x708] ss:$16 sps:$4 sm:$0xff]  }
  0xb0   :  { %1800 = vmatprep.subr.bf16.mxu0 %v2794_v4  ;;  %2012 = vmatprep.subr.bf16.mxu1 %v2797_v5  ;;  %v2872_v4 = vld [vmem:[%s3822_s1 + $0x724] ss:$16 sps:$4 sm:$0xff]   ;;  %v2875_v5 = vld [vmem:[%s3822_s1 + $0x72c] ss:$16 sps:$4 sm:$0xff]  }
  0xb3   :  { %1801 = vmatpush1.bf16.msra.mxu0 %v2792_v6  ;;  %2013 = vmatpush1.bf16.msra.mxu1 %v2795_v7  ;;  %v2870_v6 = vld [vmem:[%s3822_s1 + $0x720] ss:$16 sps:$4 sm:$0xff]   ;;  %v2873_v7 = vld [vmem:[%s3822_s1 + $0x728] ss:$16 sps:$4 sm:$0xff]  }
  0xb4   :  { %1802 = vmatprep.subr.bf16.mxu0 %v2800_v10  ;;  %2014 = vmatprep.subr.bf16.mxu1 %v2803_v11  ;;  %v2876_v10 = vld [vmem:[%s3822_s1 + $0x740] ss:$16 sps:$4 sm:$0xff]   ;;  %v2879_v11 = vld [vmem:[%s3822_s1 + $0x748] ss:$16 sps:$4 sm:$0xff]  }
  0xb7   :  { %1803 = vmatpush1.bf16.msra.mxu0 %v2798_v14  ;;  %2015 = vmatpush1.bf16.msra.mxu1 %v2801_v15  ;;  %v2882_v14 = vld [vmem:[%s3822_s1 + $0x760] ss:$16 sps:$4 sm:$0xff]   ;;  %v2885_v15 = vld [vmem:[%s3822_s1 + $0x768] ss:$16 sps:$4 sm:$0xff]  }
  0xb8   :  { %1804 = vmatprep.subr.bf16.mxu0 %v2806_v16  ;;  %2016 = vmatprep.subr.bf16.mxu1 %v2809_v17  ;;  %v2890_v16 = vld [vmem:[%s3822_s1 + $0x784] ss:$16 sps:$4 sm:$0xff]   ;;  %v2893_v17 = vld [vmem:[%s3822_s1 + $0x78c] ss:$16 sps:$4 sm:$0xff]  }
  0xbb   :  { %1805 = vmatpush1.bf16.msra.mxu0 %v2804_v18  ;;  %2017 = vmatpush1.bf16.msra.mxu1 %v2807_v19  ;;  %v2888_v18 = vld [vmem:[%s3822_s1 + $0x780] ss:$16 sps:$4 sm:$0xff]   ;;  %v2891_v19 = vld [vmem:[%s3822_s1 + $0x788] ss:$16 sps:$4 sm:$0xff]  }
  0xbc   :  { %1806 = vmatprep.subr.bf16.mxu0 %v2812_v20  ;;  %2018 = vmatprep.subr.bf16.mxu1 %v2815_v21  ;;  %v2896_v20 = vld [vmem:[%s3822_s1 + $0x7a4] ss:$16 sps:$4 sm:$0xff]   ;;  %v2899_v21 = vld [vmem:[%s3822_s1 + $0x7ac] ss:$16 sps:$4 sm:$0xff]  }
  0xbf   :  { %1807 = vmatpush1.bf16.msra.mxu0 %v2810_v22  ;;  %2019 = vmatpush1.bf16.msra.mxu1 %v2813_v23  ;;  %v2894_v22 = vld [vmem:[%s3822_s1 + $0x7a0] ss:$16 sps:$4 sm:$0xff]   ;;  %v2897_v23 = vld [vmem:[%s3822_s1 + $0x7a8] ss:$16 sps:$4 sm:$0xff]  }
  0xc0   :  { %1829 = vmatprep.subr.bf16.mxu0 %v2818_v24  ;;  %2041 = vmatprep.subr.bf16.mxu1 %v2821_v26  ;;  %v2902_v24 = vld [vmem:[%s3822_s1 + $0x7c4] ss:$16 sps:$4 sm:$0xff]   ;;  %v2905_v26 = vld [vmem:[%s3822_s1 + $0x7cc] ss:$16 sps:$4 sm:$0xff]  }
  0xc2   :  { %1809 = vmatmul.mubr.bf16.vlgmr.msra.gmra.mrb[0].mxu0 %v2177_v28  ;;  %2021 = vmatmul.mubr.bf16.vlgmr.msra.gmra.mrb[0].mxu1 %v2177_v28  ;;  %v2900_v28 = vld [vmem:[%s3822_s1 + $0x7c0] ss:$16 sps:$4 sm:$0xff]  }
  0xc3   :  { %1830 = vmatpush1.bf16.msra.mxu0 %v2816_v31  ;;  %2042 = vmatpush1.bf16.msra.mxu1 %v2819_v32  ;;  %v2911_v31 = vld [vmem:[%s3822_s1 + $0x7ec] ss:$16 sps:$4 sm:$0xff]   ;;  %v2906_v32 = vld [vmem:[%s3822_s1 + $0x7e0] ss:$16 sps:$4 sm:$0xff]  }
  0xc4   :  { %1831 = vmatprep.subr.bf16.mxu0 %v2824_v25  ;;  %2043 = vmatprep.subr.bf16.mxu1 %v2827_v27  ;;  %v2909_v25 = vld [vmem:[%s3822_s1 + $0x7e8] ss:$16 sps:$4 sm:$0xff]  }
  0xc5   :  { %1818 = vmatprep.mubr.bf16.mxu0 %v2186_v33  ;;  %2030 = vmatprep.mubr.bf16.mxu1 %v2186_v33  ;;  %v25_v27 = vld [vmem:[%s3823_s0 + $0x58] sm:$0xff] }
  0xc6   :  { %v29_v33 = vld [vmem:[%s3823_s0 + $0x78] sm:$0xff] }
  0xc7   :  { %1832 = vmatpush1.bf16.msra.mxu0 %v2822_v34  ;;  %2044 = vmatpush1.bf16.msra.mxu1 %v2825_v35  ;;  %v2179_v34 = vcombine.low %v3606_v39, %v3611_v40  ;;  %v2188_v35 = vcombine.high %v25_v27, %v29_v33 }
  0xc8   :  { %1833 = vmatprep.subr.bf16.mxu0 %v2830_v36  ;;  %2045 = vmatprep.subr.bf16.mxu1 %v2833_v37  ;;  %v2187_v36 = vcombine.low %v25_v27, %v29_v33 }
  0xca   :  { %1819 = vmatmul.mubr.bf16.gmra.mrb[4].mxu0 %v2185_v38  ;;  %2031 = vmatmul.mubr.bf16.gmra.mrb[4].mxu1 %v2185_v38 }
  0xcb   :  { %1834 = vmatpush1.bf16.msra.mxu0 %v2828_v41  ;;  %2046 = vmatpush1.bf16.msra.mxu1 %v2831_v42 }
  0xcc   :  { %1835 = vmatprep.subr.bf16.mxu0 %v2836_v43  ;;  %2047 = vmatprep.subr.bf16.mxu1 %v2839_v44 }
  0xcd   :  { %1861 = vmatprep.mubr.bf16.mxu0 %v2180_v45  ;;  %2073 = vmatprep.mubr.bf16.mxu1 %v2180_v45 }
  0xcf   :  { %1836 = vmatpush1.bf16.msra.mxu0 %v2834_v46  ;;  %2048 = vmatpush1.bf16.msra.mxu1 %v2837_v47 }
  0xd0   :  { %1837 = vmatprep.subr.bf16.mxu0 %v2842_v48  ;;  %2049 = vmatprep.subr.bf16.mxu1 %v2845_v49 }
  0xd3   :  { %1838 = vmatpush1.bf16.msra.mxu0 %v2840_v50  ;;  %2050 = vmatpush1.bf16.msra.mxu1 %v2843_v51 }
  0xd4   :  { %1839 = vmatprep.subr.bf16.mxu0 %v2848_v52  ;;  %2051 = vmatprep.subr.bf16.mxu1 %v2851_v53 }
  0xd7   :  { %1840 = vmatpush1.bf16.msra.mxu0 %v2846_v54  ;;  %2052 = vmatpush1.bf16.msra.mxu1 %v2849_v55 }
  0xd8   :  { %1841 = vmatprep.subr.bf16.mxu0 %v2854_v56  ;;  %2053 = vmatprep.subr.bf16.mxu1 %v2857_v57 }
  0xdb   :  { %1842 = vmatpush1.bf16.msra.mxu0 %v2852_v58  ;;  %2054 = vmatpush1.bf16.msra.mxu1 %v2855_v59 }
  0xdc   :  { %1843 = vmatprep.subr.bf16.mxu0 %v2860_v60  ;;  %2055 = vmatprep.subr.bf16.mxu1 %v2863_v61 }
  0xdf   :  { %1844 = vmatpush1.bf16.msra.mxu0 %v2858_v62  ;;  %2056 = vmatpush1.bf16.msra.mxu1 %v2861_v63 }
  0xe0   :  { %1845 = vmatprep.subr.bf16.mxu0 %v2866_v0  ;;  %2057 = vmatprep.subr.bf16.mxu1 %v2869_v1 }
  0xe3   :  { %1846 = vmatpush1.bf16.msra.mxu0 %v2864_v2  ;;  %2058 = vmatpush1.bf16.msra.mxu1 %v2867_v3 }
  0xe4   :  { %1847 = vmatprep.subr.bf16.mxu0 %v2872_v4  ;;  %2059 = vmatprep.subr.bf16.mxu1 %v2875_v5 }
  0xe7   :  { %1848 = vmatpush1.bf16.msra.mxu0 %v2870_v6  ;;  %2060 = vmatpush1.bf16.msra.mxu1 %v2873_v7 }
  0xe8   :  { %1849 = vmatprep.subr.bf16.mxu0 %v2878_v8  ;;  %2061 = vmatprep.subr.bf16.mxu1 %v2881_v9 }
  0xeb   :  { %1850 = vmatpush1.bf16.msra.mxu0 %v2876_v10  ;;  %2062 = vmatpush1.bf16.msra.mxu1 %v2879_v11 }
  0xec   :  { %1851 = vmatprep.subr.bf16.mxu0 %v2884_v12  ;;  %2063 = vmatprep.subr.bf16.mxu1 %v2887_v13 }
  0xef   :  { %1852 = vmatpush1.bf16.msra.mxu0 %v2882_v14  ;;  %2064 = vmatpush1.bf16.msra.mxu1 %v2885_v15 }
  0xf0   :  { %1853 = vmatprep.subr.bf16.mxu0 %v2890_v16  ;;  %2065 = vmatprep.subr.bf16.mxu1 %v2893_v17 }
  0xf3   :  { %1854 = vmatpush1.bf16.msra.mxu0 %v2888_v18  ;;  %2066 = vmatpush1.bf16.msra.mxu1 %v2891_v19 }
  0xf4   :  { %1855 = vmatprep.subr.bf16.mxu0 %v2896_v20  ;;  %2067 = vmatprep.subr.bf16.mxu1 %v2899_v21 }
  0xf7   :  { %1856 = vmatpush1.bf16.msra.mxu0 %v2894_v22  ;;  %2068 = vmatpush1.bf16.msra.mxu1 %v2897_v23 }
  0xf8   :  { %1857 = vmatprep.subr.bf16.mxu0 %v2902_v24  ;;  %2069 = vmatprep.subr.bf16.mxu1 %v2905_v26 }
  0xfb   :  { %1858 = vmatpush1.bf16.msra.mxu0 %v2900_v28  ;;  %2070 = vmatpush1.bf16.msra.mxu1 %v2903_v29 }
  0xfc   :  { %1859 = vmatprep.subr.bf16.mxu0 %v2908_v30  ;;  %2071 = vmatprep.subr.bf16.mxu1 %v2911_v31  ;;  %v293_v37 = vpop.permute.xlu0 %292 }
  0xff   :  { %1860 = vmatpush1.bf16.msra.mxu0 %v2906_v32  ;;  %2072 = vmatpush1.bf16.msra.mxu1 %v2909_v25 }
 0x100   :  { %v303_v41 = vpop.permute.xlu1 %302 }
 0x102   :  { %1862 = vmatmul.mubr.bf16.vlgmr.msra.gmra.mrb[0].mxu0 %v2179_v34  ;;  %2074 = vmatmul.mubr.bf16.vlgmr.msra.gmra.mrb[0].mxu1 %v2179_v34 }
 0x103   :  { %1871 = vmatprep.mubr.bf16.mxu0 %v2188_v35  ;;  %2083 = vmatprep.mubr.bf16.mxu1 %v2188_v35 }
 0x105   :  { %v298_v38 = vpop.permute.xlu0 %297  ;;  %v308_v3 = vpop.permute.xlu1 %307 }
 0x10a   :  { %1872 = vmatmul.mubr.bf16.gmra.mrb[4].mxu0 %v2187_v36  ;;  %2084 = vmatmul.mubr.bf16.gmra.mrb[4].mxu1 %v2187_v36 }
 0x1d5   :  { %v1863_v42 = vpop.f32.mrb[0].mxu0  ;;  %v2075_v43 = vpop.f32.mrb[0].mxu1 }
 0x1d6   :  { %v2461_v44 = vadd.f32 %v1863_v42, %v293_v37  ;;  %v2469_v45 = vadd.f32 %v2075_v43, %v293_v37  ;;  %v1865_v46 = vpop.f32.mrb[1].mxu0  ;;  %v2077_v47 = vpop.f32.mrb[1].mxu1 }
 0x1d7   :  { %v2462_v39 = vadd.f32 %v1865_v46, %v293_v37  ;;  %v2470_v40 = vadd.f32 %v2077_v47, %v293_v37  ;;  %v1867_v48 = vpop.f32.mrb[2].mxu0  ;;  %v2079_v49 = vpop.f32.mrb[2].mxu1 }
 0x1d8   :  { %v2094_v50 = vmax.f32 %v2461_v44, 0.0  ;;  %v2096_v51 = vmax.f32 %v2469_v45, 0.0  ;;  %v2463_v52 = vadd.f32 %v1867_v48, %v298_v38  ;;  %v2471_v53 = vadd.f32 %v2079_v49, %v298_v38  ;;  %v1869_v54 = vpop.f32.mrb[3].mxu0  ;;  %v2081_v55 = vpop.f32.mrb[3].mxu1 }
 0x1d9   :  { %v2095_v56 = vmax.f32 %v2462_v39, 0.0  ;;  %v2097_v57 = vmax.f32 %v2470_v40, 0.0  ;;  %v2464_v58 = vadd.f32 %v1869_v54, %v298_v38  ;;  %v2472_v59 = vadd.f32 %v2081_v55, %v298_v38 }
 0x1da   :  { %v2098_v61 = vmax.f32 %v2463_v52, 0.0  ;;  %v2100_v62 = vmax.f32 %v2471_v53, 0.0 }
 0x1db   :  { %v2453_v63 = vpack.c.bf16 %v2095_v56, %v2094_v50  ;;  %v2454_v0 = vpack.c.bf16 %v2097_v57, %v2096_v51  ;;  %v2099_v1 = vmax.f32 %v2464_v58, 0.0  ;;  %v2101_v2 = vmax.f32 %v2472_v59, 0.0 }
 0x1dd   :  { %2158 = vst [vmem:[%s3825_s3] sm:$0xff] %v2453_v63  ;;  %2162 = vst.msk [vmem:[%s3825_s3 + $0x8] sm:$0xff] %vm3786_vm2, %v2454_v0  ;;  %v2455_v4 = vpack.c.bf16 %v2099_v1, %v2098_v61  ;;  %v2456_v5 = vpack.c.bf16 %v2101_v2, %v2100_v62  ;;  %v1873_v6 = vpop.f32.mrb[4].mxu0  ;;  %v2085_v7 = vpop.f32.mrb[4].mxu1 }
 0x1de   :  { %v2465_v8 = vadd.f32 %v1873_v6, %v303_v41  ;;  %v2473_v9 = vadd.f32 %v2085_v7, %v303_v41  ;;  %v1875_v10 = vpop.f32.mrb[5].mxu0  ;;  %v2087_v11 = vpop.f32.mrb[5].mxu1 }
 0x1df   :  { %2163 = vst [vmem:[%s3825_s3 + $0x10] sm:$0xff] %v2455_v4  ;;  %2164 = vst.msk [vmem:[%s3825_s3 + $0x18] sm:$0xff] %vm3786_vm2, %v2456_v5  ;;  %v2466_v12 = vadd.f32 %v1875_v10, %v303_v41  ;;  %v2474_v13 = vadd.f32 %v2087_v11, %v303_v41  ;;  %v1877_v14 = vpop.f32.mrb[6].mxu0  ;;  %v2089_v15 = vpop.f32.mrb[6].mxu1 }
 0x1e0   :  { %v2102_v16 = vmax.f32 %v2465_v8, 0.0  ;;  %v2104_v17 = vmax.f32 %v2473_v9, 0.0  ;;  %v2467_v18 = vadd.f32 %v1877_v14, %v308_v3  ;;  %v2475_v19 = vadd.f32 %v2089_v15, %v308_v3  ;;  %v1879_v20 = vpop.f32.mrb[7].mxu0  ;;  %v2091_v21 = vpop.f32.mrb[7].mxu1 }
 0x1e1   :  { %v2103_v22 = vmax.f32 %v2466_v12, 0.0  ;;  %v2105_v23 = vmax.f32 %v2474_v13, 0.0  ;;  %v2468_v24 = vadd.f32 %v1879_v20, %v308_v3  ;;  %v2476_v26 = vadd.f32 %v2091_v21, %v308_v3 }
 0x1e2   :  { %v2106_v28 = vmax.f32 %v2467_v18, 0.0  ;;  %v2108_v29 = vmax.f32 %v2475_v19, 0.0 }
 0x1e3   :  { %v2457_v30 = vpack.c.bf16 %v2103_v22, %v2102_v16  ;;  %v2458_v31 = vpack.c.bf16 %v2105_v23, %v2104_v17  ;;  %v2107_v32 = vmax.f32 %v2468_v24, 0.0  ;;  %v2109_v25 = vmax.f32 %v2476_v26, 0.0 }
 0x1e5   :  { %2165 = vst [vmem:[%s3825_s3 + $0x20] sm:$0xff] %v2457_v30  ;;  %2166 = vst.msk [vmem:[%s3825_s3 + $0x28] sm:$0xff] %vm3786_vm2, %v2458_v31  ;;  %v2459_v27 = vpack.c.bf16 %v2107_v32, %v2106_v28  ;;  %v2460_v33 = vpack.c.bf16 %v2109_v25, %v2108_v29 }
 0x1e7   :  { %2167 = vst [vmem:[%s3825_s3 + $0x30] sm:$0xff] %v2459_v27  ;;  %2168 = vst.msk [vmem:[%s3825_s3 + $0x38] sm:$0xff] %vm3786_vm2, %v2460_v33 }

// kernel: vae_decoder_forward.5
= control target key start
LH: loop header
LB: loop body
LE: loop exit
PB: predicated region body
PF: predicated region fallthrough
CT: control target
= control target key end

     0   :  { %v472_v38 = vlaneseq  ;;  %v4527_v39 = vmov 1966171168   ;;  %s5894_s1 = inlined_call_operand.vmem [shape: bf16[512,1568], index: 1, kind: input, shape index: {}]   ;;  %s5895_s0 = inlined_call_operand.vmem [shape: bf16[1,512], index: 0, kind: input, shape index: {}]   ;;  %s5896_s2 = inlined_call_operand.<no memory space> [shape: f32[1,1], index: 2, kind: input, shape index: {}]   ;;  %s5897_s3 = inlined_call_operand.vmem [shape: f32[1,1568], index: 3, kind: output, shape index: {}]  }
   0x1   :  { %v3867_v0 = vld [vmem:[%s5894_s1 + $0x4] ss:$52 sps:$4 sm:$0xff]   ;;  %v3869_v1 = vld [vmem:[%s5894_s1 + $0xc] ss:$52 sps:$4 sm:$0xff]   ;;  %v3872_v3 = vld [vmem:[%s5894_s1 + $0x8] ss:$52 sps:$4 sm:$0xff]   ;;  %v486_v40 = vunpack.c.l.s4 %v4527_v39 }
   0x2   :  { %2617 = vmatprep.subr.bf16.mxu0 %v3867_v0  ;;  %v3871_v2 = vld [vmem:[%s5894_s1] ss:$52 sps:$4 sm:$0xff]   ;;  %2699 = vmatprep.subr.bf16.mxu1 %v3869_v1  ;;  %v3877_v6 = vld [vmem:[%s5894_s1 + $0x68] ss:$52 sps:$4 sm:$0xff]   ;;  %v3878_v7 = vld [vmem:[%s5894_s1 + $0x70] ss:$52 sps:$4 sm:$0xff]  }
   0x3   :  { %v3873_v4 = vld [vmem:[%s5894_s1 + $0x6c] ss:$52 sps:$4 sm:$0xff]   ;;  %2618 = vmatpush1.bf16.msra.mxu0 %v3871_v2  ;;  %2700 = vmatpush1.bf16.msra.mxu1 %v3872_v3  ;;  %v3875_v5 = vld [vmem:[%s5894_s1 + $0x74] ss:$52 sps:$4 sm:$0xff]   ;;  %v3881_v9 = vld [vmem:[%s5894_s1 + $0xdc] ss:$52 sps:$4 sm:$0xff]   ;;  %v487_v46 = vunpack.c.0.s8 %v486_v40 }
   0x4   :  { %2619 = vmatprep.subr.bf16.mxu0 %v3873_v4  ;;  %2701 = vmatprep.subr.bf16.mxu1 %v3875_v5  ;;  %v3879_v8 = vld [vmem:[%s5894_s1 + $0xd4] ss:$52 sps:$4 sm:$0xff]   ;;  %v3883_v10 = vld [vmem:[%s5894_s1 + $0xd0] ss:$52 sps:$4 sm:$0xff]   ;;  %v3884_v11 = vld [vmem:[%s5894_s1 + $0xd8] ss:$52 sps:$4 sm:$0xff]  }
   0x5   :  { %v3885_v12 = vld [vmem:[%s5894_s1 + $0x13c] ss:$52 sps:$4 sm:$0xff]   ;;  %v3887_v13 = vld [vmem:[%s5894_s1 + $0x144] ss:$52 sps:$4 sm:$0xff]   ;;  %v3890_v15 = vld [vmem:[%s5894_s1 + $0x140] ss:$52 sps:$4 sm:$0xff]  }
   0x6   :  { %v3889_v14 = vld [vmem:[%s5894_s1 + $0x138] ss:$52 sps:$4 sm:$0xff]   ;;  %v3895_v18 = vld [vmem:[%s5894_s1 + $0x1a0] ss:$52 sps:$4 sm:$0xff]   ;;  %v3896_v19 = vld [vmem:[%s5894_s1 + $0x1a8] ss:$52 sps:$4 sm:$0xff]  }
   0x7   :  { %2620 = vmatpush1.bf16.msra.mxu0 %v3877_v6  ;;  %2702 = vmatpush1.bf16.msra.mxu1 %v3878_v7  ;;  %v3891_v16 = vld [vmem:[%s5894_s1 + $0x1a4] ss:$52 sps:$4 sm:$0xff]   ;;  %v3893_v17 = vld [vmem:[%s5894_s1 + $0x1ac] ss:$52 sps:$4 sm:$0xff]   ;;  %v3899_v21 = vld [vmem:[%s5894_s1 + $0x214] ss:$52 sps:$4 sm:$0xff]  }
   0x8   :  { %2621 = vmatprep.subr.bf16.mxu0 %v3879_v8  ;;  %2703 = vmatprep.subr.bf16.mxu1 %v3881_v9  ;;  %v3897_v20 = vld [vmem:[%s5894_s1 + $0x20c] ss:$52 sps:$4 sm:$0xff]   ;;  %v3901_v22 = vld [vmem:[%s5894_s1 + $0x208] ss:$52 sps:$4 sm:$0xff]   ;;  %v3902_v23 = vld [vmem:[%s5894_s1 + $0x210] ss:$52 sps:$4 sm:$0xff]  }
   0x9   :  { %v3903_v24 = vld [vmem:[%s5894_s1 + $0x274] ss:$52 sps:$4 sm:$0xff]   ;;  %v3905_v25 = vld [vmem:[%s5894_s1 + $0x27c] ss:$52 sps:$4 sm:$0xff]   ;;  %v3908_v27 = vld [vmem:[%s5894_s1 + $0x278] ss:$52 sps:$4 sm:$0xff]  }
   0xa   :  { %v3907_v26 = vld [vmem:[%s5894_s1 + $0x270] ss:$52 sps:$4 sm:$0xff]   ;;  %v3913_v30 = vld [vmem:[%s5894_s1 + $0x2d8] ss:$52 sps:$4 sm:$0xff]   ;;  %v3914_v31 = vld [vmem:[%s5894_s1 + $0x2e0] ss:$52 sps:$4 sm:$0xff]  }
   0xb   :  { %2622 = vmatpush1.bf16.msra.mxu0 %v3883_v10  ;;  %2704 = vmatpush1.bf16.msra.mxu1 %v3884_v11  ;;  %v3909_v28 = vld [vmem:[%s5894_s1 + $0x2dc] ss:$52 sps:$4 sm:$0xff]   ;;  %v3911_v29 = vld [vmem:[%s5894_s1 + $0x2e4] ss:$52 sps:$4 sm:$0xff]   ;;  %v3917_v33 = vld [vmem:[%s5894_s1 + $0x34c] ss:$52 sps:$4 sm:$0xff]  }
   0xc   :  { %2623 = vmatprep.subr.bf16.mxu0 %v3885_v12  ;;  %2705 = vmatprep.subr.bf16.mxu1 %v3887_v13  ;;  %v3915_v32 = vld [vmem:[%s5894_s1 + $0x344] ss:$52 sps:$4 sm:$0xff]   ;;  %v3919_v34 = vld [vmem:[%s5894_s1 + $0x340] ss:$52 sps:$4 sm:$0xff]   ;;  %v3920_v35 = vld [vmem:[%s5894_s1 + $0x348] ss:$52 sps:$4 sm:$0xff]  }
   0xd   :  { %v3921_v36 = vld [vmem:[%s5894_s1 + $0x3ac] ss:$52 sps:$4 sm:$0xff]   ;;  %v3923_v37 = vld [vmem:[%s5894_s1 + $0x3b4] ss:$52 sps:$4 sm:$0xff]   ;;  %v3926_v42 = vld [vmem:[%s5894_s1 + $0x3b0] ss:$52 sps:$4 sm:$0xff]  }
   0xe   :  { %v3925_v41 = vld [vmem:[%s5894_s1 + $0x3a8] ss:$52 sps:$4 sm:$0xff]   ;;  %v4676_v45 = vshrl.u32 %v472_v38, 7  ;;  %v3931_v47 = vld [vmem:[%s5894_s1 + $0x410] ss:$52 sps:$4 sm:$0xff]   ;;  %vm3360_vm0 = vcmp.lt.s32.totalorder %v472_v38, 544 }
   0xf   :  { %2624 = vmatpush1.bf16.msra.mxu0 %v3889_v14  ;;  %2706 = vmatpush1.bf16.msra.mxu1 %v3890_v15  ;;  %v3927_v43 = vld [vmem:[%s5894_s1 + $0x414] ss:$52 sps:$4 sm:$0xff]   ;;  %v3929_v44 = vld [vmem:[%s5894_s1 + $0x41c] ss:$52 sps:$4 sm:$0xff]   ;;  %v3932_v48 = vld [vmem:[%s5894_s1 + $0x418] ss:$52 sps:$4 sm:$0xff]  }
  0x10   :  { %2625 = vmatprep.subr.bf16.mxu0 %v3891_v16  ;;  %2707 = vmatprep.subr.bf16.mxu1 %v3893_v17  ;;  %v3933_v49 = vld [vmem:[%s5894_s1 + $0x47c] ss:$52 sps:$4 sm:$0xff]   ;;  %v3935_v50 = vld [vmem:[%s5894_s1 + $0x484] ss:$52 sps:$4 sm:$0xff]   ;;  %v4691_v51 = vsub.s32 %v487_v46, %v4676_v45  ;;  %v3938_v54 = vld [vmem:[%s5894_s1 + $0x480] ss:$52 sps:$4 sm:$0xff]  }
  0x11   :  { %v3367_v52 = vld.sshfl [vmem:[%s5895_s0] sm:$0x33 pattern:$0x75316420]  ;;  %v3937_v53 = vld [vmem:[%s5894_s1 + $0x478] ss:$52 sps:$4 sm:$0xff]  }
  0x12   :  { %v484_v55 = vcombine.high %v3367_v52, %v3367_v52  ;;  %v3939_v56 = vld [vmem:[%s5894_s1 + $0x4e4] ss:$52 sps:$4 sm:$0xff]   ;;  %v3941_v57 = vld [vmem:[%s5894_s1 + $0x4ec] ss:$52 sps:$4 sm:$0xff]   ;;  %v3944_v60 = vld [vmem:[%s5894_s1 + $0x4e8] ss:$52 sps:$4 sm:$0xff]   ;;  %v4765_v12 = vrot.slane %v3367_v52, %v4691_v51 }
  0x13   :  { %2626 = vmatpush1.bf16.msra.mxu0 %v3895_v18  ;;  %2708 = vmatpush1.bf16.msra.mxu1 %v3896_v19  ;;  %v3943_v59 = vld [vmem:[%s5894_s1 + $0x4e0] ss:$52 sps:$4 sm:$0xff]   ;;  %v3949_v63 = vld [vmem:[%s5894_s1 + $0x548] ss:$52 sps:$4 sm:$0xff]   ;;  %v3950_v0 = vld [vmem:[%s5894_s1 + $0x550] ss:$52 sps:$4 sm:$0xff]  }
  0x14   :  { %2627 = vmatprep.subr.bf16.mxu0 %v3897_v20  ;;  %2709 = vmatprep.subr.bf16.mxu1 %v3899_v21  ;;  %v4709_v58 = vrot.slane %v484_v55, %v4691_v51  ;;  %v3945_v61 = vld [vmem:[%s5894_s1 + $0x54c] ss:$52 sps:$4 sm:$0xff]   ;;  %v3947_v62 = vld [vmem:[%s5894_s1 + $0x554] ss:$52 sps:$4 sm:$0xff]   ;;  %v3953_v2 = vld [vmem:[%s5894_s1 + $0x5bc] ss:$52 sps:$4 sm:$0xff]  }
  0x15   :  { %v3951_v1 = vld [vmem:[%s5894_s1 + $0x5b4] ss:$52 sps:$4 sm:$0xff]   ;;  %v3955_v3 = vld [vmem:[%s5894_s1 + $0x5b0] ss:$52 sps:$4 sm:$0xff]   ;;  %v3956_v4 = vld [vmem:[%s5894_s1 + $0x5b8] ss:$52 sps:$4 sm:$0xff]  }
  0x16   :  { %2649 = vmatprep.mubr.bf16.mxu0 %v4709_v58  ;;  %2731 = vmatprep.mubr.bf16.mxu1 %v4709_v58  ;;  %v3957_v5 = vld [vmem:[%s5894_s1 + $0x61c] ss:$52 sps:$4 sm:$0xff]   ;;  %v3959_v6 = vld [vmem:[%s5894_s1 + $0x624] ss:$52 sps:$4 sm:$0xff]   ;;  %v3962_v8 = vld [vmem:[%s5894_s1 + $0x620] ss:$52 sps:$4 sm:$0xff]   ;;  %v4778_v16 = vcombine.high %v4709_v58, %v4709_v58 }
  0x17   :  { %2628 = vmatpush1.bf16.msra.mxu0 %v3901_v22  ;;  %2710 = vmatpush1.bf16.msra.mxu1 %v3902_v23  ;;  %v3961_v7 = vld [vmem:[%s5894_s1 + $0x618] ss:$52 sps:$4 sm:$0xff]   ;;  %v3963_v11 = vld [vmem:[%s5894_s1 + $0x680] ss:$52 sps:$4 sm:$0xff]   ;;  %v3966_v13 = vld [vmem:[%s5894_s1 + $0x688] ss:$52 sps:$4 sm:$0xff]  }
  0x18   :  { %2629 = vmatprep.subr.bf16.mxu0 %v3903_v24  ;;  %2711 = vmatprep.subr.bf16.mxu1 %v3905_v25  ;;  %v3965_v9 = vld [vmem:[%s5894_s1 + $0x684] ss:$52 sps:$4 sm:$0xff]   ;;  %v3968_v10 = vld [vmem:[%s5894_s1 + $0x68c] ss:$52 sps:$4 sm:$0xff]   ;;  %v3974_v15 = vld [vmem:[%s5894_s1 + $0x6f4] ss:$52 sps:$4 sm:$0xff]  }
  0x19   :  { %v3971_v14 = vld [vmem:[%s5894_s1 + $0x6ec] ss:$52 sps:$4 sm:$0xff]   ;;  %v3969_v17 = vld [vmem:[%s5894_s1 + $0x6e8] ss:$52 sps:$4 sm:$0xff]   ;;  %v3972_v18 = vld [vmem:[%s5894_s1 + $0x6f0] ss:$52 sps:$4 sm:$0xff]  }
  0x1a   :  { %v3977_v19 = vld [vmem:[%s5894_s1 + $0x754] ss:$52 sps:$4 sm:$0xff]   ;;  %v3980_v20 = vld [vmem:[%s5894_s1 + $0x75c] ss:$52 sps:$4 sm:$0xff]   ;;  %v3978_v22 = vld [vmem:[%s5894_s1 + $0x758] ss:$52 sps:$4 sm:$0xff]  }
  0x1b   :  { %2630 = vmatpush1.bf16.msra.mxu0 %v3907_v26  ;;  %2712 = vmatpush1.bf16.msra.mxu1 %v3908_v27  ;;  %v3975_v21 = vld [vmem:[%s5894_s1 + $0x750] ss:$52 sps:$4 sm:$0xff]   ;;  %v3981_v25 = vld [vmem:[%s5894_s1 + $0x7b8] ss:$52 sps:$4 sm:$0xff]   ;;  %v3984_v26 = vld [vmem:[%s5894_s1 + $0x7c0] ss:$52 sps:$4 sm:$0xff]   ;;  %v8_v27 = vstv %s5896_s2 }
  0x1c   :  { %2631 = vmatprep.subr.bf16.mxu0 %v3909_v28  ;;  %2713 = vmatprep.subr.bf16.mxu1 %v3911_v29  ;;  %v3983_v23 = vld [vmem:[%s5894_s1 + $0x7bc] ss:$52 sps:$4 sm:$0xff]   ;;  %v3986_v24 = vld [vmem:[%s5894_s1 + $0x7c4] ss:$52 sps:$4 sm:$0xff]   ;;  %v3992_v29 = vld [vmem:[%s5894_s1 + $0x82c] ss:$52 sps:$4 sm:$0xff]  }
  0x1d   :  { %v3989_v28 = vld [vmem:[%s5894_s1 + $0x824] ss:$52 sps:$4 sm:$0xff]   ;;  %9 = vst [vmem:[#allocation2] sm:$0x1] %v8_v27  ;;  %v4004_v39 = vld [vmem:[%s5894_s1 + $0x8fc] ss:$52 sps:$4 sm:$0xff]  }
  0x1e   :  { %v3999_v40 = vld [vmem:[%s5894_s1 + $0x8f0] ss:$52 sps:$4 sm:$0xff]   ;;  %v4008_v46 = vld [vmem:[%s5894_s1 + $0x960] ss:$52 sps:$4 sm:$0xff]  }
  0x1f   :  { %2632 = vmatpush1.bf16.msra.mxu0 %v3913_v30  ;;  %2714 = vmatpush1.bf16.msra.mxu1 %v3914_v31  ;;  %v3987_v30 = vld [vmem:[%s5894_s1 + $0x820] ss:$52 sps:$4 sm:$0xff]   ;;  %v3990_v31 = vld [vmem:[%s5894_s1 + $0x828] ss:$52 sps:$4 sm:$0xff]   ;;  %v4020_v55 = vld [vmem:[%s5894_s1 + $0xa30] ss:$52 sps:$4 sm:$0xff]  }
  0x20   :  { %2633 = vmatprep.subr.bf16.mxu0 %v3915_v32  ;;  %2715 = vmatprep.subr.bf16.mxu1 %v3917_v33  ;;  %v3995_v32 = vld [vmem:[%s5894_s1 + $0x88c] ss:$52 sps:$4 sm:$0xff]   ;;  %v3998_v33 = vld [vmem:[%s5894_s1 + $0x894] ss:$52 sps:$4 sm:$0xff]  }
  0x21   :  { %v4019_v52 = vld [vmem:[%s5894_s1 + $0xa2c] ss:$52 sps:$4 sm:$0xff]  }
  0x22   :  { %v4068_v27 = vld [vmem:[%s5894_s1 + $0x80] ss:$52 sps:$4 sm:$0xff]  }
  0x23   :  { %2634 = vmatpush1.bf16.msra.mxu0 %v3919_v34  ;;  %2716 = vmatpush1.bf16.msra.mxu1 %v3920_v35  ;;  %v4528_v34 = vmov 0   ;;  %v3993_v35 = vld [vmem:[%s5894_s1 + $0x888] ss:$52 sps:$4 sm:$0xff]  }
  0x24   :  { %2635 = vmatprep.subr.bf16.mxu0 %v3921_v36  ;;  %2717 = vmatprep.subr.bf16.mxu1 %v3923_v37  ;;  %v3996_v36 = vld [vmem:[%s5894_s1 + $0x890] ss:$52 sps:$4 sm:$0xff]   ;;  %v4001_v37 = vld [vmem:[%s5894_s1 + $0x8f4] ss:$52 sps:$4 sm:$0xff]  }
  0x25   :  { %3866 = vset.pattern.permute.xlu0 %v4528_v34  ;;  %v4077_v34 = vld [vmem:[%s5894_s1 + $0x148] ss:$52 sps:$4 sm:$0xff]  }
  0x27   :  { %2636 = vmatpush1.bf16.msra.mxu0 %v3925_v41  ;;  %2718 = vmatpush1.bf16.msra.mxu1 %v3926_v42  ;;  %v4002_v41 = vld [vmem:[%s5894_s1 + $0x8f8] ss:$52 sps:$4 sm:$0xff]   ;;  %v4007_v42 = vld [vmem:[%s5894_s1 + $0x95c] ss:$52 sps:$4 sm:$0xff]  }
  0x28   :  { %2637 = vmatprep.subr.bf16.mxu0 %v3927_v43  ;;  %2719 = vmatprep.subr.bf16.mxu1 %v3929_v44  ;;  %v4010_v43 = vld [vmem:[%s5894_s1 + $0x964] ss:$52 sps:$4 sm:$0xff]  }
  0x29   :  { %v4005_v44 = vld [vmem:[%s5894_s1 + $0x958] ss:$52 sps:$4 sm:$0xff]  }
  0x2b   :  { %2638 = vmatpush1.bf16.msra.mxu0 %v3931_v47  ;;  %2720 = vmatpush1.bf16.msra.mxu1 %v3932_v48  ;;  %v4013_v47 = vld [vmem:[%s5894_s1 + $0x9c4] ss:$52 sps:$4 sm:$0xff]   ;;  %v4016_v48 = vld [vmem:[%s5894_s1 + $0x9cc] ss:$52 sps:$4 sm:$0xff]  }
  0x2c   :  { %2639 = vmatprep.subr.bf16.mxu0 %v3933_v49  ;;  %2721 = vmatprep.subr.bf16.mxu1 %v3935_v50  ;;  %v4011_v49 = vld [vmem:[%s5894_s1 + $0x9c0] ss:$52 sps:$4 sm:$0xff]   ;;  %v4014_v50 = vld [vmem:[%s5894_s1 + $0x9c8] ss:$52 sps:$4 sm:$0xff]  }
  0x2f   :  { %2640 = vmatpush1.bf16.msra.mxu0 %v3937_v53  ;;  %2722 = vmatpush1.bf16.msra.mxu1 %v3938_v54  ;;  %v4022_v53 = vld [vmem:[%s5894_s1 + $0xa34] ss:$52 sps:$4 sm:$0xff]  }
  0x30   :  { %2641 = vmatprep.subr.bf16.mxu0 %v3939_v56  ;;  %2723 = vmatprep.subr.bf16.mxu1 %v3941_v57  ;;  %v4017_v54 = vld [vmem:[%s5894_s1 + $0xa28] ss:$52 sps:$4 sm:$0xff]  }
  0x31   :  { %v4025_v56 = vld [vmem:[%s5894_s1 + $0xa94] ss:$52 sps:$4 sm:$0xff]   ;;  %v4028_v57 = vld [vmem:[%s5894_s1 + $0xa9c] ss:$52 sps:$4 sm:$0xff]  }
  0x33   :  { %2642 = vmatpush1.bf16.msra.mxu0 %v3943_v59  ;;  %2724 = vmatpush1.bf16.msra.mxu1 %v3944_v60  ;;  %v4023_v59 = vld [vmem:[%s5894_s1 + $0xa90] ss:$52 sps:$4 sm:$0xff]   ;;  %v4026_v60 = vld [vmem:[%s5894_s1 + $0xa98] ss:$52 sps:$4 sm:$0xff]  }
  0x34   :  { %2643 = vmatprep.subr.bf16.mxu0 %v3945_v61  ;;  %2725 = vmatprep.subr.bf16.mxu1 %v3947_v62  ;;  %v4031_v61 = vld [vmem:[%s5894_s1 + $0xafc] ss:$52 sps:$4 sm:$0xff]   ;;  %v4034_v62 = vld [vmem:[%s5894_s1 + $0xb04] ss:$52 sps:$4 sm:$0xff]  }
  0x37   :  { %2644 = vmatpush1.bf16.msra.mxu0 %v3949_v63  ;;  %2726 = vmatpush1.bf16.msra.mxu1 %v3950_v0  ;;  %v4029_v63 = vld [vmem:[%s5894_s1 + $0xaf8] ss:$52 sps:$4 sm:$0xff]   ;;  %v4032_v0 = vld [vmem:[%s5894_s1 + $0xb00] ss:$52 sps:$4 sm:$0xff]  }
  0x38   :  { %2645 = vmatprep.subr.bf16.mxu0 %v3951_v1  ;;  %2727 = vmatprep.subr.bf16.mxu1 %v3953_v2  ;;  %v4037_v1 = vld [vmem:[%s5894_s1 + $0xb64] ss:$52 sps:$4 sm:$0xff]   ;;  %v4040_v2 = vld [vmem:[%s5894_s1 + $0xb6c] ss:$52 sps:$4 sm:$0xff]  }
  0x3b   :  { %2646 = vmatpush1.bf16.msra.mxu0 %v3955_v3  ;;  %2728 = vmatpush1.bf16.msra.mxu1 %v3956_v4  ;;  %v4035_v3 = vld [vmem:[%s5894_s1 + $0xb60] ss:$52 sps:$4 sm:$0xff]   ;;  %v4038_v4 = vld [vmem:[%s5894_s1 + $0xb68] ss:$52 sps:$4 sm:$0xff]  }
  0x3c   :  { %2647 = vmatprep.subr.bf16.mxu0 %v3957_v5  ;;  %2729 = vmatprep.subr.bf16.mxu1 %v3959_v6  ;;  %v4043_v5 = vld [vmem:[%s5894_s1 + $0xbcc] ss:$52 sps:$4 sm:$0xff]   ;;  %v4046_v6 = vld [vmem:[%s5894_s1 + $0xbd4] ss:$52 sps:$4 sm:$0xff]  }
  0x3f   :  { %2648 = vmatpush1.bf16.msra.mxu0 %v3961_v7  ;;  %2730 = vmatpush1.bf16.msra.mxu1 %v3962_v8  ;;  %v4041_v7 = vld [vmem:[%s5894_s1 + $0xbc8] ss:$52 sps:$4 sm:$0xff]   ;;  %v4044_v8 = vld [vmem:[%s5894_s1 + $0xbd0] ss:$52 sps:$4 sm:$0xff]  }
  0x40   :  { %2658 = vmatprep.subr.bf16.mxu0 %v3965_v9  ;;  %2740 = vmatprep.subr.bf16.mxu1 %v3968_v10  ;;  %v4049_v9 = vld [vmem:[%s5894_s1 + $0xc34] ss:$52 sps:$4 sm:$0xff]   ;;  %v4052_v10 = vld [vmem:[%s5894_s1 + $0xc3c] ss:$52 sps:$4 sm:$0xff]  }
  0x42   :  { %2650 = vmatmul.mubr.bf16.vlgmr.msra.gmra.mrb[0].mxu0 %v4765_v12  ;;  %2732 = vmatmul.mubr.bf16.vlgmr.msra.gmra.mrb[0].mxu1 %v4765_v12 }
  0x43   :  { %2659 = vmatpush1.bf16.msra.mxu0 %v3963_v11  ;;  %2741 = vmatpush1.bf16.msra.mxu1 %v3966_v13  ;;  %v4047_v11 = vld [vmem:[%s5894_s1 + $0xc30] ss:$52 sps:$4 sm:$0xff]   ;;  %v4050_v13 = vld [vmem:[%s5894_s1 + $0xc38] ss:$52 sps:$4 sm:$0xff]  }
  0x44   :  { %2660 = vmatprep.subr.bf16.mxu0 %v3971_v14  ;;  %2742 = vmatprep.subr.bf16.mxu1 %v3974_v15  ;;  %v4055_v14 = vld [vmem:[%s5894_s1 + $0xc9c] ss:$52 sps:$4 sm:$0xff]   ;;  %v4058_v15 = vld [vmem:[%s5894_s1 + $0xca4] ss:$52 sps:$4 sm:$0xff]  }
  0x45   :  { %2690 = vmatprep.mubr.bf16.mxu0 %v4778_v16  ;;  %2772 = vmatprep.mubr.bf16.mxu1 %v4778_v16 }
  0x47   :  { %2661 = vmatpush1.bf16.msra.mxu0 %v3969_v17  ;;  %2743 = vmatpush1.bf16.msra.mxu1 %v3972_v18  ;;  %v4053_v17 = vld [vmem:[%s5894_s1 + $0xc98] ss:$52 sps:$4 sm:$0xff]   ;;  %v4056_v18 = vld [vmem:[%s5894_s1 + $0xca0] ss:$52 sps:$4 sm:$0xff]  }
  0x48   :  { %2662 = vmatprep.subr.bf16.mxu0 %v3977_v19  ;;  %2744 = vmatprep.subr.bf16.mxu1 %v3980_v20  ;;  %v4061_v19 = vld [vmem:[%s5894_s1 + $0x14] ss:$52 sps:$4 sm:$0xff]   ;;  %v4064_v20 = vld [vmem:[%s5894_s1 + $0x1c] ss:$52 sps:$4 sm:$0xff]  }
  0x4b   :  { %2663 = vmatpush1.bf16.msra.mxu0 %v3975_v21  ;;  %2745 = vmatpush1.bf16.msra.mxu1 %v3978_v22  ;;  %v4969_v21 = vcombine.high %v4765_v12, %v4765_v12  ;;  %v4059_v22 = vld [vmem:[%s5894_s1 + $0x10] ss:$52 sps:$4 sm:$0xff]  }
  0x4c   :  { %2664 = vmatprep.subr.bf16.mxu0 %v3983_v23  ;;  %2746 = vmatprep.subr.bf16.mxu1 %v3986_v24  ;;  %v4062_v23 = vld [vmem:[%s5894_s1 + $0x18] ss:$52 sps:$4 sm:$0xff]   ;;  %v4067_v24 = vld [vmem:[%s5894_s1 + $0x7c] ss:$52 sps:$4 sm:$0xff]  }
  0x4f   :  { %2665 = vmatpush1.bf16.msra.mxu0 %v3981_v25  ;;  %2747 = vmatpush1.bf16.msra.mxu1 %v3984_v26  ;;  %v4070_v25 = vld [vmem:[%s5894_s1 + $0x84] ss:$52 sps:$4 sm:$0xff]  }
  0x50   :  { %2666 = vmatprep.subr.bf16.mxu0 %v3989_v28  ;;  %2748 = vmatprep.subr.bf16.mxu1 %v3992_v29  ;;  %v4065_v26 = vld [vmem:[%s5894_s1 + $0x78] ss:$52 sps:$4 sm:$0xff]  }
  0x51   :  { %v4073_v28 = vld [vmem:[%s5894_s1 + $0xe4] ss:$52 sps:$4 sm:$0xff]   ;;  %v4076_v29 = vld [vmem:[%s5894_s1 + $0xec] ss:$52 sps:$4 sm:$0xff]  }
  0x53   :  { %2667 = vmatpush1.bf16.msra.mxu0 %v3987_v30  ;;  %2749 = vmatpush1.bf16.msra.mxu1 %v3990_v31  ;;  %v4071_v30 = vld [vmem:[%s5894_s1 + $0xe0] ss:$52 sps:$4 sm:$0xff]   ;;  %v4074_v31 = vld [vmem:[%s5894_s1 + $0xe8] ss:$52 sps:$4 sm:$0xff]  }
  0x54   :  { %2668 = vmatprep.subr.bf16.mxu0 %v3995_v32  ;;  %2750 = vmatprep.subr.bf16.mxu1 %v3998_v33  ;;  %v4079_v32 = vld [vmem:[%s5894_s1 + $0x14c] ss:$52 sps:$4 sm:$0xff]   ;;  %v4082_v33 = vld [vmem:[%s5894_s1 + $0x154] ss:$52 sps:$4 sm:$0xff]  }
  0x57   :  { %2669 = vmatpush1.bf16.msra.mxu0 %v3993_v35  ;;  %2751 = vmatpush1.bf16.msra.mxu1 %v3996_v36  ;;  %v4080_v35 = vld [vmem:[%s5894_s1 + $0x150] ss:$52 sps:$4 sm:$0xff]   ;;  %v4085_v36 = vld [vmem:[%s5894_s1 + $0x1b4] ss:$52 sps:$4 sm:$0xff]  }
  0x58   :  { %2670 = vmatprep.subr.bf16.mxu0 %v4001_v37  ;;  %2752 = vmatprep.subr.bf16.mxu1 %v4004_v39  ;;  %v4088_v37 = vld [vmem:[%s5894_s1 + $0x1bc] ss:$52 sps:$4 sm:$0xff]   ;;  %v466_v39 = vld [vmem:[#allocation2] sm:$0x1] }
  0x59   :  { %469 = vperm.xlu0 %3866, %v466_v39   ;;  %v4167_v39 = vld [vmem:[%s5894_s1 + $0x760] ss:$52 sps:$4 sm:$0xff]  }
  0x5b   :  { %2671 = vmatpush1.bf16.msra.mxu0 %v3999_v40  ;;  %2753 = vmatpush1.bf16.msra.mxu1 %v4002_v41  ;;  %v4083_v40 = vld [vmem:[%s5894_s1 + $0x1b0] ss:$52 sps:$4 sm:$0xff]   ;;  %v4086_v41 = vld [vmem:[%s5894_s1 + $0x1b8] ss:$52 sps:$4 sm:$0xff]  }
  0x5c   :  { %2672 = vmatprep.subr.bf16.mxu0 %v4007_v42  ;;  %2754 = vmatprep.subr.bf16.mxu1 %v4010_v43  ;;  %v4091_v42 = vld [vmem:[%s5894_s1 + $0x21c] ss:$52 sps:$4 sm:$0xff]   ;;  %v4094_v43 = vld [vmem:[%s5894_s1 + $0x224] ss:$52 sps:$4 sm:$0xff]  }
  0x5f   :  { %2673 = vmatpush1.bf16.msra.mxu0 %v4005_v44  ;;  %2755 = vmatpush1.bf16.msra.mxu1 %v4008_v46  ;;  %v4089_v44 = vld [vmem:[%s5894_s1 + $0x218] ss:$52 sps:$4 sm:$0xff]   ;;  %v4092_v46 = vld [vmem:[%s5894_s1 + $0x220] ss:$52 sps:$4 sm:$0xff]  }
  0x60   :  { %2674 = vmatprep.subr.bf16.mxu0 %v4013_v47  ;;  %2756 = vmatprep.subr.bf16.mxu1 %v4016_v48  ;;  %v4097_v47 = vld [vmem:[%s5894_s1 + $0x284] ss:$52 sps:$4 sm:$0xff]   ;;  %v4100_v48 = vld [vmem:[%s5894_s1 + $0x28c] ss:$52 sps:$4 sm:$0xff]  }
  0x63   :  { %2675 = vmatpush1.bf16.msra.mxu0 %v4011_v49  ;;  %2757 = vmatpush1.bf16.msra.mxu1 %v4014_v50  ;;  %v4095_v49 = vld [vmem:[%s5894_s1 + $0x280] ss:$52 sps:$4 sm:$0xff]   ;;  %v4098_v50 = vld [vmem:[%s5894_s1 + $0x288] ss:$52 sps:$4 sm:$0xff]  }
  0x64   :  { %2676 = vmatprep.subr.bf16.mxu0 %v4019_v52  ;;  %2758 = vmatprep.subr.bf16.mxu1 %v4022_v53  ;;  %v4103_v52 = vld [vmem:[%s5894_s1 + $0x2ec] ss:$52 sps:$4 sm:$0xff]   ;;  %v4106_v53 = vld [vmem:[%s5894_s1 + $0x2f4] ss:$52 sps:$4 sm:$0xff]  }
  0x67   :  { %2677 = vmatpush1.bf16.msra.mxu0 %v4017_v54  ;;  %2759 = vmatpush1.bf16.msra.mxu1 %v4020_v55  ;;  %v4101_v54 = vld [vmem:[%s5894_s1 + $0x2e8] ss:$52 sps:$4 sm:$0xff]   ;;  %v4104_v55 = vld [vmem:[%s5894_s1 + $0x2f0] ss:$52 sps:$4 sm:$0xff]  }
  0x68   :  { %2678 = vmatprep.subr.bf16.mxu0 %v4025_v56  ;;  %2760 = vmatprep.subr.bf16.mxu1 %v4028_v57  ;;  %v4109_v56 = vld [vmem:[%s5894_s1 + $0x354] ss:$52 sps:$4 sm:$0xff]   ;;  %v4112_v57 = vld [vmem:[%s5894_s1 + $0x35c] ss:$52 sps:$4 sm:$0xff]  }
  0x6b   :  { %2679 = vmatpush1.bf16.msra.mxu0 %v4023_v59  ;;  %2761 = vmatpush1.bf16.msra.mxu1 %v4026_v60  ;;  %v4107_v59 = vld [vmem:[%s5894_s1 + $0x350] ss:$52 sps:$4 sm:$0xff]   ;;  %v4110_v60 = vld [vmem:[%s5894_s1 + $0x358] ss:$52 sps:$4 sm:$0xff]  }
  0x6c   :  { %2680 = vmatprep.subr.bf16.mxu0 %v4031_v61  ;;  %2762 = vmatprep.subr.bf16.mxu1 %v4034_v62  ;;  %v4115_v61 = vld [vmem:[%s5894_s1 + $0x3bc] ss:$52 sps:$4 sm:$0xff]   ;;  %v4118_v62 = vld [vmem:[%s5894_s1 + $0x3c4] ss:$52 sps:$4 sm:$0xff]  }
  0x6f   :  { %2681 = vmatpush1.bf16.msra.mxu0 %v4029_v63  ;;  %2763 = vmatpush1.bf16.msra.mxu1 %v4032_v0  ;;  %v4113_v63 = vld [vmem:[%s5894_s1 + $0x3b8] ss:$52 sps:$4 sm:$0xff]   ;;  %v4116_v0 = vld [vmem:[%s5894_s1 + $0x3c0] ss:$52 sps:$4 sm:$0xff]  }
  0x70   :  { %2682 = vmatprep.subr.bf16.mxu0 %v4037_v1  ;;  %2764 = vmatprep.subr.bf16.mxu1 %v4040_v2  ;;  %v4121_v1 = vld [vmem:[%s5894_s1 + $0x424] ss:$52 sps:$4 sm:$0xff]   ;;  %v4124_v2 = vld [vmem:[%s5894_s1 + $0x42c] ss:$52 sps:$4 sm:$0xff]  }
  0x73   :  { %2683 = vmatpush1.bf16.msra.mxu0 %v4035_v3  ;;  %2765 = vmatpush1.bf16.msra.mxu1 %v4038_v4  ;;  %v4119_v3 = vld [vmem:[%s5894_s1 + $0x420] ss:$52 sps:$4 sm:$0xff]   ;;  %v4122_v4 = vld [vmem:[%s5894_s1 + $0x428] ss:$52 sps:$4 sm:$0xff]  }
  0x74   :  { %2684 = vmatprep.subr.bf16.mxu0 %v4043_v5  ;;  %2766 = vmatprep.subr.bf16.mxu1 %v4046_v6  ;;  %v4127_v5 = vld [vmem:[%s5894_s1 + $0x48c] ss:$52 sps:$4 sm:$0xff]   ;;  %v4130_v6 = vld [vmem:[%s5894_s1 + $0x494] ss:$52 sps:$4 sm:$0xff]  }
  0x77   :  { %2685 = vmatpush1.bf16.msra.mxu0 %v4041_v7  ;;  %2767 = vmatpush1.bf16.msra.mxu1 %v4044_v8  ;;  %v4125_v7 = vld [vmem:[%s5894_s1 + $0x488] ss:$52 sps:$4 sm:$0xff]   ;;  %v4128_v8 = vld [vmem:[%s5894_s1 + $0x490] ss:$52 sps:$4 sm:$0xff]  }
  0x78   :  { %2686 = vmatprep.subr.bf16.mxu0 %v4049_v9  ;;  %2768 = vmatprep.subr.bf16.mxu1 %v4052_v10  ;;  %v4133_v9 = vld [vmem:[%s5894_s1 + $0x4f4] ss:$52 sps:$4 sm:$0xff]   ;;  %v4136_v10 = vld [vmem:[%s5894_s1 + $0x4fc] ss:$52 sps:$4 sm:$0xff]  }
  0x7b   :  { %2687 = vmatpush1.bf16.msra.mxu0 %v4047_v11  ;;  %2769 = vmatpush1.bf16.msra.mxu1 %v4050_v13  ;;  %v4131_v11 = vld [vmem:[%s5894_s1 + $0x4f0] ss:$52 sps:$4 sm:$0xff]   ;;  %v4134_v13 = vld [vmem:[%s5894_s1 + $0x4f8] ss:$52 sps:$4 sm:$0xff]  }
  0x7c   :  { %2688 = vmatprep.subr.bf16.mxu0 %v4055_v14  ;;  %2770 = vmatprep.subr.bf16.mxu1 %v4058_v15  ;;  %v4139_v14 = vld [vmem:[%s5894_s1 + $0x55c] ss:$52 sps:$4 sm:$0xff]   ;;  %v4142_v15 = vld [vmem:[%s5894_s1 + $0x564] ss:$52 sps:$4 sm:$0xff]  }
  0x7f   :  { %2689 = vmatpush1.bf16.msra.mxu0 %v4053_v17  ;;  %2771 = vmatpush1.bf16.msra.mxu1 %v4056_v18  ;;  %v4137_v17 = vld [vmem:[%s5894_s1 + $0x558] ss:$52 sps:$4 sm:$0xff]   ;;  %v4140_v18 = vld [vmem:[%s5894_s1 + $0x560] ss:$52 sps:$4 sm:$0xff]  }
  0x80   :  { %2781 = vmatprep.subr.bf16.mxu0 %v4061_v19  ;;  %2863 = vmatprep.subr.bf16.mxu1 %v4064_v20  ;;  %v4145_v19 = vld [vmem:[%s5894_s1 + $0x5c4] ss:$52 sps:$4 sm:$0xff]   ;;  %v4148_v20 = vld [vmem:[%s5894_s1 + $0x5cc] ss:$52 sps:$4 sm:$0xff]  }
  0x82   :  { %2691 = vmatmul.mubr.bf16.vlgmr.msra.gmra.mrb[0].mxu0 %v4969_v21  ;;  %2773 = vmatmul.mubr.bf16.vlgmr.msra.gmra.mrb[0].mxu1 %v4969_v21 }
  0x83   :  { %2782 = vmatpush1.bf16.msra.mxu0 %v4059_v22  ;;  %2864 = vmatpush1.bf16.msra.mxu1 %v4062_v23  ;;  %v4143_v22 = vld [vmem:[%s5894_s1 + $0x5c0] ss:$52 sps:$4 sm:$0xff]   ;;  %v4146_v23 = vld [vmem:[%s5894_s1 + $0x5c8] ss:$52 sps:$4 sm:$0xff]  }
  0x84   :  { %2783 = vmatprep.subr.bf16.mxu0 %v4067_v24  ;;  %2865 = vmatprep.subr.bf16.mxu1 %v4070_v25  ;;  %v4151_v24 = vld [vmem:[%s5894_s1 + $0x62c] ss:$52 sps:$4 sm:$0xff]   ;;  %v4154_v25 = vld [vmem:[%s5894_s1 + $0x634] ss:$52 sps:$4 sm:$0xff]  }
  0x85   :  { %2813 = vmatprep.mubr.bf16.mxu0 %v4709_v58  ;;  %2895 = vmatprep.mubr.bf16.mxu1 %v4709_v58 }
  0x87   :  { %2784 = vmatpush1.bf16.msra.mxu0 %v4065_v26  ;;  %2866 = vmatpush1.bf16.msra.mxu1 %v4068_v27  ;;  %v4149_v26 = vld [vmem:[%s5894_s1 + $0x628] ss:$52 sps:$4 sm:$0xff]   ;;  %v4152_v27 = vld [vmem:[%s5894_s1 + $0x630] ss:$52 sps:$4 sm:$0xff]  }
  0x88   :  { %2785 = vmatprep.subr.bf16.mxu0 %v4073_v28  ;;  %2867 = vmatprep.subr.bf16.mxu1 %v4076_v29  ;;  %v4157_v28 = vld [vmem:[%s5894_s1 + $0x694] ss:$52 sps:$4 sm:$0xff]   ;;  %v4160_v29 = vld [vmem:[%s5894_s1 + $0x69c] ss:$52 sps:$4 sm:$0xff]  }
  0x8b   :  { %2786 = vmatpush1.bf16.msra.mxu0 %v4071_v30  ;;  %2868 = vmatpush1.bf16.msra.mxu1 %v4074_v31  ;;  %v4155_v30 = vld [vmem:[%s5894_s1 + $0x690] ss:$52 sps:$4 sm:$0xff]   ;;  %v4158_v31 = vld [vmem:[%s5894_s1 + $0x698] ss:$52 sps:$4 sm:$0xff]  }
  0x8c   :  { %2787 = vmatprep.subr.bf16.mxu0 %v4079_v32  ;;  %2869 = vmatprep.subr.bf16.mxu1 %v4082_v33  ;;  %v4163_v32 = vld [vmem:[%s5894_s1 + $0x6fc] ss:$52 sps:$4 sm:$0xff]   ;;  %v4166_v33 = vld [vmem:[%s5894_s1 + $0x704] ss:$52 sps:$4 sm:$0xff]  }
  0x8f   :  { %2788 = vmatpush1.bf16.msra.mxu0 %v4077_v34  ;;  %2870 = vmatpush1.bf16.msra.mxu1 %v4080_v35  ;;  %v4161_v34 = vld [vmem:[%s5894_s1 + $0x6f8] ss:$52 sps:$4 sm:$0xff]   ;;  %v4164_v35 = vld [vmem:[%s5894_s1 + $0x700] ss:$52 sps:$4 sm:$0xff]  }
  0x90   :  { %2789 = vmatprep.subr.bf16.mxu0 %v4085_v36  ;;  %2871 = vmatprep.subr.bf16.mxu1 %v4088_v37  ;;  %v4169_v36 = vld [vmem:[%s5894_s1 + $0x764] ss:$52 sps:$4 sm:$0xff]   ;;  %v4172_v37 = vld [vmem:[%s5894_s1 + $0x76c] ss:$52 sps:$4 sm:$0xff]  }
  0x93   :  { %2790 = vmatpush1.bf16.msra.mxu0 %v4083_v40  ;;  %2872 = vmatpush1.bf16.msra.mxu1 %v4086_v41  ;;  %v4170_v40 = vld [vmem:[%s5894_s1 + $0x768] ss:$52 sps:$4 sm:$0xff]   ;;  %v4175_v41 = vld [vmem:[%s5894_s1 + $0x7cc] ss:$52 sps:$4 sm:$0xff]  }
  0x94   :  { %2791 = vmatprep.subr.bf16.mxu0 %v4091_v42  ;;  %2873 = vmatprep.subr.bf16.mxu1 %v4094_v43  ;;  %v4178_v42 = vld [vmem:[%s5894_s1 + $0x7d4] ss:$52 sps:$4 sm:$0xff]  }
  0x95   :  { %v4173_v43 = vld [vmem:[%s5894_s1 + $0x7c8] ss:$52 sps:$4 sm:$0xff]  }
  0x97   :  { %2792 = vmatpush1.bf16.msra.mxu0 %v4089_v44  ;;  %2874 = vmatpush1.bf16.msra.mxu1 %v4092_v46  ;;  %v4176_v44 = vld [vmem:[%s5894_s1 + $0x7d0] ss:$52 sps:$4 sm:$0xff]   ;;  %v4181_v46 = vld [vmem:[%s5894_s1 + $0x834] ss:$52 sps:$4 sm:$0xff]  }
  0x98   :  { %2793 = vmatprep.subr.bf16.mxu0 %v4097_v47  ;;  %2875 = vmatprep.subr.bf16.mxu1 %v4100_v48  ;;  %v4184_v47 = vld [vmem:[%s5894_s1 + $0x83c] ss:$52 sps:$4 sm:$0xff]  }
  0x99   :  { %v4179_v48 = vld [vmem:[%s5894_s1 + $0x830] ss:$52 sps:$4 sm:$0xff]  }
  0x9b   :  { %2794 = vmatpush1.bf16.msra.mxu0 %v4095_v49  ;;  %2876 = vmatpush1.bf16.msra.mxu1 %v4098_v50  ;;  %v4182_v49 = vld [vmem:[%s5894_s1 + $0x838] ss:$52 sps:$4 sm:$0xff]   ;;  %v4187_v50 = vld [vmem:[%s5894_s1 + $0x89c] ss:$52 sps:$4 sm:$0xff]  }
  0x9c   :  { %2795 = vmatprep.subr.bf16.mxu0 %v4103_v52  ;;  %2877 = vmatprep.subr.bf16.mxu1 %v4106_v53  ;;  %v4190_v52 = vld [vmem:[%s5894_s1 + $0x8a4] ss:$52 sps:$4 sm:$0xff]  }
  0x9d   :  { %v4185_v53 = vld [vmem:[%s5894_s1 + $0x898] ss:$52 sps:$4 sm:$0xff]  }
  0x9f   :  { %2796 = vmatpush1.bf16.msra.mxu0 %v4101_v54  ;;  %2878 = vmatpush1.bf16.msra.mxu1 %v4104_v55  ;;  %v4188_v54 = vld [vmem:[%s5894_s1 + $0x8a0] ss:$52 sps:$4 sm:$0xff]   ;;  %v4193_v55 = vld [vmem:[%s5894_s1 + $0x904] ss:$52 sps:$4 sm:$0xff]  }
  0xa0   :  { %2797 = vmatprep.subr.bf16.mxu0 %v4109_v56  ;;  %2879 = vmatprep.subr.bf16.mxu1 %v4112_v57  ;;  %v4196_v56 = vld [vmem:[%s5894_s1 + $0x90c] ss:$52 sps:$4 sm:$0xff]  }
  0xa1   :  { %v4191_v57 = vld [vmem:[%s5894_s1 + $0x900] ss:$52 sps:$4 sm:$0xff]  }
  0xa3   :  { %2798 = vmatpush1.bf16.msra.mxu0 %v4107_v59  ;;  %2880 = vmatpush1.bf16.msra.mxu1 %v4110_v60  ;;  %v4194_v59 = vld [vmem:[%s5894_s1 + $0x908] ss:$52 sps:$4 sm:$0xff]   ;;  %v4199_v60 = vld [vmem:[%s5894_s1 + $0x96c] ss:$52 sps:$4 sm:$0xff]  }
  0xa4   :  { %2799 = vmatprep.subr.bf16.mxu0 %v4115_v61  ;;  %2881 = vmatprep.subr.bf16.mxu1 %v4118_v62  ;;  %v4202_v61 = vld [vmem:[%s5894_s1 + $0x974] ss:$52 sps:$4 sm:$0xff]  }
  0xa5   :  { %v4197_v62 = vld [vmem:[%s5894_s1 + $0x968] ss:$52 sps:$4 sm:$0xff]  }
  0xa7   :  { %2800 = vmatpush1.bf16.msra.mxu0 %v4113_v63  ;;  %2882 = vmatpush1.bf16.msra.mxu1 %v4116_v0  ;;  %v4200_v63 = vld [vmem:[%s5894_s1 + $0x970] ss:$52 sps:$4 sm:$0xff]   ;;  %v4205_v0 = vld [vmem:[%s5894_s1 + $0x9d4] ss:$52 sps:$4 sm:$0xff]  }
  0xa8   :  { %2801 = vmatprep.subr.bf16.mxu0 %v4121_v1  ;;  %2883 = vmatprep.subr.bf16.mxu1 %v4124_v2  ;;  %v4208_v1 = vld [vmem:[%s5894_s1 + $0x9dc] ss:$52 sps:$4 sm:$0xff]  }
  0xa9   :  { %v4203_v2 = vld [vmem:[%s5894_s1 + $0x9d0] ss:$52 sps:$4 sm:$0xff]  }
  0xab   :  { %2802 = vmatpush1.bf16.msra.mxu0 %v4119_v3  ;;  %2884 = vmatpush1.bf16.msra.mxu1 %v4122_v4  ;;  %v4206_v3 = vld [vmem:[%s5894_s1 + $0x9d8] ss:$52 sps:$4 sm:$0xff]   ;;  %v4211_v4 = vld [vmem:[%s5894_s1 + $0xa3c] ss:$52 sps:$4 sm:$0xff]  }
  0xac   :  { %2803 = vmatprep.subr.bf16.mxu0 %v4127_v5  ;;  %2885 = vmatprep.subr.bf16.mxu1 %v4130_v6  ;;  %v4214_v5 = vld [vmem:[%s5894_s1 + $0xa44] ss:$52 sps:$4 sm:$0xff]  }
  0xad   :  { %v4209_v6 = vld [vmem:[%s5894_s1 + $0xa38] ss:$52 sps:$4 sm:$0xff]  }
  0xaf   :  { %2804 = vmatpush1.bf16.msra.mxu0 %v4125_v7  ;;  %2886 = vmatpush1.bf16.msra.mxu1 %v4128_v8  ;;  %v4212_v7 = vld [vmem:[%s5894_s1 + $0xa40] ss:$52 sps:$4 sm:$0xff]   ;;  %v4217_v8 = vld [vmem:[%s5894_s1 + $0xaa4] ss:$52 sps:$4 sm:$0xff]  }
  0xb0   :  { %2805 = vmatprep.subr.bf16.mxu0 %v4133_v9  ;;  %2887 = vmatprep.subr.bf16.mxu1 %v4136_v10  ;;  %v4220_v9 = vld [vmem:[%s5894_s1 + $0xaac] ss:$52 sps:$4 sm:$0xff]  }
  0xb1   :  { %v4215_v10 = vld [vmem:[%s5894_s1 + $0xaa0] ss:$52 sps:$4 sm:$0xff]  }
  0xb3   :  { %2806 = vmatpush1.bf16.msra.mxu0 %v4131_v11  ;;  %2888 = vmatpush1.bf16.msra.mxu1 %v4134_v13  ;;  %v4218_v11 = vld [vmem:[%s5894_s1 + $0xaa8] ss:$52 sps:$4 sm:$0xff]   ;;  %v4223_v13 = vld [vmem:[%s5894_s1 + $0xb0c] ss:$52 sps:$4 sm:$0xff]  }
  0xb4   :  { %2807 = vmatprep.subr.bf16.mxu0 %v4139_v14  ;;  %2889 = vmatprep.subr.bf16.mxu1 %v4142_v15  ;;  %v4226_v14 = vld [vmem:[%s5894_s1 + $0xb14] ss:$52 sps:$4 sm:$0xff]  }
  0xb5   :  { %v4221_v15 = vld [vmem:[%s5894_s1 + $0xb08] ss:$52 sps:$4 sm:$0xff]  }
  0xb7   :  { %2808 = vmatpush1.bf16.msra.mxu0 %v4137_v17  ;;  %2890 = vmatpush1.bf16.msra.mxu1 %v4140_v18  ;;  %v4224_v17 = vld [vmem:[%s5894_s1 + $0xb10] ss:$52 sps:$4 sm:$0xff]   ;;  %v4229_v18 = vld [vmem:[%s5894_s1 + $0xb74] ss:$52 sps:$4 sm:$0xff]  }
  0xb8   :  { %2809 = vmatprep.subr.bf16.mxu0 %v4145_v19  ;;  %2891 = vmatprep.subr.bf16.mxu1 %v4148_v20  ;;  %v4232_v19 = vld [vmem:[%s5894_s1 + $0xb7c] ss:$52 sps:$4 sm:$0xff]  }
  0xb9   :  { %v4227_v20 = vld [vmem:[%s5894_s1 + $0xb70] ss:$52 sps:$4 sm:$0xff]  }
  0xbb   :  { %2810 = vmatpush1.bf16.msra.mxu0 %v4143_v22  ;;  %2892 = vmatpush1.bf16.msra.mxu1 %v4146_v23  ;;  %v4230_v22 = vld [vmem:[%s5894_s1 + $0xb78] ss:$52 sps:$4 sm:$0xff]   ;;  %v4235_v23 = vld [vmem:[%s5894_s1 + $0xbdc] ss:$52 sps:$4 sm:$0xff]  }
  0xbc   :  { %2811 = vmatprep.subr.bf16.mxu0 %v4151_v24  ;;  %2893 = vmatprep.subr.bf16.mxu1 %v4154_v25  ;;  %v4238_v24 = vld [vmem:[%s5894_s1 + $0xbe4] ss:$52 sps:$4 sm:$0xff]  }
  0xbd   :  { %v4233_v25 = vld [vmem:[%s5894_s1 + $0xbd8] ss:$52 sps:$4 sm:$0xff]  }
  0xbf   :  { %2812 = vmatpush1.bf16.msra.mxu0 %v4149_v26  ;;  %2894 = vmatpush1.bf16.msra.mxu1 %v4152_v27  ;;  %v4236_v26 = vld [vmem:[%s5894_s1 + $0xbe0] ss:$52 sps:$4 sm:$0xff]   ;;  %v4241_v27 = vld [vmem:[%s5894_s1 + $0xc44] ss:$52 sps:$4 sm:$0xff]  }
  0xc0   :  { %2822 = vmatprep.subr.bf16.mxu0 %v4157_v28  ;;  %2904 = vmatprep.subr.bf16.mxu1 %v4160_v29  ;;  %v4244_v28 = vld [vmem:[%s5894_s1 + $0xc4c] ss:$52 sps:$4 sm:$0xff]  }
  0xc1   :  { %v4239_v29 = vld [vmem:[%s5894_s1 + $0xc40] ss:$52 sps:$4 sm:$0xff]  }
  0xc2   :  { %2814 = vmatmul.mubr.bf16.vlgmr.msra.gmra.mrb[4].mxu0 %v4765_v12  ;;  %2896 = vmatmul.mubr.bf16.vlgmr.msra.gmra.mrb[4].mxu1 %v4765_v12 }
  0xc3   :  { %2823 = vmatpush1.bf16.msra.mxu0 %v4155_v30  ;;  %2905 = vmatpush1.bf16.msra.mxu1 %v4158_v31  ;;  %v4242_v30 = vld [vmem:[%s5894_s1 + $0xc48] ss:$52 sps:$4 sm:$0xff]   ;;  %v4247_v31 = vld [vmem:[%s5894_s1 + $0xcac] ss:$52 sps:$4 sm:$0xff]  }
  0xc4   :  { %2824 = vmatprep.subr.bf16.mxu0 %v4163_v32  ;;  %2906 = vmatprep.subr.bf16.mxu1 %v4166_v33  ;;  %v4250_v32 = vld [vmem:[%s5894_s1 + $0xcb4] ss:$52 sps:$4 sm:$0xff]  }
  0xc5   :  { %2854 = vmatprep.mubr.bf16.mxu0 %v4778_v16  ;;  %2936 = vmatprep.mubr.bf16.mxu1 %v4778_v16  ;;  %v4245_v33 = vld [vmem:[%s5894_s1 + $0xca8] ss:$52 sps:$4 sm:$0xff]  }
  0xc7   :  { %2825 = vmatpush1.bf16.msra.mxu0 %v4161_v34  ;;  %2907 = vmatpush1.bf16.msra.mxu1 %v4164_v35  ;;  %v4248_v34 = vld [vmem:[%s5894_s1 + $0xcb0] ss:$52 sps:$4 sm:$0xff]  }
  0xc8   :  { %2826 = vmatprep.subr.bf16.mxu0 %v4169_v36  ;;  %2908 = vmatprep.subr.bf16.mxu1 %v4172_v37  ;;  %v4253_v35 = vld [vmem:[%s5894_s1 + $0x24] ss:$52 sps:$4 sm:$0xff]   ;;  %v4256_v36 = vld [vmem:[%s5894_s1 + $0x2c] ss:$52 sps:$4 sm:$0xff]  }
  0xc9   :  { %v4251_v37 = vld [vmem:[%s5894_s1 + $0x20] ss:$52 sps:$4 sm:$0xff]  }
  0xcb   :  { %2827 = vmatpush1.bf16.msra.mxu0 %v4167_v39  ;;  %2909 = vmatpush1.bf16.msra.mxu1 %v4170_v40  ;;  %v4254_v39 = vld [vmem:[%s5894_s1 + $0x28] ss:$52 sps:$4 sm:$0xff]   ;;  %v4259_v40 = vld [vmem:[%s5894_s1 + $0x8c] ss:$52 sps:$4 sm:$0xff]  }
  0xcc   :  { %2828 = vmatprep.subr.bf16.mxu0 %v4175_v41  ;;  %2910 = vmatprep.subr.bf16.mxu1 %v4178_v42  ;;  %v4262_v41 = vld [vmem:[%s5894_s1 + $0x94] ss:$52 sps:$4 sm:$0xff]  }
  0xcd   :  { %v4257_v42 = vld [vmem:[%s5894_s1 + $0x88] ss:$52 sps:$4 sm:$0xff]  }
  0xcf   :  { %2829 = vmatpush1.bf16.msra.mxu0 %v4173_v43  ;;  %2911 = vmatpush1.bf16.msra.mxu1 %v4176_v44  ;;  %v4260_v43 = vld [vmem:[%s5894_s1 + $0x90] ss:$52 sps:$4 sm:$0xff]   ;;  %v4265_v44 = vld [vmem:[%s5894_s1 + $0xf4] ss:$52 sps:$4 sm:$0xff]  }
  0xd0   :  { %2830 = vmatprep.subr.bf16.mxu0 %v4181_v46  ;;  %2912 = vmatprep.subr.bf16.mxu1 %v4184_v47  ;;  %v4268_v46 = vld [vmem:[%s5894_s1 + $0xfc] ss:$52 sps:$4 sm:$0xff]  }
  0xd1   :  { %v4263_v47 = vld [vmem:[%s5894_s1 + $0xf0] ss:$52 sps:$4 sm:$0xff]  }
  0xd3   :  { %2831 = vmatpush1.bf16.msra.mxu0 %v4179_v48  ;;  %2913 = vmatpush1.bf16.msra.mxu1 %v4182_v49  ;;  %v4266_v48 = vld [vmem:[%s5894_s1 + $0xf8] ss:$52 sps:$4 sm:$0xff]   ;;  %v4271_v49 = vld [vmem:[%s5894_s1 + $0x15c] ss:$52 sps:$4 sm:$0xff]  }
  0xd4   :  { %2832 = vmatprep.subr.bf16.mxu0 %v4187_v50  ;;  %2914 = vmatprep.subr.bf16.mxu1 %v4190_v52  ;;  %v4274_v50 = vld [vmem:[%s5894_s1 + $0x164] ss:$52 sps:$4 sm:$0xff]  }
  0xd5   :  { %v4269_v52 = vld [vmem:[%s5894_s1 + $0x158] ss:$52 sps:$4 sm:$0xff]  }
  0xd7   :  { %2833 = vmatpush1.bf16.msra.mxu0 %v4185_v53  ;;  %2915 = vmatpush1.bf16.msra.mxu1 %v4188_v54  ;;  %v4272_v53 = vld [vmem:[%s5894_s1 + $0x160] ss:$52 sps:$4 sm:$0xff]   ;;  %v4277_v54 = vld [vmem:[%s5894_s1 + $0x1c4] ss:$52 sps:$4 sm:$0xff]  }
  0xd8   :  { %2834 = vmatprep.subr.bf16.mxu0 %v4193_v55  ;;  %2916 = vmatprep.subr.bf16.mxu1 %v4196_v56  ;;  %v4280_v55 = vld [vmem:[%s5894_s1 + $0x1cc] ss:$52 sps:$4 sm:$0xff]  }
  0xd9   :  { %v4275_v56 = vld [vmem:[%s5894_s1 + $0x1c0] ss:$52 sps:$4 sm:$0xff]  }
  0xdb   :  { %2835 = vmatpush1.bf16.msra.mxu0 %v4191_v57  ;;  %2917 = vmatpush1.bf16.msra.mxu1 %v4194_v59  ;;  %v4278_v57 = vld [vmem:[%s5894_s1 + $0x1c8] ss:$52 sps:$4 sm:$0xff]   ;;  %v4283_v59 = vld [vmem:[%s5894_s1 + $0x22c] ss:$52 sps:$4 sm:$0xff]  }
  0xdc   :  { %2836 = vmatprep.subr.bf16.mxu0 %v4199_v60  ;;  %2918 = vmatprep.subr.bf16.mxu1 %v4202_v61  ;;  %v4286_v60 = vld [vmem:[%s5894_s1 + $0x234] ss:$52 sps:$4 sm:$0xff]  }
  0xdd   :  { %v4281_v61 = vld [vmem:[%s5894_s1 + $0x228] ss:$52 sps:$4 sm:$0xff]  }
  0xdf   :  { %2837 = vmatpush1.bf16.msra.mxu0 %v4197_v62  ;;  %2919 = vmatpush1.bf16.msra.mxu1 %v4200_v63  ;;  %v4284_v62 = vld [vmem:[%s5894_s1 + $0x230] ss:$52 sps:$4 sm:$0xff]   ;;  %v4289_v63 = vld [vmem:[%s5894_s1 + $0x294] ss:$52 sps:$4 sm:$0xff]  }
  0xe0   :  { %2838 = vmatprep.subr.bf16.mxu0 %v4205_v0  ;;  %2920 = vmatprep.subr.bf16.mxu1 %v4208_v1  ;;  %v4292_v0 = vld [vmem:[%s5894_s1 + $0x29c] ss:$52 sps:$4 sm:$0xff]  }
  0xe1   :  { %v4287_v1 = vld [vmem:[%s5894_s1 + $0x290] ss:$52 sps:$4 sm:$0xff]  }
  0xe3   :  { %2839 = vmatpush1.bf16.msra.mxu0 %v4203_v2  ;;  %2921 = vmatpush1.bf16.msra.mxu1 %v4206_v3  ;;  %v4290_v2 = vld [vmem:[%s5894_s1 + $0x298] ss:$52 sps:$4 sm:$0xff]   ;;  %v4295_v3 = vld [vmem:[%s5894_s1 + $0x2fc] ss:$52 sps:$4 sm:$0xff]  }
  0xe4   :  { %2840 = vmatprep.subr.bf16.mxu0 %v4211_v4  ;;  %2922 = vmatprep.subr.bf16.mxu1 %v4214_v5  ;;  %v4298_v4 = vld [vmem:[%s5894_s1 + $0x304] ss:$52 sps:$4 sm:$0xff]  }
  0xe5   :  { %v4293_v5 = vld [vmem:[%s5894_s1 + $0x2f8] ss:$52 sps:$4 sm:$0xff]  }
  0xe7   :  { %2841 = vmatpush1.bf16.msra.mxu0 %v4209_v6  ;;  %2923 = vmatpush1.bf16.msra.mxu1 %v4212_v7  ;;  %v4296_v6 = vld [vmem:[%s5894_s1 + $0x300] ss:$52 sps:$4 sm:$0xff]   ;;  %v4301_v7 = vld [vmem:[%s5894_s1 + $0x364] ss:$52 sps:$4 sm:$0xff]  }
  0xe8   :  { %2842 = vmatprep.subr.bf16.mxu0 %v4217_v8  ;;  %2924 = vmatprep.subr.bf16.mxu1 %v4220_v9  ;;  %v4304_v8 = vld [vmem:[%s5894_s1 + $0x36c] ss:$52 sps:$4 sm:$0xff]  }
  0xe9   :  { %v4299_v9 = vld [vmem:[%s5894_s1 + $0x360] ss:$52 sps:$4 sm:$0xff]  }
  0xeb   :  { %2843 = vmatpush1.bf16.msra.mxu0 %v4215_v10  ;;  %2925 = vmatpush1.bf16.msra.mxu1 %v4218_v11  ;;  %v4302_v10 = vld [vmem:[%s5894_s1 + $0x368] ss:$52 sps:$4 sm:$0xff]   ;;  %v4307_v11 = vld [vmem:[%s5894_s1 + $0x3cc] ss:$52 sps:$4 sm:$0xff]  }
  0xec   :  { %2844 = vmatprep.subr.bf16.mxu0 %v4223_v13  ;;  %2926 = vmatprep.subr.bf16.mxu1 %v4226_v14  ;;  %v4310_v13 = vld [vmem:[%s5894_s1 + $0x3d4] ss:$52 sps:$4 sm:$0xff]  }
  0xed   :  { %v4305_v14 = vld [vmem:[%s5894_s1 + $0x3c8] ss:$52 sps:$4 sm:$0xff]  }
  0xef   :  { %2845 = vmatpush1.bf16.msra.mxu0 %v4221_v15  ;;  %2927 = vmatpush1.bf16.msra.mxu1 %v4224_v17  ;;  %v4308_v15 = vld [vmem:[%s5894_s1 + $0x3d0] ss:$52 sps:$4 sm:$0xff]   ;;  %v4313_v17 = vld [vmem:[%s5894_s1 + $0x434] ss:$52 sps:$4 sm:$0xff]  }
  0xf0   :  { %2846 = vmatprep.subr.bf16.mxu0 %v4229_v18  ;;  %2928 = vmatprep.subr.bf16.mxu1 %v4232_v19  ;;  %v4316_v18 = vld [vmem:[%s5894_s1 + $0x43c] ss:$52 sps:$4 sm:$0xff]  }
  0xf1   :  { %v4311_v19 = vld [vmem:[%s5894_s1 + $0x430] ss:$52 sps:$4 sm:$0xff]  }
  0xf3   :  { %2847 = vmatpush1.bf16.msra.mxu0 %v4227_v20  ;;  %2929 = vmatpush1.bf16.msra.mxu1 %v4230_v22  ;;  %v4314_v20 = vld [vmem:[%s5894_s1 + $0x438] ss:$52 sps:$4 sm:$0xff]   ;;  %v4319_v22 = vld [vmem:[%s5894_s1 + $0x49c] ss:$52 sps:$4 sm:$0xff]  }
  0xf4   :  { %2848 = vmatprep.subr.bf16.mxu0 %v4235_v23  ;;  %2930 = vmatprep.subr.bf16.mxu1 %v4238_v24  ;;  %v4322_v23 = vld [vmem:[%s5894_s1 + $0x4a4] ss:$52 sps:$4 sm:$0xff]  }
  0xf5   :  { %v4317_v24 = vld [vmem:[%s5894_s1 + $0x498] ss:$52 sps:$4 sm:$0xff]  }
  0xf7   :  { %2849 = vmatpush1.bf16.msra.mxu0 %v4233_v25  ;;  %2931 = vmatpush1.bf16.msra.mxu1 %v4236_v26  ;;  %v4320_v25 = vld [vmem:[%s5894_s1 + $0x4a0] ss:$52 sps:$4 sm:$0xff]   ;;  %v4325_v26 = vld [vmem:[%s5894_s1 + $0x504] ss:$52 sps:$4 sm:$0xff]  }
  0xf8   :  { %2850 = vmatprep.subr.bf16.mxu0 %v4241_v27  ;;  %2932 = vmatprep.subr.bf16.mxu1 %v4244_v28  ;;  %v4328_v27 = vld [vmem:[%s5894_s1 + $0x50c] ss:$52 sps:$4 sm:$0xff]  }
  0xf9   :  { %v4323_v28 = vld [vmem:[%s5894_s1 + $0x500] ss:$52 sps:$4 sm:$0xff]  }
  0xfb   :  { %2851 = vmatpush1.bf16.msra.mxu0 %v4239_v29  ;;  %2933 = vmatpush1.bf16.msra.mxu1 %v4242_v30  ;;  %v4326_v29 = vld [vmem:[%s5894_s1 + $0x508] ss:$52 sps:$4 sm:$0xff]   ;;  %v4331_v30 = vld [vmem:[%s5894_s1 + $0x56c] ss:$52 sps:$4 sm:$0xff]  }
  0xfc   :  { %2852 = vmatprep.subr.bf16.mxu0 %v4247_v31  ;;  %2934 = vmatprep.subr.bf16.mxu1 %v4250_v32  ;;  %v4334_v31 = vld [vmem:[%s5894_s1 + $0x574] ss:$52 sps:$4 sm:$0xff]  }
  0xfd   :  { %v4329_v32 = vld [vmem:[%s5894_s1 + $0x568] ss:$52 sps:$4 sm:$0xff]  }
  0xff   :  { %2853 = vmatpush1.bf16.msra.mxu0 %v4245_v33  ;;  %2935 = vmatpush1.bf16.msra.mxu1 %v4248_v34  ;;  %v4332_v33 = vld [vmem:[%s5894_s1 + $0x570] ss:$52 sps:$4 sm:$0xff]   ;;  %v4337_v34 = vld [vmem:[%s5894_s1 + $0x5d4] ss:$52 sps:$4 sm:$0xff]  }
 0x100   :  { %2945 = vmatprep.subr.bf16.mxu0 %v4253_v35  ;;  %3027 = vmatprep.subr.bf16.mxu1 %v4256_v36  ;;  %v4340_v35 = vld [vmem:[%s5894_s1 + $0x5dc] ss:$52 sps:$4 sm:$0xff]  }
 0x101   :  { %v4335_v36 = vld [vmem:[%s5894_s1 + $0x5d0] ss:$52 sps:$4 sm:$0xff]  }
 0x102   :  { %2855 = vmatmul.mubr.bf16.vlgmr.msra.gmra.mrb[4].mxu0 %v4969_v21  ;;  %2937 = vmatmul.mubr.bf16.vlgmr.msra.gmra.mrb[4].mxu1 %v4969_v21 }
 0x103   :  { %2946 = vmatpush1.bf16.msra.mxu0 %v4251_v37  ;;  %3028 = vmatpush1.bf16.msra.mxu1 %v4254_v39  ;;  %v4338_v37 = vld [vmem:[%s5894_s1 + $0x5d8] ss:$52 sps:$4 sm:$0xff]   ;;  %v4343_v39 = vld [vmem:[%s5894_s1 + $0x63c] ss:$52 sps:$4 sm:$0xff]  }
 0x104   :  { %2947 = vmatprep.subr.bf16.mxu0 %v4259_v40  ;;  %3029 = vmatprep.subr.bf16.mxu1 %v4262_v41  ;;  %v4346_v40 = vld [vmem:[%s5894_s1 + $0x644] ss:$52 sps:$4 sm:$0xff]  }
 0x105   :  { %2977 = vmatprep.mubr.bf16.mxu0 %v4709_v58  ;;  %3059 = vmatprep.mubr.bf16.mxu1 %v4709_v58  ;;  %v4341_v41 = vld [vmem:[%s5894_s1 + $0x638] ss:$52 sps:$4 sm:$0xff]  }
 0x107   :  { %2948 = vmatpush1.bf16.msra.mxu0 %v4257_v42  ;;  %3030 = vmatpush1.bf16.msra.mxu1 %v4260_v43  ;;  %v4344_v42 = vld [vmem:[%s5894_s1 + $0x640] ss:$52 sps:$4 sm:$0xff]   ;;  %v4349_v43 = vld [vmem:[%s5894_s1 + $0x6a4] ss:$52 sps:$4 sm:$0xff]  }
 0x108   :  { %2949 = vmatprep.subr.bf16.mxu0 %v4265_v44  ;;  %3031 = vmatprep.subr.bf16.mxu1 %v4268_v46  ;;  %v4352_v44 = vld [vmem:[%s5894_s1 + $0x6ac] ss:$52 sps:$4 sm:$0xff]  }
 0x109   :  { %v4347_v46 = vld [vmem:[%s5894_s1 + $0x6a0] ss:$52 sps:$4 sm:$0xff]  }
 0x10b   :  { %2950 = vmatpush1.bf16.msra.mxu0 %v4263_v47  ;;  %3032 = vmatpush1.bf16.msra.mxu1 %v4266_v48  ;;  %v4350_v47 = vld [vmem:[%s5894_s1 + $0x6a8] ss:$52 sps:$4 sm:$0xff]   ;;  %v4355_v48 = vld [vmem:[%s5894_s1 + $0x70c] ss:$52 sps:$4 sm:$0xff]  }
 0x10c   :  { %2951 = vmatprep.subr.bf16.mxu0 %v4271_v49  ;;  %3033 = vmatprep.subr.bf16.mxu1 %v4274_v50  ;;  %v4358_v49 = vld [vmem:[%s5894_s1 + $0x714] ss:$52 sps:$4 sm:$0xff]  }
 0x10d   :  { %v4353_v50 = vld [vmem:[%s5894_s1 + $0x708] ss:$52 sps:$4 sm:$0xff]  }
 0x10f   :  { %2952 = vmatpush1.bf16.msra.mxu0 %v4269_v52  ;;  %3034 = vmatpush1.bf16.msra.mxu1 %v4272_v53  ;;  %v4356_v52 = vld [vmem:[%s5894_s1 + $0x710] ss:$52 sps:$4 sm:$0xff]   ;;  %v4361_v53 = vld [vmem:[%s5894_s1 + $0x774] ss:$52 sps:$4 sm:$0xff]  }
 0x110   :  { %2953 = vmatprep.subr.bf16.mxu0 %v4277_v54  ;;  %3035 = vmatprep.subr.bf16.mxu1 %v4280_v55  ;;  %v4364_v54 = vld [vmem:[%s5894_s1 + $0x77c] ss:$52 sps:$4 sm:$0xff]  }
 0x111   :  { %v4359_v55 = vld [vmem:[%s5894_s1 + $0x770] ss:$52 sps:$4 sm:$0xff]  }
 0x113   :  { %2954 = vmatpush1.bf16.msra.mxu0 %v4275_v56  ;;  %3036 = vmatpush1.bf16.msra.mxu1 %v4278_v57  ;;  %v4362_v56 = vld [vmem:[%s5894_s1 + $0x778] ss:$52 sps:$4 sm:$0xff]   ;;  %v4367_v57 = vld [vmem:[%s5894_s1 + $0x7dc] ss:$52 sps:$4 sm:$0xff]  }
 0x114   :  { %2955 = vmatprep.subr.bf16.mxu0 %v4283_v59  ;;  %3037 = vmatprep.subr.bf16.mxu1 %v4286_v60  ;;  %v4370_v59 = vld [vmem:[%s5894_s1 + $0x7e4] ss:$52 sps:$4 sm:$0xff]  }
 0x115   :  { %v4365_v60 = vld [vmem:[%s5894_s1 + $0x7d8] ss:$52 sps:$4 sm:$0xff]  }
 0x117   :  { %2956 = vmatpush1.bf16.msra.mxu0 %v4281_v61  ;;  %3038 = vmatpush1.bf16.msra.mxu1 %v4284_v62  ;;  %v4368_v61 = vld [vmem:[%s5894_s1 + $0x7e0] ss:$52 sps:$4 sm:$0xff]   ;;  %v4373_v62 = vld [vmem:[%s5894_s1 + $0x844] ss:$52 sps:$4 sm:$0xff]  }
 0x118   :  { %2957 = vmatprep.subr.bf16.mxu0 %v4289_v63  ;;  %3039 = vmatprep.subr.bf16.mxu1 %v4292_v0  ;;  %v4376_v63 = vld [vmem:[%s5894_s1 + $0x84c] ss:$52 sps:$4 sm:$0xff]   ;;  %v474_v0 = vsub.s32 0, %v4676_v45  ;;  %v4382_v45 = vld [vmem:[%s5894_s1 + $0x8b4] ss:$52 sps:$4 sm:$0xff]  }
 0x11b   :  { %2958 = vmatpush1.bf16.msra.mxu0 %v4287_v1  ;;  %3040 = vmatpush1.bf16.msra.mxu1 %v4290_v2  ;;  %v4371_v1 = vld [vmem:[%s5894_s1 + $0x840] ss:$52 sps:$4 sm:$0xff]   ;;  %v4374_v2 = vld [vmem:[%s5894_s1 + $0x848] ss:$52 sps:$4 sm:$0xff]  }
 0x11c   :  { %2959 = vmatprep.subr.bf16.mxu0 %v4295_v3  ;;  %3041 = vmatprep.subr.bf16.mxu1 %v4298_v4  ;;  %v470_v3 = vpop.permute.xlu0 %469  ;;  %v4379_v4 = vld [vmem:[%s5894_s1 + $0x8ac] ss:$52 sps:$4 sm:$0xff]  }
 0x11f   :  { %2960 = vmatpush1.bf16.msra.mxu0 %v4293_v5  ;;  %3042 = vmatpush1.bf16.msra.mxu1 %v4296_v6  ;;  %v5624_v5 = vrot.slane %v470_v3, %v474_v0  ;;  %v4377_v6 = vld [vmem:[%s5894_s1 + $0x8a8] ss:$52 sps:$4 sm:$0xff]   ;;  %v4421_v3 = vld [vmem:[%s5894_s1 + $0xb84] ss:$52 sps:$4 sm:$0xff]  }
 0x120   :  { %2961 = vmatprep.subr.bf16.mxu0 %v4301_v7  ;;  %3043 = vmatprep.subr.bf16.mxu1 %v4304_v8  ;;  %v4380_v7 = vld [vmem:[%s5894_s1 + $0x8b0] ss:$52 sps:$4 sm:$0xff]   ;;  %v4385_v8 = vld [vmem:[%s5894_s1 + $0x914] ss:$52 sps:$4 sm:$0xff]  }
 0x123   :  { %2962 = vmatpush1.bf16.msra.mxu0 %v4299_v9  ;;  %3044 = vmatpush1.bf16.msra.mxu1 %v4302_v10  ;;  %v4388_v9 = vld [vmem:[%s5894_s1 + $0x91c] ss:$52 sps:$4 sm:$0xff]  }
 0x124   :  { %2963 = vmatprep.subr.bf16.mxu0 %v4307_v11  ;;  %3045 = vmatprep.subr.bf16.mxu1 %v4310_v13 }
 0x127   :  { %2964 = vmatpush1.bf16.msra.mxu0 %v4305_v14  ;;  %3046 = vmatpush1.bf16.msra.mxu1 %v4308_v15 }
 0x128   :  { %2965 = vmatprep.subr.bf16.mxu0 %v4313_v17  ;;  %3047 = vmatprep.subr.bf16.mxu1 %v4316_v18  ;;  %v4383_v18 = vld [vmem:[%s5894_s1 + $0x910] ss:$52 sps:$4 sm:$0xff]  }
 0x12b   :  { %2966 = vmatpush1.bf16.msra.mxu0 %v4311_v19  ;;  %3048 = vmatpush1.bf16.msra.mxu1 %v4314_v20 }
 0x12c   :  { %2967 = vmatprep.subr.bf16.mxu0 %v4319_v22  ;;  %3049 = vmatprep.subr.bf16.mxu1 %v4322_v23 }
 0x12f   :  { %2968 = vmatpush1.bf16.msra.mxu0 %v4317_v24  ;;  %3050 = vmatpush1.bf16.msra.mxu1 %v4320_v25  ;;  %v4386_v24 = vld [vmem:[%s5894_s1 + $0x918] ss:$52 sps:$4 sm:$0xff]   ;;  %v4391_v25 = vld [vmem:[%s5894_s1 + $0x97c] ss:$52 sps:$4 sm:$0xff]  }
 0x130   :  { %2969 = vmatprep.subr.bf16.mxu0 %v4325_v26  ;;  %3051 = vmatprep.subr.bf16.mxu1 %v4328_v27 }
 0x133   :  { %2970 = vmatpush1.bf16.msra.mxu0 %v4323_v28  ;;  %3052 = vmatpush1.bf16.msra.mxu1 %v4326_v29 }
 0x134   :  { %2971 = vmatprep.subr.bf16.mxu0 %v4331_v30  ;;  %3053 = vmatprep.subr.bf16.mxu1 %v4334_v31  ;;  %v4394_v30 = vld [vmem:[%s5894_s1 + $0x984] ss:$52 sps:$4 sm:$0xff]  }
 0x137   :  { %2972 = vmatpush1.bf16.msra.mxu0 %v4329_v32  ;;  %3054 = vmatpush1.bf16.msra.mxu1 %v4332_v33 }
 0x138   :  { %2973 = vmatprep.subr.bf16.mxu0 %v4337_v34  ;;  %3055 = vmatprep.subr.bf16.mxu1 %v4340_v35  ;;  %v4389_v35 = vld [vmem:[%s5894_s1 + $0x978] ss:$52 sps:$4 sm:$0xff]  }
 0x13b   :  { %2974 = vmatpush1.bf16.msra.mxu0 %v4335_v36  ;;  %3056 = vmatpush1.bf16.msra.mxu1 %v4338_v37 }
 0x13c   :  { %2975 = vmatprep.subr.bf16.mxu0 %v4343_v39  ;;  %3057 = vmatprep.subr.bf16.mxu1 %v4346_v40  ;;  %v4392_v39 = vld [vmem:[%s5894_s1 + $0x980] ss:$52 sps:$4 sm:$0xff]   ;;  %v4397_v40 = vld [vmem:[%s5894_s1 + $0x9e4] ss:$52 sps:$4 sm:$0xff]  }
 0x13f   :  { %2976 = vmatpush1.bf16.msra.mxu0 %v4341_v41  ;;  %3058 = vmatpush1.bf16.msra.mxu1 %v4344_v42  ;;  %v4400_v41 = vld [vmem:[%s5894_s1 + $0x9ec] ss:$52 sps:$4 sm:$0xff]  }
 0x140   :  { %2986 = vmatprep.subr.bf16.mxu0 %v4349_v43  ;;  %3068 = vmatprep.subr.bf16.mxu1 %v4352_v44  ;;  %v4395_v42 = vld [vmem:[%s5894_s1 + $0x9e0] ss:$52 sps:$4 sm:$0xff]   ;;  %v4398_v43 = vld [vmem:[%s5894_s1 + $0x9e8] ss:$52 sps:$4 sm:$0xff]  }
 0x141   :  { %v4403_v44 = vld [vmem:[%s5894_s1 + $0xa4c] ss:$52 sps:$4 sm:$0xff]  }
 0x142   :  { %2978 = vmatmul.mubr.bf16.vlgmr.msra.gmra.mrb[8].mxu0 %v4765_v12  ;;  %3060 = vmatmul.mubr.bf16.vlgmr.msra.gmra.mrb[8].mxu1 %v4765_v12 }
 0x143   :  { %2987 = vmatpush1.bf16.msra.mxu0 %v4347_v46  ;;  %3069 = vmatpush1.bf16.msra.mxu1 %v4350_v47  ;;  %v4406_v46 = vld [vmem:[%s5894_s1 + $0xa54] ss:$52 sps:$4 sm:$0xff]  }
 0x144   :  { %2988 = vmatprep.subr.bf16.mxu0 %v4355_v48  ;;  %3070 = vmatprep.subr.bf16.mxu1 %v4358_v49  ;;  %v4401_v47 = vld [vmem:[%s5894_s1 + $0xa48] ss:$52 sps:$4 sm:$0xff]   ;;  %v4404_v48 = vld [vmem:[%s5894_s1 + $0xa50] ss:$52 sps:$4 sm:$0xff]  }
 0x145   :  { %3018 = vmatprep.mubr.bf16.mxu0 %v4778_v16  ;;  %3100 = vmatprep.mubr.bf16.mxu1 %v4778_v16  ;;  %v4409_v49 = vld [vmem:[%s5894_s1 + $0xab4] ss:$52 sps:$4 sm:$0xff]  }
 0x147   :  { %2989 = vmatpush1.bf16.msra.mxu0 %v4353_v50  ;;  %3071 = vmatpush1.bf16.msra.mxu1 %v4356_v52  ;;  %v4412_v50 = vld [vmem:[%s5894_s1 + $0xabc] ss:$52 sps:$4 sm:$0xff]  }
 0x148   :  { %2990 = vmatprep.subr.bf16.mxu0 %v4361_v53  ;;  %3072 = vmatprep.subr.bf16.mxu1 %v4364_v54 }
 0x14b   :  { %2991 = vmatpush1.bf16.msra.mxu0 %v4359_v55  ;;  %3073 = vmatpush1.bf16.msra.mxu1 %v4362_v56  ;;  %v4407_v55 = vld [vmem:[%s5894_s1 + $0xab0] ss:$52 sps:$4 sm:$0xff]   ;;  %v4410_v56 = vld [vmem:[%s5894_s1 + $0xab8] ss:$52 sps:$4 sm:$0xff]  }
 0x14c   :  { %2992 = vmatprep.subr.bf16.mxu0 %v4367_v57  ;;  %3074 = vmatprep.subr.bf16.mxu1 %v4370_v59 }
 0x14f   :  { %2993 = vmatpush1.bf16.msra.mxu0 %v4365_v60  ;;  %3075 = vmatpush1.bf16.msra.mxu1 %v4368_v61  ;;  %v4415_v60 = vld [vmem:[%s5894_s1 + $0xb1c] ss:$52 sps:$4 sm:$0xff]   ;;  %v4418_v61 = vld [vmem:[%s5894_s1 + $0xb24] ss:$52 sps:$4 sm:$0xff]  }
 0x150   :  { %2994 = vmatprep.subr.bf16.mxu0 %v4373_v62  ;;  %3076 = vmatprep.subr.bf16.mxu1 %v4376_v63 }
 0x153   :  { %2995 = vmatpush1.bf16.msra.mxu0 %v4371_v1  ;;  %3077 = vmatpush1.bf16.msra.mxu1 %v4374_v2  ;;  %v4413_v1 = vld [vmem:[%s5894_s1 + $0xb18] ss:$52 sps:$4 sm:$0xff]   ;;  %v4416_v2 = vld [vmem:[%s5894_s1 + $0xb20] ss:$52 sps:$4 sm:$0xff]  }
 0x154   :  { %2996 = vmatprep.subr.bf16.mxu0 %v4379_v4  ;;  %3078 = vmatprep.subr.bf16.mxu1 %v4382_v45  ;;  %v4424_v4 = vld [vmem:[%s5894_s1 + $0xb8c] ss:$52 sps:$4 sm:$0xff]  }
 0x155   :  { %v2692_v10 = vpop.f32.mrb[0].mxu0  ;;  %v2774_v11 = vpop.f32.mrb[0].mxu1  ;;  %v4419_v45 = vld [vmem:[%s5894_s1 + $0xb80] ss:$52 sps:$4 sm:$0xff]  }
 0x156   :  { %v3828_v13 = vadd.f32 %v2692_v10, %v5624_v5  ;;  %v3830_v14 = vadd.f32 %v2774_v11, %v5624_v5  ;;  %v2694_v15 = vpop.f32.mrb[1].mxu0  ;;  %v2776_v17 = vpop.f32.mrb[1].mxu1  ;;  %v4425_v10 = vld [vmem:[%s5894_s1 + $0xbe8] ss:$52 sps:$4 sm:$0xff]   ;;  %v4428_v11 = vld [vmem:[%s5894_s1 + $0xbf0] ss:$52 sps:$4 sm:$0xff]  }
 0x157   :  { %v3829_v19 = vadd.f32 %v2694_v15, %v5624_v5  ;;  %v3831_v20 = vadd.f32 %v2776_v17, %v5624_v5  ;;  %v2696_v22 = vpop.f32.mrb[2].mxu0  ;;  %v2778_v23 = vpop.f32.mrb[2].mxu1  ;;  %2997 = vmatpush1.bf16.msra.mxu0 %v4377_v6  ;;  %3079 = vmatpush1.bf16.msra.mxu1 %v4380_v7  ;;  %v4422_v6 = vld [vmem:[%s5894_s1 + $0xb88] ss:$52 sps:$4 sm:$0xff]   ;;  %v4427_v7 = vld [vmem:[%s5894_s1 + $0xbec] ss:$52 sps:$4 sm:$0xff]  }
 0x158   :  { %v3189_v26 = vsub.f32 0.0, %v3828_v13  ;;  %v3191_v27 = vsub.f32 0.0, %v3830_v14  ;;  %v2697_v28 = vpop.f32.mrb[3].mxu0  ;;  %v2779_v29 = vpop.f32.mrb[3].mxu1  ;;  %2998 = vmatprep.subr.bf16.mxu0 %v4385_v8  ;;  %3080 = vmatprep.subr.bf16.mxu1 %v4388_v9  ;;  %v4430_v8 = vld [vmem:[%s5894_s1 + $0xbf4] ss:$52 sps:$4 sm:$0xff]  }
 0x159   :  { %v3190_v31 = vsub.f32 0.0, %v3829_v19  ;;  %v3192_v32 = vsub.f32 0.0, %v3831_v20  ;;  %v4433_v14 = vld [vmem:[%s5894_s1 + $0xc54] ss:$52 sps:$4 sm:$0xff]   ;;  %v4436_v15 = vld [vmem:[%s5894_s1 + $0xc5c] ss:$52 sps:$4 sm:$0xff]  }
 0x15a   :  { %v3202_v33 = vmul.f32 1.442695, %v3189_v26  ;;  %v3206_v34 = vmul.f32 1.442695, %v3191_v27  ;;  %v4431_v22 = vld [vmem:[%s5894_s1 + $0xc50] ss:$52 sps:$4 sm:$0xff]  }
 0x15b   :  { %v3204_v36 = vmul.f32 1.442695, %v3190_v31  ;;  %v3208_v37 = vmul.f32 1.442695, %v3192_v32  ;;  %2999 = vmatpush1.bf16.msra.mxu0 %v4383_v18  ;;  %3081 = vmatpush1.bf16.msra.mxu1 %v4386_v24  ;;  %v4434_v23 = vld [vmem:[%s5894_s1 + $0xc58] ss:$52 sps:$4 sm:$0xff]  }
 0x15c   :  { %4475 = vpow2.f32 %v3202_v33  ;;  %3000 = vmatprep.subr.bf16.mxu0 %v4391_v25  ;;  %3082 = vmatprep.subr.bf16.mxu1 %v4394_v30  ;;  %v4439_v25 = vld [vmem:[%s5894_s1 + $0xcbc] ss:$52 sps:$4 sm:$0xff]   ;;  %v4442_v26 = vld [vmem:[%s5894_s1 + $0xcc4] ss:$52 sps:$4 sm:$0xff]   ;;  %v4440_v30 = vld [vmem:[%s5894_s1 + $0xcc0] ss:$52 sps:$4 sm:$0xff]  }
 0x15d   :  { %4477 = vpow2.f32 %v3206_v34  ;;  %v4437_v29 = vld [vmem:[%s5894_s1 + $0xcb8] ss:$52 sps:$4 sm:$0xff]   ;;  %v4443_v31 = vld [vmem:[%s5894_s1 + $0x370] ss:$52 sps:$4 sm:$0xff]  }
 0x15e   :  { %4479 = vpow2.f32 %v3204_v36  ;;  %v4444_v32 = vld [vmem:[%s5894_s1 + $0x9f0] ss:$52 sps:$4 sm:$0xff]   ;;  %v4448_v36 = vld [vmem:[%s5894_s1 + $0xa58] ss:$52 sps:$4 sm:$0xff]  }
 0x15f   :  { %4481 = vpow2.f32 %v3208_v37  ;;  %3001 = vmatpush1.bf16.msra.mxu0 %v4389_v35  ;;  %3083 = vmatpush1.bf16.msra.mxu1 %v4392_v39  ;;  %v4445_v33 = vld [vmem:[%s5894_s1 + $0x30] ss:$52 sps:$4 sm:$0xff]   ;;  %v4447_v35 = vld [vmem:[%s5894_s1 + $0x3d8] ss:$52 sps:$4 sm:$0xff]  }
 0x160   :  { %3002 = vmatprep.subr.bf16.mxu0 %v4397_v40  ;;  %3084 = vmatprep.subr.bf16.mxu1 %v4400_v41  ;;  %v4446_v34 = vld [vmem:[%s5894_s1 + $0x6b0] ss:$52 sps:$4 sm:$0xff]   ;;  %v4449_v37 = vld [vmem:[%s5894_s1 + $0x98] ss:$52 sps:$4 sm:$0xff]   ;;  %v4451_v40 = vld [vmem:[%s5894_s1 + $0x440] ss:$52 sps:$4 sm:$0xff]  }
 0x161   :  { %v4450_v39 = vld [vmem:[%s5894_s1 + $0x718] ss:$52 sps:$4 sm:$0xff]   ;;  %v4452_v41 = vld [vmem:[%s5894_s1 + $0xac0] ss:$52 sps:$4 sm:$0xff]  }
 0x163   :  { %3003 = vmatpush1.bf16.msra.mxu0 %v4395_v42  ;;  %3085 = vmatpush1.bf16.msra.mxu1 %v4398_v43  ;;  %v4453_v42 = vld [vmem:[%s5894_s1 + $0x100] ss:$52 sps:$4 sm:$0xff]  }
 0x164   :  { %3004 = vmatprep.subr.bf16.mxu0 %v4403_v44  ;;  %3086 = vmatprep.subr.bf16.mxu1 %v4406_v46  ;;  %v4454_v43 = vld [vmem:[%s5894_s1 + $0x780] ss:$52 sps:$4 sm:$0xff]   ;;  %v4455_v44 = vld [vmem:[%s5894_s1 + $0x4a8] ss:$52 sps:$4 sm:$0xff]  }
 0x165   :  { %v4458_v46 = vld [vmem:[%s5894_s1 + $0x7e8] ss:$52 sps:$4 sm:$0xff]  }
 0x166   :  { %v4476_v52 = vpop.eup %4475 }
 0x167   :  { %v4478_v53 = vpop.eup %4477  ;;  %v3228_v54 = vadd.f32 1.0, %v4476_v52  ;;  %3005 = vmatpush1.bf16.msra.mxu0 %v4401_v47  ;;  %3087 = vmatpush1.bf16.msra.mxu1 %v4404_v48  ;;  %v4459_v47 = vld [vmem:[%s5894_s1 + $0x510] ss:$52 sps:$4 sm:$0xff]   ;;  %v4463_v52 = vld [vmem:[%s5894_s1 + $0x578] ss:$52 sps:$4 sm:$0xff]  }
 0x168   :  { %v4480_v57 = vpop.eup %4479  ;;  %v3230_v59 = vadd.f32 1.0, %v4478_v53  ;;  %3006 = vmatprep.subr.bf16.mxu0 %v4409_v49  ;;  %3088 = vmatprep.subr.bf16.mxu1 %v4412_v50  ;;  %v4460_v48 = vld [vmem:[%s5894_s1 + $0xb90] ss:$52 sps:$4 sm:$0xff]   ;;  %v4464_v53 = vld [vmem:[%s5894_s1 + $0xbf8] ss:$52 sps:$4 sm:$0xff]  }
 0x169   :  { %v4482_v62 = vpop.eup %4481  ;;  %4483 = vrcp.f32 %v3228_v54  ;;  %v3229_v63 = vadd.f32 1.0, %v4480_v57  ;;  %v4461_v49 = vld [vmem:[%s5894_s1 + $0x1d0] ss:$52 sps:$4 sm:$0xff]   ;;  %v4465_v54 = vld [vmem:[%s5894_s1 + $0x238] ss:$52 sps:$4 sm:$0xff]  }
 0x16a   :  { %4485 = vrcp.f32 %v3230_v59  ;;  %v3231_v0 = vadd.f32 1.0, %v4482_v62  ;;  %v4462_v50 = vld [vmem:[%s5894_s1 + $0x850] ss:$52 sps:$4 sm:$0xff]   ;;  %v4468_v57 = vld [vmem:[%s5894_s1 + $0xc60] ss:$52 sps:$4 sm:$0xff]  }
 0x16b   :  { %4487 = vrcp.f32 %v3229_v63  ;;  %3007 = vmatpush1.bf16.msra.mxu0 %v4407_v55  ;;  %3089 = vmatpush1.bf16.msra.mxu1 %v4410_v56  ;;  %v4466_v55 = vld [vmem:[%s5894_s1 + $0x8b8] ss:$52 sps:$4 sm:$0xff]   ;;  %v4467_v56 = vld [vmem:[%s5894_s1 + $0x5e0] ss:$52 sps:$4 sm:$0xff]   ;;  %v4472_v62 = vld [vmem:[%s5894_s1 + $0xcc8] ss:$52 sps:$4 sm:$0xff]  }
 0x16c   :  { %4489 = vrcp.f32 %v3231_v0  ;;  %3008 = vmatprep.subr.bf16.mxu0 %v4415_v60  ;;  %3090 = vmatprep.subr.bf16.mxu1 %v4418_v61  ;;  %v4469_v59 = vld [vmem:[%s5894_s1 + $0x2a0] ss:$52 sps:$4 sm:$0xff]   ;;  %v4471_v61 = vld [vmem:[%s5894_s1 + $0x648] ss:$52 sps:$4 sm:$0xff]  }
 0x16d   :  { %v4470_v60 = vld [vmem:[%s5894_s1 + $0x920] ss:$52 sps:$4 sm:$0xff]   ;;  %v4473_v63 = vld [vmem:[%s5894_s1 + $0x308] ss:$52 sps:$4 sm:$0xff]  }
 0x16e   :  { %v4474_v0 = vld [vmem:[%s5894_s1 + $0x988] ss:$52 sps:$4 sm:$0xff]  }
 0x16f   :  { %3009 = vmatpush1.bf16.msra.mxu0 %v4413_v1  ;;  %3091 = vmatpush1.bf16.msra.mxu1 %v4416_v2 }
 0x170   :  { %3010 = vmatprep.subr.bf16.mxu0 %v4421_v3  ;;  %3092 = vmatprep.subr.bf16.mxu1 %v4424_v4 }
 0x173   :  { %v4484_v9 = vpop.eup %4483  ;;  %3011 = vmatpush1.bf16.msra.mxu0 %v4419_v45  ;;  %3093 = vmatpush1.bf16.msra.mxu1 %v4422_v6 }
 0x174   :  { %v4486_v13 = vpop.eup %4485  ;;  %3012 = vmatprep.subr.bf16.mxu0 %v4427_v7  ;;  %3094 = vmatprep.subr.bf16.mxu1 %v4430_v8 }
 0x175   :  { %v4488_v17 = vpop.eup %4487 }
 0x176   :  { %v4490_v18 = vpop.eup %4489  ;;  %v3267_v19 = vcombine.low %v4484_v9, %v4488_v17 }
 0x177   :  { %v3268_v20 = vcombine.low %v4486_v13, %v4490_v18  ;;  %3013 = vmatpush1.bf16.msra.mxu0 %v4425_v10  ;;  %3095 = vmatpush1.bf16.msra.mxu1 %v4428_v11 }
 0x178   :  { %v5745_v24 = vrot.slane %v3267_v19, %v4691_v51  ;;  %3014 = vmatprep.subr.bf16.mxu0 %v4433_v14  ;;  %3096 = vmatprep.subr.bf16.mxu1 %v4436_v15 }
 0x179   :  { %v5754_v27 = vrot.slane %v3268_v20, %v4691_v51 }
 0x17b   :  { %v3299_v28 = vcombine.low %v5745_v24, %v5754_v27  ;;  %3015 = vmatpush1.bf16.msra.mxu0 %v4431_v22  ;;  %3097 = vmatpush1.bf16.msra.mxu1 %v4434_v23 }
 0x17c   :  { %3016 = vmatprep.subr.bf16.mxu0 %v4439_v25  ;;  %3098 = vmatprep.subr.bf16.mxu1 %v4442_v26 }
 0x17f   :  { %3017 = vmatpush1.bf16.msra.mxu0 %v4437_v29  ;;  %3099 = vmatpush1.bf16.msra.mxu1 %v4440_v30 }
 0x180   :  { %3784 = vmatprep.subr.bf16.mxu0 %v4443_v31  ;;  %3806 = vmatprep.subr.bf16.mxu1 %v4444_v32 }
 0x182   :  { %3019 = vmatmul.mubr.bf16.vlgmr.msra.gmra.mrb[8].mxu0 %v4969_v21  ;;  %3101 = vmatmul.mubr.bf16.vlgmr.msra.gmra.mrb[8].mxu1 %v4969_v21 }
 0x183   :  { %3785 = vmatpush3.bf16.msra.mxu0 %v4445_v33  ;;  %3807 = vmatpush3.bf16.msra.mxu1 %v4446_v34 }
 0x184   :  { %3786 = vmatprep.subr.bf16.mxu0 %v4447_v35  ;;  %3808 = vmatprep.subr.bf16.mxu1 %v4448_v36 }
 0x185   :  { %3141 = vmatprep.mubr.bf16.mxu0 %v4709_v58  ;;  %3181 = vmatprep.mubr.bf16.mxu1 %v4778_v16  ;;  %v4456_v58 = vld [vmem:[%s5894_s1 + $0xb28] ss:$52 sps:$4 sm:$0xff]  }
 0x186   :  { %v4457_v16 = vld [vmem:[%s5894_s1 + $0x168] ss:$52 sps:$4 sm:$0xff]  }
 0x187   :  { %3787 = vmatpush3.bf16.msra.mxu0 %v4449_v37  ;;  %3809 = vmatpush3.bf16.msra.mxu1 %v4450_v39 }
 0x188   :  { %3788 = vmatprep.subr.bf16.mxu0 %v4451_v40  ;;  %3810 = vmatprep.subr.bf16.mxu1 %v4452_v41 }
 0x18b   :  { %3789 = vmatpush3.bf16.msra.mxu0 %v4453_v42  ;;  %3811 = vmatpush3.bf16.msra.mxu1 %v4454_v43  ;;  %v3307_v43 = vrot.slane %v3299_v28, %v4691_v51 }
 0x18c   :  { %3790 = vmatprep.subr.bf16.mxu0 %v4455_v44  ;;  %3812 = vmatprep.subr.bf16.mxu1 %v4456_v58 }
 0x18f   :  { %3791 = vmatpush3.bf16.msra.mxu0 %v4457_v16  ;;  %3813 = vmatpush3.bf16.msra.mxu1 %v4458_v46 }
 0x190   :  { %3792 = vmatprep.subr.bf16.mxu0 %v4459_v47  ;;  %3814 = vmatprep.subr.bf16.mxu1 %v4460_v48 }
 0x193   :  { %3793 = vmatpush3.bf16.msra.mxu0 %v4461_v49  ;;  %3815 = vmatpush3.bf16.msra.mxu1 %v4462_v50 }
 0x194   :  { %3794 = vmatprep.subr.bf16.mxu0 %v4463_v52  ;;  %3816 = vmatprep.subr.bf16.mxu1 %v4464_v53 }
 0x197   :  { %3795 = vmatpush3.bf16.msra.mxu0 %v4465_v54  ;;  %3817 = vmatpush3.bf16.msra.mxu1 %v4466_v55 }
 0x198   :  { %3796 = vmatprep.subr.bf16.mxu0 %v4467_v56  ;;  %3818 = vmatprep.subr.bf16.mxu1 %v4468_v57 }
 0x19b   :  { %3797 = vmatpush3.bf16.msra.mxu0 %v4469_v59  ;;  %3819 = vmatpush3.bf16.msra.mxu1 %v4470_v60 }
 0x19c   :  { %3798 = vmatprep.subr.bf16.mxu0 %v4471_v61  ;;  %3820 = vmatprep.subr.bf16.mxu1 %v4472_v62 }
 0x19f   :  { %3799 = vmatpush3.bf16.msra.mxu0 %v4473_v63  ;;  %3821 = vmatpush3.bf16.msra.mxu1 %v4474_v0 }
 0x1a2   :  { %3142 = vmatmul.mubr.bf16.vlgmr.msra.gmra.mrb[12].mxu0 %v4765_v12  ;;  %3182 = vmatmul.mubr.bf16.vlgmr.msra.gmra.mrb[12].mxu1 %v4969_v21 }
 0x1d5   :  { %v2856_v1 = vpop.f32.mrb[4].mxu0  ;;  %v2938_v2 = vpop.f32.mrb[4].mxu1 }
 0x1d6   :  { %v3832_v3 = vadd.f32 %v2856_v1, %v5624_v5  ;;  %v3834_v4 = vadd.f32 %v2938_v2, %v5624_v5  ;;  %v2858_v45 = vpop.f32.mrb[5].mxu0  ;;  %v2940_v6 = vpop.f32.mrb[5].mxu1 }
 0x1d7   :  { %v3833_v7 = vadd.f32 %v2858_v45, %v5624_v5  ;;  %v3835_v8 = vadd.f32 %v2940_v6, %v5624_v5  ;;  %v2860_v9 = vpop.f32.mrb[6].mxu0  ;;  %v2942_v10 = vpop.f32.mrb[6].mxu1 }
 0x1d8   :  { %v3193_v11 = vsub.f32 0.0, %v3832_v3  ;;  %v3195_v13 = vsub.f32 0.0, %v3834_v4  ;;  %v2861_v14 = vpop.f32.mrb[7].mxu0  ;;  %v2943_v12 = vpop.f32.mrb[7].mxu1 }
 0x1d9   :  { %v3194_v15 = vsub.f32 0.0, %v3833_v7  ;;  %v3196_v21 = vsub.f32 0.0, %v3835_v8 }
 0x1da   :  { %v3210_v17 = vmul.f32 1.442695, %v3193_v11  ;;  %v3214_v18 = vmul.f32 1.442695, %v3195_v13 }
 0x1db   :  { %v3212_v19 = vmul.f32 1.442695, %v3194_v15  ;;  %v3216_v20 = vmul.f32 1.442695, %v3196_v21 }
 0x1dc   :  { %4491 = vpow2.f32 %v3210_v17 }
 0x1dd   :  { %4493 = vpow2.f32 %v3214_v18 }
 0x1de   :  { %4495 = vpow2.f32 %v3212_v19 }
 0x1df   :  { %4497 = vpow2.f32 %v3216_v20 }
 0x1e6   :  { %v4492_v22 = vpop.eup %4491 }
 0x1e7   :  { %v4494_v23 = vpop.eup %4493  ;;  %v3232_v25 = vadd.f32 1.0, %v4492_v22 }
 0x1e8   :  { %v4496_v26 = vpop.eup %4495  ;;  %v3234_v29 = vadd.f32 1.0, %v4494_v23 }
 0x1e9   :  { %v4498_v30 = vpop.eup %4497  ;;  %4499 = vrcp.f32 %v3232_v25  ;;  %v3233_v31 = vadd.f32 1.0, %v4496_v26 }
 0x1ea   :  { %4501 = vrcp.f32 %v3234_v29  ;;  %v3235_v32 = vadd.f32 1.0, %v4498_v30 }
 0x1eb   :  { %4503 = vrcp.f32 %v3233_v31 }
 0x1ec   :  { %4505 = vrcp.f32 %v3235_v32 }
 0x1f3   :  { %v4500_v33 = vpop.eup %4499 }
 0x1f4   :  { %v4502_v34 = vpop.eup %4501 }
 0x1f5   :  { %v4504_v35 = vpop.eup %4503 }
 0x1f6   :  { %v4506_v36 = vpop.eup %4505  ;;  %v3269_v37 = vcombine.low %v4500_v33, %v4504_v35 }
 0x1f7   :  { %v3270_v39 = vcombine.low %v4502_v34, %v4506_v36 }
 0x1f8   :  { %v3291_v40 = vrot.slane %v3269_v37, %v4691_v51 }
 0x1f9   :  { %v3298_v41 = vrot.slane %v3270_v39, %v4691_v51 }
 0x1fb   :  { %v3300_v42 = vcombine.low %v3291_v40, %v3298_v41 }
 0x1fd   :  { %v3314_v44 = vrot.slane %v3300_v42, %v4691_v51 }
 0x1ff   :  { %v3315_v58 = vcombine.low %v3307_v43, %v3314_v44 }
 0x201   :  { %3357 = vst [vmem:[%s5897_s3] sm:$0xff] %v3315_v58 }
 0x255   :  { %v3020_v16 = vpop.f32.mrb[8].mxu0  ;;  %v3102_v46 = vpop.f32.mrb[8].mxu1 }
 0x256   :  { %v3836_v47 = vadd.f32 %v3020_v16, %v5624_v5  ;;  %v3838_v48 = vadd.f32 %v3102_v46, %v5624_v5  ;;  %v3022_v49 = vpop.f32.mrb[9].mxu0  ;;  %v3104_v50 = vpop.f32.mrb[9].mxu1 }
 0x257   :  { %v3837_v52 = vadd.f32 %v3022_v49, %v5624_v5  ;;  %v3839_v24 = vadd.f32 %v3104_v50, %v5624_v5  ;;  %v3024_v27 = vpop.f32.mrb[10].mxu0  ;;  %v3106_v28 = vpop.f32.mrb[10].mxu1 }
 0x258   :  { %v3197_v53 = vsub.f32 0.0, %v3836_v47  ;;  %v3199_v54 = vsub.f32 0.0, %v3838_v48  ;;  %v3025_v55 = vpop.f32.mrb[11].mxu0  ;;  %v3107_v56 = vpop.f32.mrb[11].mxu1 }
 0x259   :  { %v3198_v57 = vsub.f32 0.0, %v3837_v52  ;;  %v3200_v59 = vsub.f32 0.0, %v3839_v24 }
 0x25a   :  { %v3218_v60 = vmul.f32 1.442695, %v3197_v53  ;;  %v3222_v61 = vmul.f32 1.442695, %v3199_v54 }
 0x25b   :  { %v3220_v62 = vmul.f32 1.442695, %v3198_v57  ;;  %v3224_v63 = vmul.f32 1.442695, %v3200_v59 }
 0x25c   :  { %4507 = vpow2.f32 %v3218_v60 }
 0x25d   :  { %4509 = vpow2.f32 %v3222_v61 }
 0x25e   :  { %4511 = vpow2.f32 %v3220_v62 }
 0x25f   :  { %4513 = vpow2.f32 %v3224_v63 }
 0x266   :  { %v4508_v0 = vpop.eup %4507 }
 0x267   :  { %v4510_v1 = vpop.eup %4509  ;;  %v3236_v2 = vadd.f32 1.0, %v4508_v0 }
 0x268   :  { %v4512_v3 = vpop.eup %4511  ;;  %v3238_v4 = vadd.f32 1.0, %v4510_v1 }
 0x269   :  { %v4514_v45 = vpop.eup %4513  ;;  %4515 = vrcp.f32 %v3236_v2  ;;  %v3237_v6 = vadd.f32 1.0, %v4512_v3 }
 0x26a   :  { %4517 = vrcp.f32 %v3238_v4  ;;  %v3239_v7 = vadd.f32 1.0, %v4514_v45 }
 0x26b   :  { %4519 = vrcp.f32 %v3237_v6 }
 0x26c   :  { %4521 = vrcp.f32 %v3239_v7 }
 0x273   :  { %v4516_v8 = vpop.eup %4515 }
 0x274   :  { %v4518_v9 = vpop.eup %4517 }
 0x275   :  { %v4520_v10 = vpop.eup %4519  ;;  %v3800_v11 = vpop.f32.mrb[12].mxu0 }
 0x276   :  { %v3822_v13 = vpop.f32.mrb[12].mxu1  ;;  %v4522_v14 = vpop.eup %4521  ;;  %v3316_v12 = vcombine.low %v4516_v8, %v4520_v10 }
 0x277   :  { %v3801_v15 = vpop.f32.mrb[13].mxu0  ;;  %v3823_v21 = vpop.f32.mrb[13].mxu1  ;;  %v3317_v17 = vcombine.low %v4518_v9, %v4522_v14 }
 0x278   :  { %v3802_v18 = vadd.f32 %v3801_v15, %v3800_v11  ;;  %v3824_v19 = vadd.f32 %v3823_v21, %v3822_v13  ;;  %v3803_v20 = vpop.f32.mrb[14].mxu0  ;;  %v3825_v22 = vpop.f32.mrb[14].mxu1  ;;  %v3324_v23 = vrot.slane %v3316_v12, %v4691_v51 }
 0x279   :  { %v3804_v25 = vpop.f32.mrb[15].mxu0  ;;  %v3826_v26 = vpop.f32.mrb[15].mxu1  ;;  %v3331_v29 = vrot.slane %v3317_v17, %v4691_v51 }
 0x27a   :  { %v3144_v30 = vadd.f32 %v3802_v18, %v5624_v5 }
 0x27b   :  { %v3339_v31 = vcombine.low %v3324_v23, %v3331_v29 }
 0x27c   :  { %v3184_v32 = vadd.f32 %v3824_v19, %v3144_v30 }
 0x27d   :  { %v3346_v40 = vrot.slane %v3339_v31, %v4691_v51 }
 0x27e   :  { %v3201_v33 = vsub.f32 0.0, %v3184_v32 }
 0x280   :  { %v3226_v34 = vmul.f32 1.442695, %v3201_v33 }
 0x282   :  { %4523 = vpow2.f32 %v3226_v34 }
 0x28c   :  { %v4524_v35 = vpop.eup %4523 }
 0x28d   :  { %v3240_v36 = vadd.f32 1.0, %v4524_v35 }
 0x28f   :  { %4525 = vrcp.f32 %v3240_v36 }
 0x299   :  { %v4526_v37 = vpop.eup %4525 }
 0x29a   :  { %v3338_v39 = vrot.slane %v4526_v37, %v4691_v51 }
 0x29c   :  { %v3353_v41 = vrot.slane %v3338_v39, %v4691_v51 }
 0x29e   :  { %v3354_v42 = vcombine.low %v3346_v40, %v3353_v41 }
 0x2a0   :  { %3362 = vst.msk [vmem:[%s5897_s3 + $0x8] sm:$0x1f] %vm3360_vm0, %v3354_v42 }

</bundles_post_ra>
